<compile_context>
chip_gen: v7x
topology: tpu7x:2x2x1
jax: 0.10.0
libtpu: 0.0.40
codegen_flags: <defaults>
</compile_context>

<pallas_src>
import math
import functools

import jax
import jax.numpy as jnp
import numpy as np
from jax import lax
from jax.experimental import pallas as pl
from jax.experimental.pallas import tpu as pltpu


# ---------------------------------------------------------------------------
# Fused MHA kernel: one grid step = (one batch element, one tile of query rows)
# ---------------------------------------------------------------------------
def _mha_kernel(xq_ref, xk_ref, xv_ref, mask_ref,
                wq_ref, bq_ref, wk_ref, bk_ref, wv_ref, bv_ref, wo_ref, bo_ref,
                o_ref, k_cache, v_cache, *, n_heads, d_k, scale):
    f32 = jnp.float32
    bf16 = jnp.bfloat16

    # --- K/V projections: once per batch element, cached across query tiles ---
    @pl.when(pl.program_id(1) == 0)
    def _():
        k = jnp.dot(xk_ref[...], wk_ref[...], preferred_element_type=f32) + bk_ref[...]
        v = jnp.dot(xv_ref[...], wv_ref[...], preferred_element_type=f32) + bv_ref[...]
        k_cache[...] = k.astype(bf16)
        v_cache[...] = v.astype(bf16)

    # --- Q projection for this row tile; fold 1/sqrt(d_k) into q (cheap) ------
    q = jnp.dot(xq_ref[...], wq_ref[...], preferred_element_type=f32) + bq_ref[...]
    q = (q * scale).astype(bf16)                                   # (TQ, D)

    # Key-padding mask, hoisted out of the head loop.  (1, S_kv) bool.
    keep = mask_ref[...] != 0

    # --- per-head attention, accumulated straight into the output projection --
    acc = jnp.zeros((q.shape[0], wo_ref.shape[1]), dtype=f32)      # (TQ, D) f32
    for hh in range(n_heads):
        lo = hh * d_k
        qh = q[:, lo:lo + d_k]                                     # (TQ,   d_k) bf16
        kh = k_cache[:, lo:lo + d_k]                               # (S_kv, d_k) bf16
        vh = v_cache[:, lo:lo + d_k]                               # (S_kv, d_k) bf16

        # contraction on the last dim of both operands -> no explicit K transpose
        s = lax.dot_general(qh, kh, (((1,), (1,)), ((), ())),
                            preferred_element_type=f32)            # (TQ, S_kv) f32
        s = jnp.where(keep, s, f32(-1e9))                          # masked_fill

        # numerically-stable softmax along the key axis (all f32)
        s = s - jnp.max(s, axis=-1, keepdims=True)
        p = jnp.exp(s)
        denom = jnp.sum(p, axis=-1, keepdims=True)
        r = pl.reciprocal(denom, approx=True)                      # EUP seed (free slot)
        r = r * (2.0 - denom * r)                                  # one Newton step -> ~f32 exact

        # normalize AFTER the (TQ, d_k) P.V matmul, not on the (TQ, S_kv) probs
        ctx_h = jnp.dot(p.astype(bf16), vh, preferred_element_type=f32) * r
        acc = acc + jnp.dot(ctx_h.astype(bf16), wo_ref[lo:lo + d_k, :],
                            preferred_element_type=f32)            # (TQ, D)

    o_ref[...] = (acc + bo_ref[...]).astype(o_ref.dtype)


# ---------------------------------------------------------------------------
# Wrapper
# ---------------------------------------------------------------------------
def _tpu_vmem_bytes():
    """Physical VMEM capacity (bytes); conservative fallback = 64 MiB (v7x)."""
    try:
        info = pltpu.get_tpu_info()
        v = getattr(info, "vmem_capacity_bytes", None)
        if v:
            return int(v)
    except Exception:
        pass
    return 64 * 1024 * 1024


def multi_headed_attention(params, query, key, value, mask, *, h, tq=None,
                           single_buffer_constants=True):
    """query: (B, S_q, D); key/value: (B, S_kv, D); mask: (B, 1, S_kv) int (1=keep)."""
    B, Sq, D = query.shape
    Skv = key.shape[1]
    assert D % h == 0
    d_k = D // h
    scale = 1.0 / math.sqrt(d_k)
    f32 = jnp.float32
    bf16 = jnp.bfloat16

    # Generation-aware tiling / VMEM budget (v7x has 64 MiB; v5e/v6e 128 MiB).
    vmem_bytes = _tpu_vmem_bytes()
    if tq is None:
        cap = 256 if vmem_bytes <= 64 * 1024 * 1024 else 512
        tq = min(Sq, cap)
    assert Sq % tq == 0, "query length must be divisible by the row tile"
    vmem_limit = min(int(vmem_bytes * 7 // 8), 100 * 1024 * 1024)

    kernel = functools.partial(_mha_kernel, n_heads=h, d_k=d_k, scale=scale)

    # bf16 MXU operands (f32 accumulation inside the kernel); biases stay f32.
    q_in = query.astype(bf16)
    k_in = key.astype(bf16)
    v_in = value.astype(bf16)
    wq = params["wq"].astype(bf16)
    wk = params["wk"].astype(bf16)
    wv = params["wv"].astype(bf16)
    wo = params["wo"].astype(bf16)
    bq = params["bq"].reshape(1, D).astype(f32)
    bk = params["bk"].reshape(1, D).astype(f32)
    bv = params["bv"].reshape(1, D).astype(f32)
    bo = params["bo"].reshape(1, D).astype(f32)

    # Constant-index operands: single-buffer to halve their VMEM footprint.
    def _const_spec(shape):
        if single_buffer_constants:
            return pl.BlockSpec(shape, lambda b, i: (0, 0),
                                pipeline_mode=pl.Buffered(1))
        return pl.BlockSpec(shape, lambda b, i: (0, 0))

    def _mask_spec():
        if single_buffer_constants:
            return pl.BlockSpec((None, 1, Skv), lambda b, i: (b, 0, 0),
                                pipeline_mode=pl.Buffered(1))
        return pl.BlockSpec((None, 1, Skv), lambda b, i: (b, 0, 0))

    w_spec = _const_spec((D, D))
    b_spec = _const_spec((1, D))

    # Advisory cost estimate for XLA scheduling around the fused kernel.
    flops = (2 * B * Sq * D * D            # Q projection
             + 2 * 2 * B * Skv * D * D     # K, V projections (once per batch)
             + 2 * B * Sq * D * D          # output projection
             + 4 * B * Sq * Skv * D)       # QK^T + P.V over all heads
    transcendentals = B * h * Sq * Skv     # exp
    bytes_accessed = ((q_in.size + k_in.size + v_in.size) * 2
                      + mask.size * 4
                      + 4 * D * D * 2 + 4 * D * 4
                      + B * Sq * D * 4)
    cost = pl.CostEstimate(flops=flops, transcendentals=transcendentals,
                           bytes_accessed=bytes_accessed)

    return pl.pallas_call(
        kernel,
        out_shape=jax.ShapeDtypeStruct((B, Sq, D), query.dtype),
        grid=(B, Sq // tq),
        in_specs=[
            pl.BlockSpec((None, tq, D), lambda b, i: (b, i, 0)),    # query row tile
            pl.BlockSpec((None, Skv, D), lambda b, i: (b, 0, 0)),   # key   (full per batch)
            pl.BlockSpec((None, Skv, D), lambda b, i: (b, 0, 0)),   # value (full per batch)
            _mask_spec(),                                           # mask  (once per batch)
            w_spec, b_spec,   # wq, bq
            w_spec, b_spec,   # wk, bk
            w_spec, b_spec,   # wv, bv
            w_spec, b_spec,   # wo, bo
        ],
        out_specs=pl.BlockSpec((None, tq, D), lambda b, i: (b, i, 0)),
        scratch_shapes=[
            pltpu.VMEM((Skv, D), bf16),   # projected K cache (persists across q tiles)
            pltpu.VMEM((Skv, D), bf16),   # projected V cache
        ],
        compiler_params=pltpu.CompilerParams(
            # batch axis parallel (megacore on v7x); query-tile axis must be
            # "arbitrary" so the per-batch K/V scratch cache is valid.
            dimension_semantics=("parallel", "arbitrary"),
            vmem_limit_bytes=vmem_limit),
        cost_estimate=cost,
    )(q_in, k_in, v_in, mask, wq, bq, wk, bk, wv, bv, wo, bo)


# Pure-JAX reference for verification -----------------------------------------
def reference(params, query, key, value, mask, *, h):
    B, S, d_model = query.shape
    d_k = d_model // h

    def proj(x, w, b):
        return (x @ w + b).reshape(B, -1, h, d_k).transpose(0, 2, 1, 3)

    q = proj(query, params["wq"], params["bq"])
    k = proj(key, params["wk"], params["bk"])
    v = proj(value, params["wv"], params["bv"])
    scores = jnp.einsum("bhqd,bhkd->bhqk", q, k) / math.sqrt(d_k)
    scores = jnp.where(mask[:, None, :, :] == 0, -1e9, scores)
    p = jax.nn.softmax(scores, axis=-1)
    x = jnp.einsum("bhqk,bhkd->bhqd", p, v)
    x = x.transpose(0, 2, 1, 3).reshape(B, -1, d_model)
    return x @ params["wo"] + params["bo"]


# ---------------------------------------------------------------------------
# Main
# ---------------------------------------------------------------------------
if __name__ == "__main__":
    B, S, d_model, h = 2, 8, 32, 4

    key0 = jax.random.PRNGKey(0)
    keys = jax.random.split(key0, 12)
    bound = 1.0 / math.sqrt(d_model)

    def mk_w(k):
        return jax.random.uniform(k, (d_model, d_model), jnp.float32, -bound, bound)

    def mk_b(k):
        return jax.random.uniform(k, (d_model,), jnp.float32, -bound, bound)

    params = {
        "wq": mk_w(keys[0]), "bq": mk_b(keys[1]),
        "wk": mk_w(keys[2]), "bk": mk_b(keys[3]),
        "wv": mk_w(keys[4]), "bv": mk_b(keys[5]),
        "wo": mk_w(keys[6]), "bo": mk_b(keys[7]),
    }

    query = jax.random.normal(keys[8], (B, S, d_model), jnp.float32)
    key_in = jax.random.normal(keys[9], (B, S, d_model), jnp.float32)
    value = jax.random.normal(keys[10], (B, S, d_model), jnp.float32)
    # padding mask: 1 = attend, 0 = masked; mask last 2 key positions of batch 1
    mask = jnp.ones((B, 1, S), dtype=jnp.int32)
    mask = mask.at[1, 0, -2:].set(0)

    try:
        out = multi_headed_attention(params, query, key_in, value, mask, h=h)
    except Exception:
        # Fallback if pipeline_mode=pl.Buffered(1) is unsupported in this JAX build.
        out = multi_headed_attention(params, query, key_in, value, mask, h=h,
                                     single_buffer_constants=False)
    out = jax.block_until_ready(out)

    ref = reference(params, query, key_in, value, mask, h=h)
    # bf16 MXU operands with f32 accumulation -> slightly looser tolerance vs f32 ref.
    np.testing.assert_allclose(np.asarray(out), np.asarray(ref), rtol=2e-2, atol=2e-2)

    print("KERNEL_OK")
</pallas_src>

<mosaic_0001>
module attributes {stable_mosaic.version = 11 : i64} {
  func.func @_mha_kernel(%arg0: i32, %arg1: i32, %arg2: memref<1x8x32xbf16, #tpu.memory_space<vmem>>, %arg3: memref<1x8x32xbf16, #tpu.memory_space<vmem>>, %arg4: memref<1x8x32xbf16, #tpu.memory_space<vmem>>, %arg5: memref<1x1x8xi32, #tpu.memory_space<vmem>>, %arg6: memref<32x32xbf16, #tpu.memory_space<vmem>>, %arg7: memref<1x32xf32, #tpu.memory_space<vmem>>, %arg8: memref<32x32xbf16, #tpu.memory_space<vmem>>, %arg9: memref<1x32xf32, #tpu.memory_space<vmem>>, %arg10: memref<32x32xbf16, #tpu.memory_space<vmem>>, %arg11: memref<1x32xf32, #tpu.memory_space<vmem>>, %arg12: memref<32x32xbf16, #tpu.memory_space<vmem>>, %arg13: memref<1x32xf32, #tpu.memory_space<vmem>>, %arg14: memref<1x8x32xf32, #tpu.memory_space<vmem>>, %arg15: memref<8x32xbf16, #tpu.memory_space<vmem>>, %arg16: memref<8x32xbf16, #tpu.memory_space<vmem>>) attributes {dimension_semantics = [#tpu.dimension_semantics<parallel>, #tpu.dimension_semantics<arbitrary>], iteration_bounds = array<i64: 2, 1>, scalar_prefetch = 0 : i64, scratch_operands = 2 : i64, tpu.core_type = #tpu.core_type<tc>, window_params = [{transform_indices = @transform_0, window_bounds = array<i64: 1, 8, 32>}, {transform_indices = @transform_1, window_bounds = array<i64: 1, 8, 32>}, {transform_indices = @transform_2, window_bounds = array<i64: 1, 8, 32>}, {pipeline_mode = #tpu.pipeline_mode<synchronous>, transform_indices = @transform_3, window_bounds = array<i64: 1, 1, 8>}, {pipeline_mode = #tpu.pipeline_mode<synchronous>, transform_indices = @transform_4, window_bounds = array<i64: 32, 32>}, {pipeline_mode = #tpu.pipeline_mode<synchronous>, transform_indices = @transform_5, window_bounds = array<i64: 1, 32>}, {pipeline_mode = #tpu.pipeline_mode<synchronous>, transform_indices = @transform_6, window_bounds = array<i64: 32, 32>}, {pipeline_mode = #tpu.pipeline_mode<synchronous>, transform_indices = @transform_7, window_bounds = array<i64: 1, 32>}, {pipeline_mode = #tpu.pipeline_mode<synchronous>, transform_indices = @transform_8, window_bounds = array<i64: 32, 32>}, {pipeline_mode = #tpu.pipeline_mode<synchronous>, transform_indices = @transform_9, window_bounds = array<i64: 1, 32>}, {pipeline_mode = #tpu.pipeline_mode<synchronous>, transform_indices = @transform_10, window_bounds = array<i64: 32, 32>}, {pipeline_mode = #tpu.pipeline_mode<synchronous>, transform_indices = @transform_11, window_bounds = array<i64: 1, 32>}, {transform_indices = @transform_12, window_bounds = array<i64: 1, 8, 32>}]} {
    %c0_i32 = arith.constant 0 : i32
    %0 = arith.cmpi eq, %arg1, %c0_i32 : i32
    %1 = arith.extui %0 : i1 to i32
    %c0_i32_0 = arith.constant 0 : i32
    %2 = arith.cmpi ne, %1, %c0_i32_0 : i32
    scf.if %2 {
      %c0_67 = arith.constant 0 : index
      %c0_68 = arith.constant 0 : index
      %c0_69 = arith.constant 0 : index
      %136 = vector.load %arg3[%c0_67, %c0_68, %c0_69] : memref<1x8x32xbf16, #tpu.memory_space<vmem>>, vector<1x8x32xbf16>
      %137 = vector.shape_cast %136 : vector<1x8x32xbf16> to vector<8x32xbf16>
      %c0_70 = arith.constant 0 : index
      %c0_71 = arith.constant 0 : index
      %138 = vector.load %arg8[%c0_70, %c0_71] : memref<32x32xbf16, #tpu.memory_space<vmem>>, vector<32x32xbf16>
      %cst_72 = arith.constant dense<0.000000e+00> : vector<8x32xf32>
      %139 = tpu.matmul %137, %138, %cst_72 {dimension_numbers = #tpu.dot_dimension_numbers<[1], [0], [0], [1], [0, 0, 1, 1], [], []>} : vector<8x32xbf16>, vector<32x32xbf16>, vector<8x32xf32> -> vector<8x32xf32>
      %c0_73 = arith.constant 0 : index
      %c0_74 = arith.constant 0 : index
      %140 = vector.load %arg9[%c0_73, %c0_74] : memref<1x32xf32, #tpu.memory_space<vmem>>, vector<1x32xf32>
      %141 = vector.broadcast %140 : vector<1x32xf32> to vector<8x32xf32>
      %142 = arith.addf %139, %141 : vector<8x32xf32>
      %c0_75 = arith.constant 0 : index
      %c0_76 = arith.constant 0 : index
      %c0_77 = arith.constant 0 : index
      %143 = vector.load %arg4[%c0_75, %c0_76, %c0_77] : memref<1x8x32xbf16, #tpu.memory_space<vmem>>, vector<1x8x32xbf16>
      %144 = vector.shape_cast %143 : vector<1x8x32xbf16> to vector<8x32xbf16>
      %c0_78 = arith.constant 0 : index
      %c0_79 = arith.constant 0 : index
      %145 = vector.load %arg10[%c0_78, %c0_79] : memref<32x32xbf16, #tpu.memory_space<vmem>>, vector<32x32xbf16>
      %cst_80 = arith.constant dense<0.000000e+00> : vector<8x32xf32>
      %146 = tpu.matmul %144, %145, %cst_80 {dimension_numbers = #tpu.dot_dimension_numbers<[1], [0], [0], [1], [0, 0, 1, 1], [], []>} : vector<8x32xbf16>, vector<32x32xbf16>, vector<8x32xf32> -> vector<8x32xf32>
      %c0_81 = arith.constant 0 : index
      %c0_82 = arith.constant 0 : index
      %147 = vector.load %arg11[%c0_81, %c0_82] : memref<1x32xf32, #tpu.memory_space<vmem>>, vector<1x32xf32>
      %148 = vector.broadcast %147 : vector<1x32xf32> to vector<8x32xf32>
      %149 = arith.addf %146, %148 : vector<8x32xf32>
      %150 = arith.truncf %142 : vector<8x32xf32> to vector<8x32xbf16>
      %c0_83 = arith.constant 0 : index
      %c0_84 = arith.constant 0 : index
      %151 = vector.load %arg15[%c0_83, %c0_84] : memref<8x32xbf16, #tpu.memory_space<vmem>>, vector<8x32xbf16>
      tpu.vector_store %arg15[%c0_83, %c0_84], %150 {strides = array<i32>} : memref<8x32xbf16, #tpu.memory_space<vmem>>, vector<8x32xbf16>,
      %152 = arith.truncf %149 : vector<8x32xf32> to vector<8x32xbf16>
      %c0_85 = arith.constant 0 : index
      %c0_86 = arith.constant 0 : index
      %153 = vector.load %arg16[%c0_85, %c0_86] : memref<8x32xbf16, #tpu.memory_space<vmem>>, vector<8x32xbf16>
      tpu.vector_store %arg16[%c0_85, %c0_86], %152 {strides = array<i32>} : memref<8x32xbf16, #tpu.memory_space<vmem>>, vector<8x32xbf16>,
    } else {
    }
    %c0 = arith.constant 0 : index
    %c0_1 = arith.constant 0 : index
    %c0_2 = arith.constant 0 : index
    %3 = vector.load %arg2[%c0, %c0_1, %c0_2] : memref<1x8x32xbf16, #tpu.memory_space<vmem>>, vector<1x8x32xbf16>
    %4 = vector.shape_cast %3 : vector<1x8x32xbf16> to vector<8x32xbf16>
    %c0_3 = arith.constant 0 : index
    %c0_4 = arith.constant 0 : index
    %5 = vector.load %arg6[%c0_3, %c0_4] : memref<32x32xbf16, #tpu.memory_space<vmem>>, vector<32x32xbf16>
    %cst = arith.constant dense<0.000000e+00> : vector<8x32xf32>
    %6 = tpu.matmul %4, %5, %cst {dimension_numbers = #tpu.dot_dimension_numbers<[1], [0], [0], [1], [0, 0, 1, 1], [], []>} : vector<8x32xbf16>, vector<32x32xbf16>, vector<8x32xf32> -> vector<8x32xf32>
    %c0_5 = arith.constant 0 : index
    %c0_6 = arith.constant 0 : index
    %7 = vector.load %arg7[%c0_5, %c0_6] : memref<1x32xf32, #tpu.memory_space<vmem>>, vector<1x32xf32>
    %8 = vector.broadcast %7 : vector<1x32xf32> to vector<8x32xf32>
    %9 = arith.addf %6, %8 : vector<8x32xf32>
    %cst_7 = arith.constant 0.353553385 : f32
    %10 = vector.broadcast %cst_7 : f32 to vector<8x32xf32>
    %11 = arith.mulf %9, %10 : vector<8x32xf32>
    %12 = arith.truncf %11 : vector<8x32xf32> to vector<8x32xbf16>
    %c0_8 = arith.constant 0 : index
    %c0_9 = arith.constant 0 : index
    %c0_10 = arith.constant 0 : index
    %13 = vector.load %arg5[%c0_8, %c0_9, %c0_10] : memref<1x1x8xi32, #tpu.memory_space<vmem>>, vector<1x1x8xi32>
    %14 = vector.shape_cast %13 : vector<1x1x8xi32> to vector<1x8xi32>
    %c0_i32_11 = arith.constant 0 : i32
    %15 = vector.broadcast %c0_i32_11 : i32 to vector<1x8xi32>
    %16 = arith.cmpi ne, %14, %15 : vector<1x8xi32>
    %cst_12 = arith.constant 0.000000e+00 : f32
    %17 = vector.broadcast %cst_12 : f32 to vector<8x32xf32>
    %18 = vector.extract_strided_slice %12 {offsets = [0, 0], sizes = [8, 8], strides = [1, 1]} : vector<8x32xbf16> to vector<8x8xbf16>
    %c0_13 = arith.constant 0 : index
    %c0_14 = arith.constant 0 : index
    %19 = vector.load %arg15[%c0_13, %c0_14] : memref<8x32xbf16, #tpu.memory_space<vmem>>, vector<8x8xbf16>
    %c0_15 = arith.constant 0 : index
    %c0_16 = arith.constant 0 : index
    %20 = vector.load %arg16[%c0_15, %c0_16] : memref<8x32xbf16, #tpu.memory_space<vmem>>, vector<8x8xbf16>
    %cst_17 = arith.constant dense<0.000000e+00> : vector<8x8xf32>
    %21 = tpu.matmul %18, %19, %cst_17 {dimension_numbers = #tpu.dot_dimension_numbers<[1], [1], [0], [0], [0, 0, 1, 0], [], []>} : vector<8x8xbf16>, vector<8x8xbf16>, vector<8x8xf32> -> vector<8x8xf32>
    %cst_18 = arith.constant -1.000000e+09 : f32
    %22 = vector.shape_cast %16 : vector<1x8xi1> to vector<1x8xi1>
    %23 = vector.broadcast %22 : vector<1x8xi1> to vector<8x8xi1>
    %24 = vector.broadcast %cst_18 : f32 to vector<8x8xf32>
    %25 = arith.select %23, %21, %24 : vector<8x8xi1>, vector<8x8xf32>
    %cst_19 = arith.constant dense<0xFF800000> : vector<8xf32>
    %26 = vector.multi_reduction <maximumf>, %25, %cst_19 [1] : vector<8x8xf32> to vector<8xf32>
    %27 = vector.shape_cast %26 : vector<8xf32> to vector<8x1xf32>
    %28 = vector.broadcast %27 : vector<8x1xf32> to vector<8x8xf32>
    %29 = arith.subf %25, %28 : vector<8x8xf32>
    %30 = math.exp %29 : vector<8x8xf32>
    %cst_20 = arith.constant dense<0.000000e+00> : vector<8xf32>
    %31 = vector.multi_reduction <add>, %30, %cst_20 [1] : vector<8x8xf32> to vector<8xf32>
    %32 = vector.shape_cast %31 : vector<8xf32> to vector<8x1xf32>
    %33 = tpu.reciprocal %32 {approx = true} : vector<8x1xf32> -> vector<8x1xf32>
    %34 = arith.mulf %32, %33 : vector<8x1xf32>
    %cst_21 = arith.constant 2.000000e+00 : f32
    %35 = vector.broadcast %cst_21 : f32 to vector<8x1xf32>
    %36 = arith.subf %35, %34 : vector<8x1xf32>
    %37 = arith.mulf %33, %36 : vector<8x1xf32>
    %38 = arith.truncf %30 : vector<8x8xf32> to vector<8x8xbf16>
    %cst_22 = arith.constant dense<0.000000e+00> : vector<8x8xf32>
    %39 = tpu.matmul %38, %20, %cst_22 {dimension_numbers = #tpu.dot_dimension_numbers<[1], [0], [0], [1], [0, 0, 1, 1], [], []>} : vector<8x8xbf16>, vector<8x8xbf16>, vector<8x8xf32> -> vector<8x8xf32>
    %40 = vector.broadcast %37 : vector<8x1xf32> to vector<8x8xf32>
    %41 = arith.mulf %39, %40 : vector<8x8xf32>
    %42 = arith.truncf %41 : vector<8x8xf32> to vector<8x8xbf16>
    %c0_23 = arith.constant 0 : index
    %c0_24 = arith.constant 0 : index
    %43 = vector.load %arg12[%c0_23, %c0_24] : memref<32x32xbf16, #tpu.memory_space<vmem>>, vector<8x32xbf16>
    %cst_25 = arith.constant dense<0.000000e+00> : vector<8x32xf32>
    %44 = tpu.matmul %42, %43, %cst_25 {dimension_numbers = #tpu.dot_dimension_numbers<[1], [0], [0], [1], [0, 0, 1, 1], [], []>} : vector<8x8xbf16>, vector<8x32xbf16>, vector<8x32xf32> -> vector<8x32xf32>
    %45 = arith.addf %17, %44 : vector<8x32xf32>
    %46 = vector.extract_strided_slice %12 {offsets = [0, 8], sizes = [8, 8], strides = [1, 1]} : vector<8x32xbf16> to vector<8x8xbf16>
    %c0_26 = arith.constant 0 : index
    %c8 = arith.constant 8 : index
    %47 = vector.load %arg15[%c0_26, %c8] : memref<8x32xbf16, #tpu.memory_space<vmem>>, vector<8x8xbf16>
    %c0_27 = arith.constant 0 : index
    %c8_28 = arith.constant 8 : index
    %48 = vector.load %arg16[%c0_27, %c8_28] : memref<8x32xbf16, #tpu.memory_space<vmem>>, vector<8x8xbf16>
    %cst_29 = arith.constant dense<0.000000e+00> : vector<8x8xf32>
    %49 = tpu.matmul %46, %47, %cst_29 {dimension_numbers = #tpu.dot_dimension_numbers<[1], [1], [0], [0], [0, 0, 1, 0], [], []>} : vector<8x8xbf16>, vector<8x8xbf16>, vector<8x8xf32> -> vector<8x8xf32>
    %cst_30 = arith.constant -1.000000e+09 : f32
    %50 = vector.shape_cast %16 : vector<1x8xi1> to vector<1x8xi1>
    %51 = vector.broadcast %50 : vector<1x8xi1> to vector<8x8xi1>
    %52 = vector.broadcast %cst_30 : f32 to vector<8x8xf32>
    %53 = arith.select %51, %49, %52 : vector<8x8xi1>, vector<8x8xf32>
    %cst_31 = arith.constant dense<0xFF800000> : vector<8xf32>
    %54 = vector.multi_reduction <maximumf>, %53, %cst_31 [1] : vector<8x8xf32> to vector<8xf32>
    %55 = vector.shape_cast %54 : vector<8xf32> to vector<8x1xf32>
    %56 = vector.broadcast %55 : vector<8x1xf32> to vector<8x8xf32>
    %57 = arith.subf %53, %56 : vector<8x8xf32>
    %58 = math.exp %57 : vector<8x8xf32>
    %cst_32 = arith.constant dense<0.000000e+00> : vector<8xf32>
    %59 = vector.multi_reduction <add>, %58, %cst_32 [1] : vector<8x8xf32> to vector<8xf32>
    %60 = vector.shape_cast %59 : vector<8xf32> to vector<8x1xf32>
    %61 = tpu.reciprocal %60 {approx = true} : vector<8x1xf32> -> vector<8x1xf32>
    %62 = arith.mulf %60, %61 : vector<8x1xf32>
    %cst_33 = arith.constant 2.000000e+00 : f32
    %63 = vector.broadcast %cst_33 : f32 to vector<8x1xf32>
    %64 = arith.subf %63, %62 : vector<8x1xf32>
    %65 = arith.mulf %61, %64 : vector<8x1xf32>
    %66 = arith.truncf %58 : vector<8x8xf32> to vector<8x8xbf16>
    %cst_34 = arith.constant dense<0.000000e+00> : vector<8x8xf32>
    %67 = tpu.matmul %66, %48, %cst_34 {dimension_numbers = #tpu.dot_dimension_numbers<[1], [0], [0], [1], [0, 0, 1, 1], [], []>} : vector<8x8xbf16>, vector<8x8xbf16>, vector<8x8xf32> -> vector<8x8xf32>
    %68 = vector.broadcast %65 : vector<8x1xf32> to vector<8x8xf32>
    %69 = arith.mulf %67, %68 : vector<8x8xf32>
    %70 = arith.truncf %69 : vector<8x8xf32> to vector<8x8xbf16>
    %c8_35 = arith.constant 8 : index
    %c0_36 = arith.constant 0 : index
    %71 = vector.load %arg12[%c8_35, %c0_36] : memref<32x32xbf16, #tpu.memory_space<vmem>>, vector<8x32xbf16>
    %cst_37 = arith.constant dense<0.000000e+00> : vector<8x32xf32>
    %72 = tpu.matmul %70, %71, %cst_37 {dimension_numbers = #tpu.dot_dimension_numbers<[1], [0], [0], [1], [0, 0, 1, 1], [], []>} : vector<8x8xbf16>, vector<8x32xbf16>, vector<8x32xf32> -> vector<8x32xf32>
    %73 = arith.addf %45, %72 : vector<8x32xf32>
    %74 = vector.extract_strided_slice %12 {offsets = [0, 16], sizes = [8, 8], strides = [1, 1]} : vector<8x32xbf16> to vector<8x8xbf16>
    %c0_38 = arith.constant 0 : index
    %c16 = arith.constant 16 : index
    %75 = vector.load %arg15[%c0_38, %c16] : memref<8x32xbf16, #tpu.memory_space<vmem>>, vector<8x8xbf16>
    %c0_39 = arith.constant 0 : index
    %c16_40 = arith.constant 16 : index
    %76 = vector.load %arg16[%c0_39, %c16_40] : memref<8x32xbf16, #tpu.memory_space<vmem>>, vector<8x8xbf16>
    %cst_41 = arith.constant dense<0.000000e+00> : vector<8x8xf32>
    %77 = tpu.matmul %74, %75, %cst_41 {dimension_numbers = #tpu.dot_dimension_numbers<[1], [1], [0], [0], [0, 0, 1, 0], [], []>} : vector<8x8xbf16>, vector<8x8xbf16>, vector<8x8xf32> -> vector<8x8xf32>
    %cst_42 = arith.constant -1.000000e+09 : f32
    %78 = vector.shape_cast %16 : vector<1x8xi1> to vector<1x8xi1>
    %79 = vector.broadcast %78 : vector<1x8xi1> to vector<8x8xi1>
    %80 = vector.broadcast %cst_42 : f32 to vector<8x8xf32>
    %81 = arith.select %79, %77, %80 : vector<8x8xi1>, vector<8x8xf32>
    %cst_43 = arith.constant dense<0xFF800000> : vector<8xf32>
    %82 = vector.multi_reduction <maximumf>, %81, %cst_43 [1] : vector<8x8xf32> to vector<8xf32>
    %83 = vector.shape_cast %82 : vector<8xf32> to vector<8x1xf32>
    %84 = vector.broadcast %83 : vector<8x1xf32> to vector<8x8xf32>
    %85 = arith.subf %81, %84 : vector<8x8xf32>
    %86 = math.exp %85 : vector<8x8xf32>
    %cst_44 = arith.constant dense<0.000000e+00> : vector<8xf32>
    %87 = vector.multi_reduction <add>, %86, %cst_44 [1] : vector<8x8xf32> to vector<8xf32>
    %88 = vector.shape_cast %87 : vector<8xf32> to vector<8x1xf32>
    %89 = tpu.reciprocal %88 {approx = true} : vector<8x1xf32> -> vector<8x1xf32>
    %90 = arith.mulf %88, %89 : vector<8x1xf32>
    %cst_45 = arith.constant 2.000000e+00 : f32
    %91 = vector.broadcast %cst_45 : f32 to vector<8x1xf32>
    %92 = arith.subf %91, %90 : vector<8x1xf32>
    %93 = arith.mulf %89, %92 : vector<8x1xf32>
    %94 = arith.truncf %86 : vector<8x8xf32> to vector<8x8xbf16>
    %cst_46 = arith.constant dense<0.000000e+00> : vector<8x8xf32>
    %95 = tpu.matmul %94, %76, %cst_46 {dimension_numbers = #tpu.dot_dimension_numbers<[1], [0], [0], [1], [0, 0, 1, 1], [], []>} : vector<8x8xbf16>, vector<8x8xbf16>, vector<8x8xf32> -> vector<8x8xf32>
    %96 = vector.broadcast %93 : vector<8x1xf32> to vector<8x8xf32>
    %97 = arith.mulf %95, %96 : vector<8x8xf32>
    %98 = arith.truncf %97 : vector<8x8xf32> to vector<8x8xbf16>
    %c16_47 = arith.constant 16 : index
    %c0_48 = arith.constant 0 : index
    %99 = vector.load %arg12[%c16_47, %c0_48] : memref<32x32xbf16, #tpu.memory_space<vmem>>, vector<8x32xbf16>
    %cst_49 = arith.constant dense<0.000000e+00> : vector<8x32xf32>
    %100 = tpu.matmul %98, %99, %cst_49 {dimension_numbers = #tpu.dot_dimension_numbers<[1], [0], [0], [1], [0, 0, 1, 1], [], []>} : vector<8x8xbf16>, vector<8x32xbf16>, vector<8x32xf32> -> vector<8x32xf32>
    %101 = arith.addf %73, %100 : vector<8x32xf32>
    %102 = vector.extract_strided_slice %12 {offsets = [0, 24], sizes = [8, 8], strides = [1, 1]} : vector<8x32xbf16> to vector<8x8xbf16>
    %c0_50 = arith.constant 0 : index
    %c24 = arith.constant 24 : index
    %103 = vector.load %arg15[%c0_50, %c24] : memref<8x32xbf16, #tpu.memory_space<vmem>>, vector<8x8xbf16>
    %c0_51 = arith.constant 0 : index
    %c24_52 = arith.constant 24 : index
    %104 = vector.load %arg16[%c0_51, %c24_52] : memref<8x32xbf16, #tpu.memory_space<vmem>>, vector<8x8xbf16>
    %cst_53 = arith.constant dense<0.000000e+00> : vector<8x8xf32>
    %105 = tpu.matmul %102, %103, %cst_53 {dimension_numbers = #tpu.dot_dimension_numbers<[1], [1], [0], [0], [0, 0, 1, 0], [], []>} : vector<8x8xbf16>, vector<8x8xbf16>, vector<8x8xf32> -> vector<8x8xf32>
    %cst_54 = arith.constant -1.000000e+09 : f32
    %106 = vector.shape_cast %16 : vector<1x8xi1> to vector<1x8xi1>
    %107 = vector.broadcast %106 : vector<1x8xi1> to vector<8x8xi1>
    %108 = vector.broadcast %cst_54 : f32 to vector<8x8xf32>
    %109 = arith.select %107, %105, %108 : vector<8x8xi1>, vector<8x8xf32>
    %cst_55 = arith.constant dense<0xFF800000> : vector<8xf32>
    %110 = vector.multi_reduction <maximumf>, %109, %cst_55 [1] : vector<8x8xf32> to vector<8xf32>
    %111 = vector.shape_cast %110 : vector<8xf32> to vector<8x1xf32>
    %112 = vector.broadcast %111 : vector<8x1xf32> to vector<8x8xf32>
    %113 = arith.subf %109, %112 : vector<8x8xf32>
    %114 = math.exp %113 : vector<8x8xf32>
    %cst_56 = arith.constant dense<0.000000e+00> : vector<8xf32>
    %115 = vector.multi_reduction <add>, %114, %cst_56 [1] : vector<8x8xf32> to vector<8xf32>
    %116 = vector.shape_cast %115 : vector<8xf32> to vector<8x1xf32>
    %117 = tpu.reciprocal %116 {approx = true} : vector<8x1xf32> -> vector<8x1xf32>
    %118 = arith.mulf %116, %117 : vector<8x1xf32>
    %cst_57 = arith.constant 2.000000e+00 : f32
    %119 = vector.broadcast %cst_57 : f32 to vector<8x1xf32>
    %120 = arith.subf %119, %118 : vector<8x1xf32>
    %121 = arith.mulf %117, %120 : vector<8x1xf32>
    %122 = arith.truncf %114 : vector<8x8xf32> to vector<8x8xbf16>
    %cst_58 = arith.constant dense<0.000000e+00> : vector<8x8xf32>
    %123 = tpu.matmul %122, %104, %cst_58 {dimension_numbers = #tpu.dot_dimension_numbers<[1], [0], [0], [1], [0, 0, 1, 1], [], []>} : vector<8x8xbf16>, vector<8x8xbf16>, vector<8x8xf32> -> vector<8x8xf32>
    %124 = vector.broadcast %121 : vector<8x1xf32> to vector<8x8xf32>
    %125 = arith.mulf %123, %124 : vector<8x8xf32>
    %126 = arith.truncf %125 : vector<8x8xf32> to vector<8x8xbf16>
    %c24_59 = arith.constant 24 : index
    %c0_60 = arith.constant 0 : index
    %127 = vector.load %arg12[%c24_59, %c0_60] : memref<32x32xbf16, #tpu.memory_space<vmem>>, vector<8x32xbf16>
    %cst_61 = arith.constant dense<0.000000e+00> : vector<8x32xf32>
    %128 = tpu.matmul %126, %127, %cst_61 {dimension_numbers = #tpu.dot_dimension_numbers<[1], [0], [0], [1], [0, 0, 1, 1], [], []>} : vector<8x8xbf16>, vector<8x32xbf16>, vector<8x32xf32> -> vector<8x32xf32>
    %129 = arith.addf %101, %128 : vector<8x32xf32>
    %c0_62 = arith.constant 0 : index
    %c0_63 = arith.constant 0 : index
    %130 = vector.load %arg13[%c0_62, %c0_63] : memref<1x32xf32, #tpu.memory_space<vmem>>, vector<1x32xf32>
    %131 = vector.broadcast %130 : vector<1x32xf32> to vector<8x32xf32>
    %132 = arith.addf %129, %131 : vector<8x32xf32>
    %c0_64 = arith.constant 0 : index
    %c0_65 = arith.constant 0 : index
    %c0_66 = arith.constant 0 : index
    %133 = vector.load %arg14[%c0_64, %c0_65, %c0_66] : memref<1x8x32xf32, #tpu.memory_space<vmem>>, vector<1x8x32xf32>
    %134 = vector.shape_cast %133 : vector<1x8x32xf32> to vector<8x32xf32>
    %135 = vector.shape_cast %132 : vector<8x32xf32> to vector<1x8x32xf32>
    tpu.vector_store %arg14[%c0_64, %c0_65, %c0_66], %135 {strides = array<i32>} : memref<1x8x32xf32, #tpu.memory_space<vmem>>, vector<1x8x32xf32>,
    return
  }
  func.func @transform_0(%arg0: i32, %arg1: i32) -> (i32, i32, i32) {
    %c0_i32 = arith.constant 0 : i32
    %c0_i32_0 = arith.constant 0 : i32
    return %arg0, %arg1, %c0_i32 : i32, i32, i32
  }
  func.func @transform_1(%arg0: i32, %arg1: i32) -> (i32, i32, i32) {
    %c0_i32 = arith.constant 0 : i32
    %c0_i32_0 = arith.constant 0 : i32
    %c0_i32_1 = arith.constant 0 : i32
    return %arg0, %c0_i32, %c0_i32_0 : i32, i32, i32
  }
  func.func @transform_2(%arg0: i32, %arg1: i32) -> (i32, i32, i32) {
    %c0_i32 = arith.constant 0 : i32
    %c0_i32_0 = arith.constant 0 : i32
    %c0_i32_1 = arith.constant 0 : i32
    return %arg0, %c0_i32, %c0_i32_0 : i32, i32, i32
  }
  func.func @transform_3(%arg0: i32, %arg1: i32) -> (i32, i32, i32) {
    %c0_i32 = arith.constant 0 : i32
    %c0_i32_0 = arith.constant 0 : i32
    %c0_i32_1 = arith.constant 0 : i32
    return %arg0, %c0_i32, %c0_i32_0 : i32, i32, i32
  }
  func.func @transform_4(%arg0: i32, %arg1: i32) -> (i32, i32) {
    %c0_i32 = arith.constant 0 : i32
    %c0_i32_0 = arith.constant 0 : i32
    %c0_i32_1 = arith.constant 0 : i32
    return %c0_i32, %c0_i32_0 : i32, i32
  }
  func.func @transform_5(%arg0: i32, %arg1: i32) -> (i32, i32) {
    %c0_i32 = arith.constant 0 : i32
    %c0_i32_0 = arith.constant 0 : i32
    %c0_i32_1 = arith.constant 0 : i32
    return %c0_i32, %c0_i32_0 : i32, i32
  }
  func.func @transform_6(%arg0: i32, %arg1: i32) -> (i32, i32) {
    %c0_i32 = arith.constant 0 : i32
    %c0_i32_0 = arith.constant 0 : i32
    %c0_i32_1 = arith.constant 0 : i32
    return %c0_i32, %c0_i32_0 : i32, i32
  }
  func.func @transform_7(%arg0: i32, %arg1: i32) -> (i32, i32) {
    %c0_i32 = arith.constant 0 : i32
    %c0_i32_0 = arith.constant 0 : i32
    %c0_i32_1 = arith.constant 0 : i32
    return %c0_i32, %c0_i32_0 : i32, i32
  }
  func.func @transform_8(%arg0: i32, %arg1: i32) -> (i32, i32) {
    %c0_i32 = arith.constant 0 : i32
    %c0_i32_0 = arith.constant 0 : i32
    %c0_i32_1 = arith.constant 0 : i32
    return %c0_i32, %c0_i32_0 : i32, i32
  }
  func.func @transform_9(%arg0: i32, %arg1: i32) -> (i32, i32) {
    %c0_i32 = arith.constant 0 : i32
    %c0_i32_0 = arith.constant 0 : i32
    %c0_i32_1 = arith.constant 0 : i32
    return %c0_i32, %c0_i32_0 : i32, i32
  }
  func.func @transform_10(%arg0: i32, %arg1: i32) -> (i32, i32) {
    %c0_i32 = arith.constant 0 : i32
    %c0_i32_0 = arith.constant 0 : i32
    %c0_i32_1 = arith.constant 0 : i32
    return %c0_i32, %c0_i32_0 : i32, i32
  }
  func.func @transform_11(%arg0: i32, %arg1: i32) -> (i32, i32) {
    %c0_i32 = arith.constant 0 : i32
    %c0_i32_0 = arith.constant 0 : i32
    %c0_i32_1 = arith.constant 0 : i32
    return %c0_i32, %c0_i32_0 : i32, i32
  }
  func.func @transform_12(%arg0: i32, %arg1: i32) -> (i32, i32, i32) {
    %c0_i32 = arith.constant 0 : i32
    %c0_i32_0 = arith.constant 0 : i32
    return %arg0, %arg1, %c0_i32 : i32, i32, i32
  }
}

module attributes {stable_mosaic.version = 11 : i64} {
  func.func @_mha_kernel(%arg0: i32, %arg1: i32, %arg2: memref<1x8x32xbf16, #tpu.memory_space<vmem>>, %arg3: memref<1x8x32xbf16, #tpu.memory_space<vmem>>, %arg4: memref<1x8x32xbf16, #tpu.memory_space<vmem>>, %arg5: memref<1x1x8xi32, #tpu.memory_space<vmem>>, %arg6: memref<32x32xbf16, #tpu.memory_space<vmem>>, %arg7: memref<1x32xf32, #tpu.memory_space<vmem>>, %arg8: memref<32x32xbf16, #tpu.memory_space<vmem>>, %arg9: memref<1x32xf32, #tpu.memory_space<vmem>>, %arg10: memref<32x32xbf16, #tpu.memory_space<vmem>>, %arg11: memref<1x32xf32, #tpu.memory_space<vmem>>, %arg12: memref<32x32xbf16, #tpu.memory_space<vmem>>, %arg13: memref<1x32xf32, #tpu.memory_space<vmem>>, %arg14: memref<1x8x32xf32, #tpu.memory_space<vmem>>, %arg15: memref<8x32xbf16, #tpu.memory_space<vmem>>, %arg16: memref<8x32xbf16, #tpu.memory_space<vmem>>) attributes {dimension_semantics = [#tpu.dimension_semantics<parallel>, #tpu.dimension_semantics<arbitrary>], iteration_bounds = array<i64: 2, 1>, scalar_prefetch = 0 : i64, scratch_operands = 2 : i64, tpu.core_type = #tpu.core_type<tc>, window_params = [{transform_indices = @transform_0, window_bounds = array<i64: 1, 8, 32>}, {transform_indices = @transform_1, window_bounds = array<i64: 1, 8, 32>}, {transform_indices = @transform_2, window_bounds = array<i64: 1, 8, 32>}, {transform_indices = @transform_3, window_bounds = array<i64: 1, 1, 8>}, {pipeline_mode = #tpu.pipeline_mode<synchronous>, transform_indices = @transform_4, window_bounds = array<i64: 32, 32>}, {pipeline_mode = #tpu.pipeline_mode<synchronous>, transform_indices = @transform_5, window_bounds = array<i64: 1, 32>}, {pipeline_mode = #tpu.pipeline_mode<synchronous>, transform_indices = @transform_6, window_bounds = array<i64: 32, 32>}, {pipeline_mode = #tpu.pipeline_mode<synchronous>, transform_indices = @transform_7, window_bounds = array<i64: 1, 32>}, {pipeline_mode = #tpu.pipeline_mode<synchronous>, transform_indices = @transform_8, window_bounds = array<i64: 32, 32>}, {pipeline_mode = #tpu.pipeline_mode<synchronous>, transform_indices = @transform_9, window_bounds = array<i64: 1, 32>}, {pipeline_mode = #tpu.pipeline_mode<synchronous>, transform_indices = @transform_10, window_bounds = array<i64: 32, 32>}, {pipeline_mode = #tpu.pipeline_mode<synchronous>, transform_indices = @transform_11, window_bounds = array<i64: 1, 32>}, {transform_indices = @transform_12, window_bounds = array<i64: 1, 8, 32>}]} {
    %c0_i32 = arith.constant 0 : i32
    %0 = arith.cmpi eq, %arg1, %c0_i32 : i32
    %1 = arith.extui %0 : i1 to i32
    %c0_i32_0 = arith.constant 0 : i32
    %2 = arith.cmpi ne, %1, %c0_i32_0 : i32
    scf.if %2 {
      %c0_67 = arith.constant 0 : index
      %c0_68 = arith.constant 0 : index
      %c0_69 = arith.constant 0 : index
      %136 = vector.load %arg3[%c0_67, %c0_68, %c0_69] : memref<1x8x32xbf16, #tpu.memory_space<vmem>>, vector<1x8x32xbf16>
      %137 = vector.shape_cast %136 : vector<1x8x32xbf16> to vector<8x32xbf16>
      %c0_70 = arith.constant 0 : index
      %c0_71 = arith.constant 0 : index
      %138 = vector.load %arg8[%c0_70, %c0_71] : memref<32x32xbf16, #tpu.memory_space<vmem>>, vector<32x32xbf16>
      %cst_72 = arith.constant dense<0.000000e+00> : vector<8x32xf32>
      %139 = tpu.matmul %137, %138, %cst_72 {dimension_numbers = #tpu.dot_dimension_numbers<[1], [0], [0], [1], [0, 0, 1, 1], [], []>} : vector<8x32xbf16>, vector<32x32xbf16>, vector<8x32xf32> -> vector<8x32xf32>
      %c0_73 = arith.constant 0 : index
      %c0_74 = arith.constant 0 : index
      %140 = vector.load %arg9[%c0_73, %c0_74] : memref<1x32xf32, #tpu.memory_space<vmem>>, vector<1x32xf32>
      %141 = vector.broadcast %140 : vector<1x32xf32> to vector<8x32xf32>
      %142 = arith.addf %139, %141 : vector<8x32xf32>
      %c0_75 = arith.constant 0 : index
      %c0_76 = arith.constant 0 : index
      %c0_77 = arith.constant 0 : index
      %143 = vector.load %arg4[%c0_75, %c0_76, %c0_77] : memref<1x8x32xbf16, #tpu.memory_space<vmem>>, vector<1x8x32xbf16>
      %144 = vector.shape_cast %143 : vector<1x8x32xbf16> to vector<8x32xbf16>
      %c0_78 = arith.constant 0 : index
      %c0_79 = arith.constant 0 : index
      %145 = vector.load %arg10[%c0_78, %c0_79] : memref<32x32xbf16, #tpu.memory_space<vmem>>, vector<32x32xbf16>
      %cst_80 = arith.constant dense<0.000000e+00> : vector<8x32xf32>
      %146 = tpu.matmul %144, %145, %cst_80 {dimension_numbers = #tpu.dot_dimension_numbers<[1], [0], [0], [1], [0, 0, 1, 1], [], []>} : vector<8x32xbf16>, vector<32x32xbf16>, vector<8x32xf32> -> vector<8x32xf32>
      %c0_81 = arith.constant 0 : index
      %c0_82 = arith.constant 0 : index
      %147 = vector.load %arg11[%c0_81, %c0_82] : memref<1x32xf32, #tpu.memory_space<vmem>>, vector<1x32xf32>
      %148 = vector.broadcast %147 : vector<1x32xf32> to vector<8x32xf32>
      %149 = arith.addf %146, %148 : vector<8x32xf32>
      %150 = arith.truncf %142 : vector<8x32xf32> to vector<8x32xbf16>
      %c0_83 = arith.constant 0 : index
      %c0_84 = arith.constant 0 : index
      %151 = vector.load %arg15[%c0_83, %c0_84] : memref<8x32xbf16, #tpu.memory_space<vmem>>, vector<8x32xbf16>
      tpu.vector_store %arg15[%c0_83, %c0_84], %150 {strides = array<i32>} : memref<8x32xbf16, #tpu.memory_space<vmem>>, vector<8x32xbf16>,
      %152 = arith.truncf %149 : vector<8x32xf32> to vector<8x32xbf16>
      %c0_85 = arith.constant 0 : index
      %c0_86 = arith.constant 0 : index
      %153 = vector.load %arg16[%c0_85, %c0_86] : memref<8x32xbf16, #tpu.memory_space<vmem>>, vector<8x32xbf16>
      tpu.vector_store %arg16[%c0_85, %c0_86], %152 {strides = array<i32>} : memref<8x32xbf16, #tpu.memory_space<vmem>>, vector<8x32xbf16>,
    } else {
    }
    %c0 = arith.constant 0 : index
    %c0_1 = arith.constant 0 : index
    %c0_2 = arith.constant 0 : index
    %3 = vector.load %arg2[%c0, %c0_1, %c0_2] : memref<1x8x32xbf16, #tpu.memory_space<vmem>>, vector<1x8x32xbf16>
    %4 = vector.shape_cast %3 : vector<1x8x32xbf16> to vector<8x32xbf16>
    %c0_3 = arith.constant 0 : index
    %c0_4 = arith.constant 0 : index
    %5 = vector.load %arg6[%c0_3, %c0_4] : memref<32x32xbf16, #tpu.memory_space<vmem>>, vector<32x32xbf16>
    %cst = arith.constant dense<0.000000e+00> : vector<8x32xf32>
    %6 = tpu.matmul %4, %5, %cst {dimension_numbers = #tpu.dot_dimension_numbers<[1], [0], [0], [1], [0, 0, 1, 1], [], []>} : vector<8x32xbf16>, vector<32x32xbf16>, vector<8x32xf32> -> vector<8x32xf32>
    %c0_5 = arith.constant 0 : index
    %c0_6 = arith.constant 0 : index
    %7 = vector.load %arg7[%c0_5, %c0_6] : memref<1x32xf32, #tpu.memory_space<vmem>>, vector<1x32xf32>
    %8 = vector.broadcast %7 : vector<1x32xf32> to vector<8x32xf32>
    %9 = arith.addf %6, %8 : vector<8x32xf32>
    %cst_7 = arith.constant 0.353553385 : f32
    %10 = vector.broadcast %cst_7 : f32 to vector<8x32xf32>
    %11 = arith.mulf %9, %10 : vector<8x32xf32>
    %12 = arith.truncf %11 : vector<8x32xf32> to vector<8x32xbf16>
    %c0_8 = arith.constant 0 : index
    %c0_9 = arith.constant 0 : index
    %c0_10 = arith.constant 0 : index
    %13 = vector.load %arg5[%c0_8, %c0_9, %c0_10] : memref<1x1x8xi32, #tpu.memory_space<vmem>>, vector<1x1x8xi32>
    %14 = vector.shape_cast %13 : vector<1x1x8xi32> to vector<1x8xi32>
    %c0_i32_11 = arith.constant 0 : i32
    %15 = vector.broadcast %c0_i32_11 : i32 to vector<1x8xi32>
    %16 = arith.cmpi ne, %14, %15 : vector<1x8xi32>
    %cst_12 = arith.constant 0.000000e+00 : f32
    %17 = vector.broadcast %cst_12 : f32 to vector<8x32xf32>
    %18 = vector.extract_strided_slice %12 {offsets = [0, 0], sizes = [8, 8], strides = [1, 1]} : vector<8x32xbf16> to vector<8x8xbf16>
    %c0_13 = arith.constant 0 : index
    %c0_14 = arith.constant 0 : index
    %19 = vector.load %arg15[%c0_13, %c0_14] : memref<8x32xbf16, #tpu.memory_space<vmem>>, vector<8x8xbf16>
    %c0_15 = arith.constant 0 : index
    %c0_16 = arith.constant 0 : index
    %20 = vector.load %arg16[%c0_15, %c0_16] : memref<8x32xbf16, #tpu.memory_space<vmem>>, vector<8x8xbf16>
    %cst_17 = arith.constant dense<0.000000e+00> : vector<8x8xf32>
    %21 = tpu.matmul %18, %19, %cst_17 {dimension_numbers = #tpu.dot_dimension_numbers<[1], [1], [0], [0], [0, 0, 1, 0], [], []>} : vector<8x8xbf16>, vector<8x8xbf16>, vector<8x8xf32> -> vector<8x8xf32>
    %cst_18 = arith.constant -1.000000e+09 : f32
    %22 = vector.shape_cast %16 : vector<1x8xi1> to vector<1x8xi1>
    %23 = vector.broadcast %22 : vector<1x8xi1> to vector<8x8xi1>
    %24 = vector.broadcast %cst_18 : f32 to vector<8x8xf32>
    %25 = arith.select %23, %21, %24 : vector<8x8xi1>, vector<8x8xf32>
    %cst_19 = arith.constant dense<0xFF800000> : vector<8xf32>
    %26 = vector.multi_reduction <maximumf>, %25, %cst_19 [1] : vector<8x8xf32> to vector<8xf32>
    %27 = vector.shape_cast %26 : vector<8xf32> to vector<8x1xf32>
    %28 = vector.broadcast %27 : vector<8x1xf32> to vector<8x8xf32>
    %29 = arith.subf %25, %28 : vector<8x8xf32>
    %30 = math.exp %29 : vector<8x8xf32>
    %cst_20 = arith.constant dense<0.000000e+00> : vector<8xf32>
    %31 = vector.multi_reduction <add>, %30, %cst_20 [1] : vector<8x8xf32> to vector<8xf32>
    %32 = vector.shape_cast %31 : vector<8xf32> to vector<8x1xf32>
    %33 = tpu.reciprocal %32 {approx = true} : vector<8x1xf32> -> vector<8x1xf32>
    %34 = arith.mulf %32, %33 : vector<8x1xf32>
    %cst_21 = arith.constant 2.000000e+00 : f32
    %35 = vector.broadcast %cst_21 : f32 to vector<8x1xf32>
    %36 = arith.subf %35, %34 : vector<8x1xf32>
    %37 = arith.mulf %33, %36 : vector<8x1xf32>
    %38 = arith.truncf %30 : vector<8x8xf32> to vector<8x8xbf16>
    %cst_22 = arith.constant dense<0.000000e+00> : vector<8x8xf32>
    %39 = tpu.matmul %38, %20, %cst_22 {dimension_numbers = #tpu.dot_dimension_numbers<[1], [0], [0], [1], [0, 0, 1, 1], [], []>} : vector<8x8xbf16>, vector<8x8xbf16>, vector<8x8xf32> -> vector<8x8xf32>
    %40 = vector.broadcast %37 : vector<8x1xf32> to vector<8x8xf32>
    %41 = arith.mulf %39, %40 : vector<8x8xf32>
    %42 = arith.truncf %41 : vector<8x8xf32> to vector<8x8xbf16>
    %c0_23 = arith.constant 0 : index
    %c0_24 = arith.constant 0 : index
    %43 = vector.load %arg12[%c0_23, %c0_24] : memref<32x32xbf16, #tpu.memory_space<vmem>>, vector<8x32xbf16>
    %cst_25 = arith.constant dense<0.000000e+00> : vector<8x32xf32>
    %44 = tpu.matmul %42, %43, %cst_25 {dimension_numbers = #tpu.dot_dimension_numbers<[1], [0], [0], [1], [0, 0, 1, 1], [], []>} : vector<8x8xbf16>, vector<8x32xbf16>, vector<8x32xf32> -> vector<8x32xf32>
    %45 = arith.addf %17, %44 : vector<8x32xf32>
    %46 = vector.extract_strided_slice %12 {offsets = [0, 8], sizes = [8, 8], strides = [1, 1]} : vector<8x32xbf16> to vector<8x8xbf16>
    %c0_26 = arith.constant 0 : index
    %c8 = arith.constant 8 : index
    %47 = vector.load %arg15[%c0_26, %c8] : memref<8x32xbf16, #tpu.memory_space<vmem>>, vector<8x8xbf16>
    %c0_27 = arith.constant 0 : index
    %c8_28 = arith.constant 8 : index
    %48 = vector.load %arg16[%c0_27, %c8_28] : memref<8x32xbf16, #tpu.memory_space<vmem>>, vector<8x8xbf16>
    %cst_29 = arith.constant dense<0.000000e+00> : vector<8x8xf32>
    %49 = tpu.matmul %46, %47, %cst_29 {dimension_numbers = #tpu.dot_dimension_numbers<[1], [1], [0], [0], [0, 0, 1, 0], [], []>} : vector<8x8xbf16>, vector<8x8xbf16>, vector<8x8xf32> -> vector<8x8xf32>
    %cst_30 = arith.constant -1.000000e+09 : f32
    %50 = vector.shape_cast %16 : vector<1x8xi1> to vector<1x8xi1>
    %51 = vector.broadcast %50 : vector<1x8xi1> to vector<8x8xi1>
    %52 = vector.broadcast %cst_30 : f32 to vector<8x8xf32>
    %53 = arith.select %51, %49, %52 : vector<8x8xi1>, vector<8x8xf32>
    %cst_31 = arith.constant dense<0xFF800000> : vector<8xf32>
    %54 = vector.multi_reduction <maximumf>, %53, %cst_31 [1] : vector<8x8xf32> to vector<8xf32>
    %55 = vector.shape_cast %54 : vector<8xf32> to vector<8x1xf32>
    %56 = vector.broadcast %55 : vector<8x1xf32> to vector<8x8xf32>
    %57 = arith.subf %53, %56 : vector<8x8xf32>
    %58 = math.exp %57 : vector<8x8xf32>
    %cst_32 = arith.constant dense<0.000000e+00> : vector<8xf32>
    %59 = vector.multi_reduction <add>, %58, %cst_32 [1] : vector<8x8xf32> to vector<8xf32>
    %60 = vector.shape_cast %59 : vector<8xf32> to vector<8x1xf32>
    %61 = tpu.reciprocal %60 {approx = true} : vector<8x1xf32> -> vector<8x1xf32>
    %62 = arith.mulf %60, %61 : vector<8x1xf32>
    %cst_33 = arith.constant 2.000000e+00 : f32
    %63 = vector.broadcast %cst_33 : f32 to vector<8x1xf32>
    %64 = arith.subf %63, %62 : vector<8x1xf32>
    %65 = arith.mulf %61, %64 : vector<8x1xf32>
    %66 = arith.truncf %58 : vector<8x8xf32> to vector<8x8xbf16>
    %cst_34 = arith.constant dense<0.000000e+00> : vector<8x8xf32>
    %67 = tpu.matmul %66, %48, %cst_34 {dimension_numbers = #tpu.dot_dimension_numbers<[1], [0], [0], [1], [0, 0, 1, 1], [], []>} : vector<8x8xbf16>, vector<8x8xbf16>, vector<8x8xf32> -> vector<8x8xf32>
    %68 = vector.broadcast %65 : vector<8x1xf32> to vector<8x8xf32>
    %69 = arith.mulf %67, %68 : vector<8x8xf32>
    %70 = arith.truncf %69 : vector<8x8xf32> to vector<8x8xbf16>
    %c8_35 = arith.constant 8 : index
    %c0_36 = arith.constant 0 : index
    %71 = vector.load %arg12[%c8_35, %c0_36] : memref<32x32xbf16, #tpu.memory_space<vmem>>, vector<8x32xbf16>
    %cst_37 = arith.constant dense<0.000000e+00> : vector<8x32xf32>
    %72 = tpu.matmul %70, %71, %cst_37 {dimension_numbers = #tpu.dot_dimension_numbers<[1], [0], [0], [1], [0, 0, 1, 1], [], []>} : vector<8x8xbf16>, vector<8x32xbf16>, vector<8x32xf32> -> vector<8x32xf32>
    %73 = arith.addf %45, %72 : vector<8x32xf32>
    %74 = vector.extract_strided_slice %12 {offsets = [0, 16], sizes = [8, 8], strides = [1, 1]} : vector<8x32xbf16> to vector<8x8xbf16>
    %c0_38 = arith.constant 0 : index
    %c16 = arith.constant 16 : index
    %75 = vector.load %arg15[%c0_38, %c16] : memref<8x32xbf16, #tpu.memory_space<vmem>>, vector<8x8xbf16>
    %c0_39 = arith.constant 0 : index
    %c16_40 = arith.constant 16 : index
    %76 = vector.load %arg16[%c0_39, %c16_40] : memref<8x32xbf16, #tpu.memory_space<vmem>>, vector<8x8xbf16>
    %cst_41 = arith.constant dense<0.000000e+00> : vector<8x8xf32>
    %77 = tpu.matmul %74, %75, %cst_41 {dimension_numbers = #tpu.dot_dimension_numbers<[1], [1], [0], [0], [0, 0, 1, 0], [], []>} : vector<8x8xbf16>, vector<8x8xbf16>, vector<8x8xf32> -> vector<8x8xf32>
    %cst_42 = arith.constant -1.000000e+09 : f32
    %78 = vector.shape_cast %16 : vector<1x8xi1> to vector<1x8xi1>
    %79 = vector.broadcast %78 : vector<1x8xi1> to vector<8x8xi1>
    %80 = vector.broadcast %cst_42 : f32 to vector<8x8xf32>
    %81 = arith.select %79, %77, %80 : vector<8x8xi1>, vector<8x8xf32>
    %cst_43 = arith.constant dense<0xFF800000> : vector<8xf32>
    %82 = vector.multi_reduction <maximumf>, %81, %cst_43 [1] : vector<8x8xf32> to vector<8xf32>
    %83 = vector.shape_cast %82 : vector<8xf32> to vector<8x1xf32>
    %84 = vector.broadcast %83 : vector<8x1xf32> to vector<8x8xf32>
    %85 = arith.subf %81, %84 : vector<8x8xf32>
    %86 = math.exp %85 : vector<8x8xf32>
    %cst_44 = arith.constant dense<0.000000e+00> : vector<8xf32>
    %87 = vector.multi_reduction <add>, %86, %cst_44 [1] : vector<8x8xf32> to vector<8xf32>
    %88 = vector.shape_cast %87 : vector<8xf32> to vector<8x1xf32>
    %89 = tpu.reciprocal %88 {approx = true} : vector<8x1xf32> -> vector<8x1xf32>
    %90 = arith.mulf %88, %89 : vector<8x1xf32>
    %cst_45 = arith.constant 2.000000e+00 : f32
    %91 = vector.broadcast %cst_45 : f32 to vector<8x1xf32>
    %92 = arith.subf %91, %90 : vector<8x1xf32>
    %93 = arith.mulf %89, %92 : vector<8x1xf32>
    %94 = arith.truncf %86 : vector<8x8xf32> to vector<8x8xbf16>
    %cst_46 = arith.constant dense<0.000000e+00> : vector<8x8xf32>
    %95 = tpu.matmul %94, %76, %cst_46 {dimension_numbers = #tpu.dot_dimension_numbers<[1], [0], [0], [1], [0, 0, 1, 1], [], []>} : vector<8x8xbf16>, vector<8x8xbf16>, vector<8x8xf32> -> vector<8x8xf32>
    %96 = vector.broadcast %93 : vector<8x1xf32> to vector<8x8xf32>
    %97 = arith.mulf %95, %96 : vector<8x8xf32>
    %98 = arith.truncf %97 : vector<8x8xf32> to vector<8x8xbf16>
    %c16_47 = arith.constant 16 : index
    %c0_48 = arith.constant 0 : index
    %99 = vector.load %arg12[%c16_47, %c0_48] : memref<32x32xbf16, #tpu.memory_space<vmem>>, vector<8x32xbf16>
    %cst_49 = arith.constant dense<0.000000e+00> : vector<8x32xf32>
    %100 = tpu.matmul %98, %99, %cst_49 {dimension_numbers = #tpu.dot_dimension_numbers<[1], [0], [0], [1], [0, 0, 1, 1], [], []>} : vector<8x8xbf16>, vector<8x32xbf16>, vector<8x32xf32> -> vector<8x32xf32>
    %101 = arith.addf %73, %100 : vector<8x32xf32>
    %102 = vector.extract_strided_slice %12 {offsets = [0, 24], sizes = [8, 8], strides = [1, 1]} : vector<8x32xbf16> to vector<8x8xbf16>
    %c0_50 = arith.constant 0 : index
    %c24 = arith.constant 24 : index
    %103 = vector.load %arg15[%c0_50, %c24] : memref<8x32xbf16, #tpu.memory_space<vmem>>, vector<8x8xbf16>
    %c0_51 = arith.constant 0 : index
    %c24_52 = arith.constant 24 : index
    %104 = vector.load %arg16[%c0_51, %c24_52] : memref<8x32xbf16, #tpu.memory_space<vmem>>, vector<8x8xbf16>
    %cst_53 = arith.constant dense<0.000000e+00> : vector<8x8xf32>
    %105 = tpu.matmul %102, %103, %cst_53 {dimension_numbers = #tpu.dot_dimension_numbers<[1], [1], [0], [0], [0, 0, 1, 0], [], []>} : vector<8x8xbf16>, vector<8x8xbf16>, vector<8x8xf32> -> vector<8x8xf32>
    %cst_54 = arith.constant -1.000000e+09 : f32
    %106 = vector.shape_cast %16 : vector<1x8xi1> to vector<1x8xi1>
    %107 = vector.broadcast %106 : vector<1x8xi1> to vector<8x8xi1>
    %108 = vector.broadcast %cst_54 : f32 to vector<8x8xf32>
    %109 = arith.select %107, %105, %108 : vector<8x8xi1>, vector<8x8xf32>
    %cst_55 = arith.constant dense<0xFF800000> : vector<8xf32>
    %110 = vector.multi_reduction <maximumf>, %109, %cst_55 [1] : vector<8x8xf32> to vector<8xf32>
    %111 = vector.shape_cast %110 : vector<8xf32> to vector<8x1xf32>
    %112 = vector.broadcast %111 : vector<8x1xf32> to vector<8x8xf32>
    %113 = arith.subf %109, %112 : vector<8x8xf32>
    %114 = math.exp %113 : vector<8x8xf32>
    %cst_56 = arith.constant dense<0.000000e+00> : vector<8xf32>
    %115 = vector.multi_reduction <add>, %114, %cst_56 [1] : vector<8x8xf32> to vector<8xf32>
    %116 = vector.shape_cast %115 : vector<8xf32> to vector<8x1xf32>
    %117 = tpu.reciprocal %116 {approx = true} : vector<8x1xf32> -> vector<8x1xf32>
    %118 = arith.mulf %116, %117 : vector<8x1xf32>
    %cst_57 = arith.constant 2.000000e+00 : f32
    %119 = vector.broadcast %cst_57 : f32 to vector<8x1xf32>
    %120 = arith.subf %119, %118 : vector<8x1xf32>
    %121 = arith.mulf %117, %120 : vector<8x1xf32>
    %122 = arith.truncf %114 : vector<8x8xf32> to vector<8x8xbf16>
    %cst_58 = arith.constant dense<0.000000e+00> : vector<8x8xf32>
    %123 = tpu.matmul %122, %104, %cst_58 {dimension_numbers = #tpu.dot_dimension_numbers<[1], [0], [0], [1], [0, 0, 1, 1], [], []>} : vector<8x8xbf16>, vector<8x8xbf16>, vector<8x8xf32> -> vector<8x8xf32>
    %124 = vector.broadcast %121 : vector<8x1xf32> to vector<8x8xf32>
    %125 = arith.mulf %123, %124 : vector<8x8xf32>
    %126 = arith.truncf %125 : vector<8x8xf32> to vector<8x8xbf16>
    %c24_59 = arith.constant 24 : index
    %c0_60 = arith.constant 0 : index
    %127 = vector.load %arg12[%c24_59, %c0_60] : memref<32x32xbf16, #tpu.memory_space<vmem>>, vector<8x32xbf16>
    %cst_61 = arith.constant dense<0.000000e+00> : vector<8x32xf32>
    %128 = tpu.matmul %126, %127, %cst_61 {dimension_numbers = #tpu.dot_dimension_numbers<[1], [0], [0], [1], [0, 0, 1, 1], [], []>} : vector<8x8xbf16>, vector<8x32xbf16>, vector<8x32xf32> -> vector<8x32xf32>
    %129 = arith.addf %101, %128 : vector<8x32xf32>
    %c0_62 = arith.constant 0 : index
    %c0_63 = arith.constant 0 : index
    %130 = vector.load %arg13[%c0_62, %c0_63] : memref<1x32xf32, #tpu.memory_space<vmem>>, vector<1x32xf32>
    %131 = vector.broadcast %130 : vector<1x32xf32> to vector<8x32xf32>
    %132 = arith.addf %129, %131 : vector<8x32xf32>
    %c0_64 = arith.constant 0 : index
    %c0_65 = arith.constant 0 : index
    %c0_66 = arith.constant 0 : index
    %133 = vector.load %arg14[%c0_64, %c0_65, %c0_66] : memref<1x8x32xf32, #tpu.memory_space<vmem>>, vector<1x8x32xf32>
    %134 = vector.shape_cast %133 : vector<1x8x32xf32> to vector<8x32xf32>
    %135 = vector.shape_cast %132 : vector<8x32xf32> to vector<1x8x32xf32>
    tpu.vector_store %arg14[%c0_64, %c0_65, %c0_66], %135 {strides = array<i32>} : memref<1x8x32xf32, #tpu.memory_space<vmem>>, vector<1x8x32xf32>,
    return
  }
  func.func @transform_0(%arg0: i32, %arg1: i32) -> (i32, i32, i32) {
    %c0_i32 = arith.constant 0 : i32
    %c0_i32_0 = arith.constant 0 : i32
    return %arg0, %arg1, %c0_i32 : i32, i32, i32
  }
  func.func @transform_1(%arg0: i32, %arg1: i32) -> (i32, i32, i32) {
    %c0_i32 = arith.constant 0 : i32
    %c0_i32_0 = arith.constant 0 : i32
    %c0_i32_1 = arith.constant 0 : i32
    return %arg0, %c0_i32, %c0_i32_0 : i32, i32, i32
  }
  func.func @transform_2(%arg0: i32, %arg1: i32) -> (i32, i32, i32) {
    %c0_i32 = arith.constant 0 : i32
    %c0_i32_0 = arith.constant 0 : i32
    %c0_i32_1 = arith.constant 0 : i32
    return %arg0, %c0_i32, %c0_i32_0 : i32, i32, i32
  }
  func.func @transform_3(%arg0: i32, %arg1: i32) -> (i32, i32, i32) {
    %c0_i32 = arith.constant 0 : i32
    %c0_i32_0 = arith.constant 0 : i32
    %c0_i32_1 = arith.constant 0 : i32
    return %arg0, %c0_i32, %c0_i32_0 : i32, i32, i32
  }
  func.func @transform_4(%arg0: i32, %arg1: i32) -> (i32, i32) {
    %c0_i32 = arith.constant 0 : i32
    %c0_i32_0 = arith.constant 0 : i32
    %c0_i32_1 = arith.constant 0 : i32
    return %c0_i32, %c0_i32_0 : i32, i32
  }
  func.func @transform_5(%arg0: i32, %arg1: i32) -> (i32, i32) {
    %c0_i32 = arith.constant 0 : i32
    %c0_i32_0 = arith.constant 0 : i32
    %c0_i32_1 = arith.constant 0 : i32
    return %c0_i32, %c0_i32_0 : i32, i32
  }
  func.func @transform_6(%arg0: i32, %arg1: i32) -> (i32, i32) {
    %c0_i32 = arith.constant 0 : i32
    %c0_i32_0 = arith.constant 0 : i32
    %c0_i32_1 = arith.constant 0 : i32
    return %c0_i32, %c0_i32_0 : i32, i32
  }
  func.func @transform_7(%arg0: i32, %arg1: i32) -> (i32, i32) {
    %c0_i32 = arith.constant 0 : i32
    %c0_i32_0 = arith.constant 0 : i32
    %c0_i32_1 = arith.constant 0 : i32
    return %c0_i32, %c0_i32_0 : i32, i32
  }
  func.func @transform_8(%arg0: i32, %arg1: i32) -> (i32, i32) {
    %c0_i32 = arith.constant 0 : i32
    %c0_i32_0 = arith.constant 0 : i32
    %c0_i32_1 = arith.constant 0 : i32
    return %c0_i32, %c0_i32_0 : i32, i32
  }
  func.func @transform_9(%arg0: i32, %arg1: i32) -> (i32, i32) {
    %c0_i32 = arith.constant 0 : i32
    %c0_i32_0 = arith.constant 0 : i32
    %c0_i32_1 = arith.constant 0 : i32
    return %c0_i32, %c0_i32_0 : i32, i32
  }
  func.func @transform_10(%arg0: i32, %arg1: i32) -> (i32, i32) {
    %c0_i32 = arith.constant 0 : i32
    %c0_i32_0 = arith.constant 0 : i32
    %c0_i32_1 = arith.constant 0 : i32
    return %c0_i32, %c0_i32_0 : i32, i32
  }
  func.func @transform_11(%arg0: i32, %arg1: i32) -> (i32, i32) {
    %c0_i32 = arith.constant 0 : i32
    %c0_i32_0 = arith.constant 0 : i32
    %c0_i32_1 = arith.constant 0 : i32
    return %c0_i32, %c0_i32_0 : i32, i32
  }
  func.func @transform_12(%arg0: i32, %arg1: i32) -> (i32, i32, i32) {
    %c0_i32 = arith.constant 0 : i32
    %c0_i32_0 = arith.constant 0 : i32
    return %arg0, %arg1, %c0_i32 : i32, i32, i32
  }
}

</mosaic_0001>

<bundles_post_ra>
// kernel: tpu_custom_call.1
= control target key start
LH: loop header
LB: loop body
LE: loop exit
PB: predicated region body
PF: predicated region fallthrough
CT: control target
= control target key end

     0   :  { %s2976_s0 = inlined_call_operand.hbm [shape: bf16[2,8,32], index: 0, kind: input, shape index: {}]   ;;  %s2977_s1 = inlined_call_operand.hbm [shape: bf16[2,8,32], index: 1, kind: input, shape index: {}]   ;;  %s2978_s2 = inlined_call_operand.hbm [shape: bf16[2,8,32], index: 2, kind: input, shape index: {}]   ;;  %s2979_s3 = inlined_call_operand.vmem [shape: s32[2,1,8], index: 3, kind: input, shape index: {}]   ;;  %s2980_s4 = inlined_call_operand.hbm [shape: bf16[32,32], index: 4, kind: input, shape index: {}]   ;;  %s2981_s5 = inlined_call_operand.hbm [shape: f32[1,32], index: 5, kind: input, shape index: {}]   ;;  %s2982_s6 = inlined_call_operand.vmem [shape: bf16[32,32], index: 6, kind: input, shape index: {}]   ;;  %s2983_s7 = inlined_call_operand.hbm [shape: f32[1,32], index: 7, kind: input, shape index: {}]   ;;  %s2984_s8 = inlined_call_operand.hbm [shape: bf16[32,32], index: 8, kind: input, shape index: {}]   ;;  %s2985_s9 = inlined_call_operand.hbm [shape: f32[1,32], index: 9, kind: input, shape index: {}]   ;;  %s2986_s10 = inlined_call_operand.vmem [shape: bf16[32,32], index: 10, kind: input, shape index: {}]   ;;  %s2987_s11 = inlined_call_operand.vmem [shape: f32[1,32], index: 11, kind: input, shape index: {}]   ;;  %s2988_s12 = inlined_call_operand.hbm [shape: f32[2,8,32], index: 12, kind: output, shape index: {}]  }
   0x1   :  { %3015 = sst [smem:[#allocation33_spill]] %s2977_s1 }
   0x2   :  { %3016 = sst [smem:[#allocation34_spill]] %s2979_s3 }
   0x3   :  { %3017 = sst [smem:[#allocation35_spill]] %s2980_s4 }
   0x4   :  { %3018 = sst [smem:[#allocation36_spill]] %s2981_s5 }
   0x5   :  { %3019 = sst [smem:[#allocation37_spill]] %s2983_s7 }
   0x6   :  { %3020 = sst [smem:[#allocation38_spill]] %s2986_s10 }
   0x7   :  { %3021 = sst [smem:[#allocation39_spill]] %s2987_s11 }
   0x8   :  { %3022 = sst [smem:[#allocation40_spill]] %s2988_s12 }
   0x9   :  { %17 = vsyncpa [#allocation5], 0 }
   0xa   :  { %19 = vsyncpa [#allocation5 + $0x1], 0 }
   0xb   :  { %20 = vsyncpa [#allocation8], 0 }
   0xc   :  { %22 = vsyncpa [#allocation8 + $0x1], 0 }
   0xd   :  { %23 = vsyncpa [#allocation11], 0 }
   0xe   :  { %24 = vsyncpa [#allocation14], 0 }
   0xf   :  { %25 = vsyncpa [#allocation17], 0 }
  0x10   :  { %26 = vsyncpa [#allocation6], 0 }
  0x11   :  { %28 = vsyncpa [#allocation6 + $0x1], 0  ;;  %s2435_s21 = smov 0   ;;  %s2437_s22 = smov 0  }
  0x12   :  { %s2439_s23 = smov 0   ;;  %s2441_s24 = smov 0  }
  0x13   :  { %s2443_s25 = smov 0   ;;  %s2445_s26 = smov 0  }
  0x14 LB: > { %3023 = sst [smem:[#allocation25_spill]] %s2331_s21  ;;  %s2466_s27 = sadd.s32 4294967295, %s2351_s26   ;;  %s2351_s26 = sphi %s2445_s26, %s34_s26   ;;  %s2347_s25 = sphi %s2443_s25, %s3074_s25   ;;  %s2343_s24 = sphi %s2441_s24, %s3073_s24   ;;  %s2339_s23 = sphi %s2439_s23, %s3077_s23   ;;  %s2335_s22 = sphi %s2437_s22, %s3076_s22   ;;  %s2331_s21 = sphi %s2435_s21, %s3075_s21  }
  0x15   : > { %3024 = sst [smem:[#allocation26_spill]] %s2343_s24  ;;  %p1685_p0 = scmp.ge.s32.totalorder %s2351_s26, 1 }
  0x16   : > { %3025 = sst [smem:[#allocation27_spill]] %s2347_s25  ;;  %p2999_p1 = scmp.eq.s32.totalorder %s2466_s27, 0 }
  0x17   : > { %3026 = sst [smem:[#allocation28_spill]] %s2351_s26  ;;  %p353_p2 = scmp.lt.s32.totalorder %s2351_s26, 3 }
  0x18   : > { %s2353_s29 = smov [#allocation10]   ;;  %s2354_s14 = smov [#allocation13]  }
  0x19   : > { %p2471_p3 = pnand %p1685_p0, %p353_p2  ;;  %s371_s30 = sshll.u32 %s2353_s29, 4  ;;  %s2475_s30 = int_to_ptr.vmem [resolvable:$true] %s371_s30 }
  0x1a   : > { %s399_s15 = sshll.u32 %s2354_s14, 4  ;;  %s3029_s4 = sld [smem:[#allocation35_spill]]  ;;  %s2486_s15 = int_to_ptr.vmem [resolvable:$true] %s399_s15 }
  0x1b   : > { %s3027_s28 = scalar_select %p2471_p3, 1, 0 }
  0x1c   : > { %p1896_p4 = pneg %p2471_p3 }
  0x1e   : > { %p2482_p6 = pnand %p1896_p4, %p2999_p1 }
  0x20   : > { %s3028_s13 = scalar_select %p2482_p6, 1, 0 }
  0x21   : > { %s2023_s18 = scalar_lea.hbm %s3029_s4, 256  ;;  %p2496_p8 = pneg %p2482_p6 }
  0x22   : > { %p2024_p7 = scmp.ne.s32.totalorder %s3029_s4, %s2023_s18  ;;  %p2030_p11 = scmp.lt.u32.totalorder %s2023_s18, %s3029_s4 }
  0x23   : > { %s3030_s29 = scalar_select %p2496_p8, 1, 0 }
  0x24   : > { %p2026_p9 = pnand %p2496_p8, %p2024_p7 }
  0x26   : > { %p2027_p10 = pneg %p2026_p9 }
  0x28   : > { %p2032_p12 = pnand %p2030_p11, %p2027_p10 }
  0x2a   : > { %2035 = shalt.err (!%p2032_p12)
}
  0x2b   : > { %s2036_s16 = scalar_lea.vmem %s2475_s30, 256  ;;  %p2044_p4 = scmp.lt.s32.totalorder %s2475_s30, %s2475_s30 }
  0x2c   : > { %p2037_p13 = scmp.ne.s32.totalorder %s2475_s30, %s2036_s16  ;;  %p2045_p5 = scmp.lt.s32.totalorder %s2036_s16, %s2036_s16 }
  0x2e   : > { %p2039_p0 = pnand %p2037_p13, %p2496_p8  ;;  %p2046_p7 = por %p2045_p5, %p2044_p4 }
  0x30   : > { %p2040_p2 = pneg %p2039_p0 }
  0x32   : > { %p2047_p9 = pnand %p2046_p7, %p2040_p2 }
  0x34   : > { %2050 = shalt.err (!%p2047_p9)
}
  0x35   : > { %s2992_s17 = smov 64   ;;  %s2993_s12 = smov 4  }
  0x36   : > { %1899 = dma.hbm_to_vmem [thread:$0]  (!%p2482_p6), %s3029_s4, 256, %s2475_s30, [#allocation11], %s2992_s17, %s2992_s17, %s2993_s12  }
  0x37   : > { %s3031_s7 = sld [smem:[#allocation37_spill]] }
  0x3d   : > { %s2051_s16 = scalar_lea.hbm %s3031_s7, 16 }
  0x3e   : > { %p2052_p5 = scmp.ne.s32.totalorder %s3031_s7, %s2051_s16  ;;  %p2058_p12 = scmp.lt.u32.totalorder %s2051_s16, %s3031_s7 }
  0x40   : > { %p2054_p10 = pnand %p2052_p5, %p2496_p8 }
  0x42   : > { %p2055_p11 = pneg %p2054_p10 }
  0x44   : > { %p2060_p13 = pnand %p2058_p12, %p2055_p11 }
  0x46   : > { %2063 = shalt.err (!%p2060_p13)
}
  0x47   : > { %s2064_s30 = scalar_lea.vmem %s2486_s15, 16  ;;  %s2071_s10 = scalar_lea.vmem %s2486_s15, 32 }
  0x48   : > { %p2065_p0 = scmp.ne.s32.totalorder %s2486_s15, %s2064_s30  ;;  %p2072_p7 = scmp.lt.s32.totalorder %s2486_s15, %s2486_s15 }
  0x49   : > { %p2073_p9 = scmp.lt.s32.totalorder %s2071_s10, %s2064_s30 }
  0x4a   : > { %p2067_p2 = pnand %p2065_p0, %p2496_p8 }
  0x4b   : > { %p2074_p5 = por %p2073_p9, %p2072_p7 }
  0x4c   : > { %p2068_p4 = pneg %p2067_p2 }
  0x4e   : > { %p2075_p10 = pnand %p2074_p5, %p2068_p4 }
  0x50   : > { %2078 = shalt.err (!%p2075_p10)
}
  0x51   : > { %1905 = dma.hbm_to_vmem [thread:$0]  (!%p2482_p6), %s3031_s7, 16, %s2486_s15, [#allocation14]  }
  0x52   : > { %s1684_s24 = sadd.s32 4294967294, %s2351_s26   ;;  %s46_s18 = sadd.s32 1, %s2347_s25 }
  0x53   : > { %p48_p11 = scmp.ge.s32.totalorder %s46_s18, 2  ;;  %s55_s19 = sadd.s32 1, %s2339_s23 }
  0x54   : > { %p62_p12 = scmp.ne.s32.totalorder %s2339_s23, %s2335_s22  ;;  %p63_p13 = scmp.eq.s32.totalorder %s2351_s26, 0 }
  0x55   : > { %s3079_s18 = smov (%p48_p11, %s46_s18), 0  ;;  %p68_p2 = scmp.ne.s32.totalorder %s2335_s22, %s2331_s21 }
  0x56   : > { %3032 = sst [smem:[#allocation29_spill]] %s3079_s18  ;;  %p2552_p0 = por %p63_p13, %p62_p12 }
  0x57   : > { %s50_s15 = ssub.s32 %s2347_s25, %s3079_s18  ;;  %p340_p4 = scmp.eq.s32.totalorder %s2466_s27, 1 }
  0x58   : > { %p53_p7 = scmp.eq.s32.totalorder %s50_s15, 0  ;;  %p2563_p9 = por %p2999_p1, %p68_p2 }
  0x59   : > { %p2567_p5 = por %p340_p4, %p62_p12  ;;  %p346_p10 = scmp.eq.s32.totalorder %s1684_s24, 1 }
  0x5a   : > { %s3034_s14 = scalar_select %p2563_p9, 1, 0 }
  0x5b   : > { %s3035_s16 = scalar_select %p2567_p5, 1, 0 }
  0x5c   : > { %s2572_s30 = scalar_select %p53_p7, %s2339_s23, %s55_s19  }
  0x5d   : > { %3036 = sst [smem:[#allocation30_spill]] %s3035_s16  ;;  %p2574_p11 = por %p346_p10, %p68_p2 }
  0x5e   : > { %3037 = sst [smem:[#allocation31_spill]] %s2572_s30  ;;  %p1931_p13 = scmp.lt.s32.totalorder %s2351_s26, 2 }
  0x5f   : > { %s3038_s10 = scalar_select %p2574_p11, 1, 0 }
  0x60   : > { %s2994_s3 = sand.u32 1, %s2339_s23   ;;  %s2581_s11 = sshll.u32 %s2347_s25, 6 }
  0x61   : > { %3039 = sst [smem:[#allocation32_spill]] %s3038_s10  ;;  %s2585_s15 = sshll.u32 %s2994_s3, 2 }
  0x62   : > { %p2589_p12 = pnand %p1931_p13, %p2552_p0  ;;  %s459_s24 = sand.u32 1, %s2351_s26  }
  0x63   : > { %s3041_s1 = sld [smem:[#allocation33_spill]]  ;;  %s463_s7 = scalar_lea.vmem [#allocation7], %s2585_s15 }
  0x64   : > { %s3040_s17 = scalar_select %p2589_p12, 1, 0 }
  0x65   : > { %s470_s3 = sshll.u32 %s463_s7, 4  ;;  %s2603_s20 = scalar_lea.sflag [#allocation8], %s459_s24  ;;  %s2601_s3 = int_to_ptr.vmem [resolvable:$true] %s470_s3 }
  0x66   : > { %p2609_p2 = pneg %p2589_p12 }
  0x68   : > { %s3042_s25 = scalar_select %p2609_p2, 1, 0 }
  0x69   : > { %s2598_s4 = scalar_lea.hbm %s3041_s1, %s2581_s11  ;;  %s2084_s30 = scalar_lea.hbm %s3041_s1, 128 }
  0x6a   : > { %s2079_s18 = scalar_lea.hbm %s2598_s4, 64  ;;  %p2085_p10 = scmp.lt.u32.totalorder %s2598_s4, %s3041_s1 }
  0x6b   : > { %p2080_p0 = scmp.ne.s32.totalorder %s2598_s4, %s2079_s18  ;;  %p2086_p13 = scmp.lt.u32.totalorder %s2084_s30, %s2079_s18 }
  0x6c   : > { %p2088_p11 = scmp.lt.u32.totalorder %s2079_s18, %s2598_s4 }
  0x6d   : > { %p2082_p4 = pnand %p2609_p2, %p2080_p0  ;;  %p2087_p1 = por %p2086_p13, %p2085_p10 }
  0x6f   : > { %p2083_p7 = pneg %p2082_p4  ;;  %p2089_p5 = por %p2088_p11, %p2087_p1 }
  0x71   : > { %p2090_p9 = pnand %p2089_p5, %p2083_p7 }
  0x73   : > { %2093 = shalt.err (!%p2090_p9)
}
  0x74   : > { %s2094_s24 = scalar_lea.vmem %s2601_s3, 64  ;;  %s2357_s12 = smov [#allocation7]  }
  0x75   : > { %p2095_p0 = scmp.ne.s32.totalorder %s2601_s3, %s2094_s24  ;;  %s2099_s19 = sshll.u32 %s2357_s12, 4  ;;  %s2100_s19 = int_to_ptr.vmem [resolvable:$false] %s2099_s19 }
  0x76   : > { %s2101_s26 = scalar_lea.vmem %s2100_s19, 128  ;;  %p2102_p6 = scmp.lt.s32.totalorder %s2601_s3, %s2100_s19 }
  0x77   : > { %p2097_p4 = pnand %p2095_p0, %p2609_p2  ;;  %p2103_p8 = scmp.lt.s32.totalorder %s2101_s26, %s2094_s24 }
  0x79   : > { %p2098_p3 = pneg %p2097_p4  ;;  %p2104_p10 = por %p2103_p8, %p2102_p6 }
  0x7b   : > { %p2105_p13 = pnand %p2104_p10, %p2098_p3 }
  0x7d   : > { %2108 = shalt.err (!%p2105_p13)
}
  0x7e   : > { %1918 = dma.hbm_to_vmem [thread:$0]  (!%p2589_p12), %s2598_s4, 64, %s2601_s3, %s2603_s20  }
  0x7f   : > { %s2358_s18 = smov [#allocation12]   ;;  %s2359_s7 = smov [#allocation15]  }
  0x80   : > { %s385_s30 = sshll.u32 %s2358_s18, 4  ;;  %s409_s1 = sshll.u32 %s2359_s7, 4  ;;  %s386_s30 = int_to_ptr.vmem [resolvable:$true] %s385_s30  ;;  %s410_s1 = int_to_ptr.vmem [resolvable:$true] %s409_s1 }
  0x81   : > { %s3043_s5 = sld [smem:[#allocation36_spill]]  ;;  %p3044_p3 = scmp.ne.s32.totalorder %s3030_s29, 0 }
  0x87   : > { %s2109_s19 = scalar_lea.hbm %s3043_s5, 16 }
  0x88   : > { %p2110_p1 = scmp.ne.s32.totalorder %s3043_s5, %s2109_s19  ;;  %p2116_p9 = scmp.lt.u32.totalorder %s2109_s19, %s3043_s5 }
  0x8a   : > { %p2112_p6 = pnand %p2110_p1, %p3044_p3 }
  0x8c   : > { %p2113_p8 = pneg %p2112_p6 }
  0x8e   : > { %p2118_p5 = pnand %p2116_p9, %p2113_p8 }
  0x90   : > { %2121 = shalt.err (!%p2118_p5)
}
  0x91   : > { %s2122_s4 = scalar_lea.vmem %s386_s30, 16  ;;  %s2129_s10 = scalar_lea.vmem %s386_s30, 32 }
  0x92   : > { %p2123_p11 = scmp.ne.s32.totalorder %s386_s30, %s2122_s4  ;;  %p2130_p4 = scmp.lt.s32.totalorder %s386_s30, %s386_s30 }
  0x93   : > { %p2131_p10 = scmp.lt.s32.totalorder %s2129_s10, %s2122_s4 }
  0x94   : > { %p2125_p7 = pnand %p2123_p11, %p3044_p3 }
  0x95   : > { %p2132_p13 = por %p2131_p10, %p2130_p4 }
  0x96   : > { %p2126_p0 = pneg %p2125_p7 }
  0x98   : > { %p2133_p12 = pnand %p2132_p13, %p2126_p0 }
  0x9a   : > { %2136 = shalt.err (!%p2133_p12)
}
  0x9b   : > { %p3045_p1 = scmp.ne.s32.totalorder %s3028_s13, 0  ;;  %s2137_s7 = scalar_lea.hbm %s2984_s8, 256 }
  0x9c   : > { %p2138_p6 = scmp.ne.s32.totalorder %s2984_s8, %s2137_s7  ;;  %p2144_p12 = scmp.lt.u32.totalorder %s2137_s7, %s2984_s8 }
  0x9d   : > { %1902 = dma.hbm_to_vmem [thread:$0]  (!%p3045_p1), %s3043_s5, 16, %s386_s30, [#allocation11]  }
  0x9e   : > { %p2140_p8 = pnand %p2138_p6, %p3044_p3 }
  0xa0   : > { %p2141_p9 = pneg %p2140_p8 }
  0xa2   : > { %p2146_p5 = pnand %p2144_p12, %p2141_p9 }
  0xa4   : > { %2149 = shalt.err (!%p2146_p5)
}
  0xa5   : > { %s2150_s4 = scalar_lea.vmem %s410_s1, 256  ;;  %p2158_p4 = scmp.lt.s32.totalorder %s410_s1, %s410_s1 }
  0xa6   : > { %p2151_p11 = scmp.ne.s32.totalorder %s410_s1, %s2150_s4  ;;  %p2159_p10 = scmp.lt.s32.totalorder %s2150_s4, %s2150_s4 }
  0xa8   : > { %p2153_p7 = pnand %p2151_p11, %p3044_p3  ;;  %p2160_p13 = por %p2159_p10, %p2158_p4 }
  0xaa   : > { %p2154_p0 = pneg %p2153_p7 }
  0xac   : > { %p2161_p2 = pnand %p2160_p13, %p2154_p0 }
  0xae   : > { %2164 = shalt.err (!%p2161_p2)
}
  0xaf   : > { %s3046_s30 = smov 4   ;;  %s3047_s10 = smov 64  }
  0xb0   : > { %1908 = dma.hbm_to_vmem [thread:$0]  (!%p3045_p1), %s2984_s8, 256, %s410_s1, [#allocation14], %s3047_s10, %s3047_s10, %s3046_s30  }
  0xb1   : > { %s2360_s21 = smov [#allocation16]   ;;  %s2165_s19 = scalar_lea.hbm %s2985_s9, 16 }
  0xb2   : > { %s423_s16 = sshll.u32 %s2360_s21, 4  ;;  %p2166_p2 = scmp.ne.s32.totalorder %s2985_s9, %s2165_s19  ;;  %s424_s16 = int_to_ptr.vmem [resolvable:$true] %s423_s16 }
  0xb3   : > { %p2172_p9 = scmp.lt.u32.totalorder %s2165_s19, %s2985_s9 }
  0xb4   : > { %p2168_p6 = pnand %p2166_p2, %p3044_p3 }
  0xb6   : > { %p2169_p8 = pneg %p2168_p6 }
  0xb8   : > { %p2174_p12 = pnand %p2172_p9, %p2169_p8 }
  0xba   : > { %2177 = shalt.err (!%p2174_p12)
}
  0xbb   : > { %s2178_s1 = scalar_lea.vmem %s424_s16, 16  ;;  %s2185_s30 = scalar_lea.vmem %s424_s16, 32 }
  0xbc   : > { %p2179_p5 = scmp.ne.s32.totalorder %s424_s16, %s2178_s1  ;;  %p2186_p0 = scmp.lt.s32.totalorder %s424_s16, %s424_s16 }
  0xbd   : > { %p2187_p4 = scmp.lt.s32.totalorder %s2185_s30, %s2178_s1 }
  0xbe   : > { %p2181_p11 = pnand %p2179_p5, %p3044_p3 }
  0xbf   : > { %p2188_p10 = por %p2187_p4, %p2186_p0 }
  0xc0   : > { %p2182_p7 = pneg %p2181_p11 }
  0xc2   : > { %p2189_p13 = pnand %p2188_p10, %p2182_p7 }
  0xc4   : > { %2192 = shalt.err (!%p2189_p13)
}
  0xc5   : > { %1911 = dma.hbm_to_vmem [thread:$0]  (!%p3045_p1), %s2985_s9, 16, %s424_s16, [#allocation17]  }
  0xc6   : > { %s2694_s18 = scalar_lea.hbm %s2976_s0, %s2581_s11  ;;  %s444_s21 = scalar_lea.vmem [#allocation4], %s2585_s15 }
  0xc7   : > { %s452_s7 = sshll.u32 %s444_s21, 4  ;;  %s3048_s13 = sand.u32 1, %s2339_s23   ;;  %s453_s7 = int_to_ptr.vmem [resolvable:$true] %s452_s7 }
  0xc8   : > { %s441_s12 = scalar_lea.sflag [#allocation5], %s3048_s13  ;;  %s2193_s19 = scalar_lea.hbm %s2694_s18, 64 }
  0xc9   : > { %p2194_p3 = scmp.ne.s32.totalorder %s2694_s18, %s2193_s19  ;;  %p3049_p2 = scmp.ne.s32.totalorder %s3042_s25, 0 }
  0xca   : > { %s2198_s26 = scalar_lea.hbm %s2976_s0, 128  ;;  %p2199_p1 = scmp.lt.u32.totalorder %s2694_s18, %s2976_s0 }
  0xcb   : > { %p2196_p6 = pnand %p2194_p3, %p3049_p2  ;;  %p2200_p9 = scmp.lt.u32.totalorder %s2198_s26, %s2193_s19 }
  0xcc   : > { %p2202_p5 = scmp.lt.u32.totalorder %s2193_s19, %s2694_s18 }
  0xcd   : > { %p2197_p8 = pneg %p2196_p6  ;;  %p2201_p12 = por %p2200_p9, %p2199_p1 }
  0xcf   : > { %p2203_p11 = por %p2202_p5, %p2201_p12 }
  0xd1   : > { %p2204_p7 = pnand %p2203_p11, %p2197_p8 }
  0xd3   : > { %2207 = shalt.err (!%p2204_p7)
}
  0xd4   : > { %s2208_s30 = scalar_lea.vmem %s453_s7, 64  ;;  %s2361_s10 = smov [#allocation4]  }
  0xd5   : > { %p2209_p0 = scmp.ne.s32.totalorder %s453_s7, %s2208_s30  ;;  %s2213_s3 = sshll.u32 %s2361_s10, 4  ;;  %s2214_s3 = int_to_ptr.vmem [resolvable:$false] %s2213_s3 }
  0xd6   : > { %s2215_s5 = scalar_lea.vmem %s2214_s3, 128  ;;  %p2216_p13 = scmp.lt.s32.totalorder %s453_s7, %s2214_s3 }
  0xd7   : > { %p2211_p4 = pnand %p2209_p0, %p3049_p2  ;;  %p2217_p3 = scmp.lt.s32.totalorder %s2215_s5, %s2208_s30 }
  0xd9   : > { %p2212_p10 = pneg %p2211_p4  ;;  %p2218_p6 = por %p2217_p3, %p2216_p13 }
  0xdb   : > { %p2219_p1 = pnand %p2218_p6, %p2212_p10 }
  0xdd   : > { %2222 = shalt.err (!%p2219_p1)
}
  0xde   : > { %p3050_p9 = scmp.ne.s32.totalorder %s3040_s17, 0  ;;  %s2720_s13 = scalar_lea.hbm %s2978_s2, %s2581_s11 }
  0xdf   : > { %s481_s19 = scalar_lea.vmem [#allocation9], %s2585_s15  ;;  %s2223_s24 = scalar_lea.hbm %s2720_s13, 64 }
  0xe0   : > { %1915 = dma.hbm_to_vmem [thread:$0]  (!%p3050_p9), %s2694_s18, 64, %s453_s7, %s441_s12  }
  0xe1   : > { %s488_s16 = sshll.u32 %s481_s19, 4  ;;  %p2224_p8 = scmp.ne.s32.totalorder %s2720_s13, %s2223_s24  ;;  %s489_s16 = int_to_ptr.vmem [resolvable:$true] %s488_s16 }
  0xe2   : > { %s2228_s18 = scalar_lea.hbm %s2978_s2, 128  ;;  %p2229_p11 = scmp.lt.u32.totalorder %s2720_s13, %s2978_s2 }
  0xe3   : > { %p2226_p12 = pnand %p2224_p8, %p3049_p2  ;;  %p2230_p7 = scmp.lt.u32.totalorder %s2228_s18, %s2223_s24 }
  0xe4   : > { %p2232_p4 = scmp.lt.u32.totalorder %s2223_s24, %s2720_s13 }
  0xe5   : > { %p2227_p5 = pneg %p2226_p12  ;;  %p2231_p0 = por %p2230_p7, %p2229_p11 }
  0xe7   : > { %p2233_p10 = por %p2232_p4, %p2231_p0 }
  0xe9   : > { %p2234_p13 = pnand %p2233_p10, %p2227_p5 }
  0xeb   : > { %2237 = shalt.err (!%p2234_p13)
}
  0xec   : > { %s2238_s11 = scalar_lea.vmem %s489_s16, 64  ;;  %s2362_s15 = smov [#allocation9]  }
  0xed   : > { %p2239_p3 = scmp.ne.s32.totalorder %s489_s16, %s2238_s11  ;;  %s2243_s1 = sshll.u32 %s2362_s15, 4  ;;  %s2244_s1 = int_to_ptr.vmem [resolvable:$false] %s2243_s1 }
  0xee   : > { %s2245_s30 = scalar_lea.vmem %s2244_s1, 128  ;;  %p2246_p8 = scmp.lt.s32.totalorder %s489_s16, %s2244_s1 }
  0xef   : > { %p2241_p6 = pnand %p2239_p3, %p3049_p2  ;;  %p2247_p12 = scmp.lt.s32.totalorder %s2245_s30, %s2238_s11 }
  0xf1   : > { %p2242_p1 = pneg %p2241_p6  ;;  %p2248_p9 = por %p2247_p12, %p2246_p8 }
  0xf3   : > { %p2249_p7 = pnand %p2248_p9, %p2242_p1 }
  0xf5   : > { %2252 = shalt.err (!%p2249_p7)
}
  0xf6   : > { %p3051_p11 = scmp.ne.s32.totalorder %s3040_s17, 0  ;;  %p3052_p5 = scmp.ne.s32.totalorder %s3027_s28, 0 }
  0xf7   : > { %s2744_s25 = sand.u32 (!%p3052_p5), 1, %s2335_s22   ;;  %p3053_p2 = scmp.ne.s32.totalorder (!%p3052_p5), %s3034_s14, 0 }
  0xf8   : > { %1921 = dma.hbm_to_vmem [thread:$0]  (!%p3051_p11), %s2720_s13, 64, %s489_s16, %s2603_s20  }
  0xf9   : > { %497 = sbr.rel (%p3052_p5) target bundleno = 2426 (0x97a), region = 68  ;;  %s2747_s10 = sshll.u32 (!%p3052_p5), %s2744_s25, 2 }
  0xfa   : > { %s500_s3 = scalar_lea.sflag (!%p3052_p5), [#allocation5], %s2744_s25  ;;  %s503_s5 = scalar_lea.vmem (!%p3052_p5), [#allocation4], %s2747_s10 }
 0x100   : > { %2306 = dma.done.wait (%p3053_p2), %s500_s3, 64  }
 0x101   : > { %2308 = vsyncadd (%p3053_p2), %s500_s3, 4294967232  ;;  %s508_s28 = sand.u32 1, %s2466_s27   ;;  %s512_s20 = scalar_lea.vmem [#allocation7], %s2747_s10 }
 0x102   : > { %s509_s17 = scalar_lea.sflag [#allocation8], %s508_s28 }
 0x103   : > { %2310 = dma.done.wait (%p3053_p2), %s509_s17, 128  }
 0x104   : > { %2312 = vsyncadd (%p3053_p2), %s509_s17, 4294967168  ;;  %s521_s29 = scalar_lea.vmem [#allocation9], %s2747_s10  ;;  %p3054_p9 = scmp.eq.s32.totalorder %s2466_s27, 0 }
 0x106   : > { %2314 = dma.done.wait (%p3054_p9), [#allocation11], 272   ;;  %p3055_p0 = pmov %p3054_p9 }
 0x108   : > { %2316 = vsyncadd (%p3055_p0), [#allocation11], 4294967024  ;;  %p3056_p4 = pmov %p3055_p0 }
 0x109   : > { %p3057_p10 = pmov %p3055_p0 }
 0x10a   : > { %2318 = dma.done.wait (%p3056_p4), [#allocation14], 272  }
 0x10b   : > { %2320 = vsyncadd (%p3057_p10), [#allocation14], 4294967024  ;;  %p3058_p13 = pmov %p3055_p0 }
 0x10c   : > { %p3059_p3 = pmov %p3055_p0 }
 0x10d   : > { %2322 = dma.done.wait (%p3058_p13), [#allocation17], 16  }
 0x10e   : > { %2324 = vsyncadd (%p3059_p3), [#allocation17], 4294967280  ;;  %v2363_v0 = vmov 0.0   ;;  %vm2364_vm0 = vmmov 0   ;;  %v1999_v1 = vld [vmem:[%s2982_s6] sm:$0xff]   ;;  %v2000_v2 = vld [vmem:[%s2982_s6 + $0x8] sm:$0xff]   ;;  %v865_v41 = vlaneseq }
 0x10f   : > { %1772 = vmatprep.subr.bf16.mxu0 %v2363_v0  ;;  %1776 = vmatprep.mubr.msk.bf16.mxu0 %vm2364_vm0, %v2363_v0  ;;  %v2001_v3 = vld [vmem:[#allocation15] sm:$0xff]   ;;  %v2002_v4 = vld [vmem:[#allocation15 + $0x8] sm:$0xff]   ;;  %vm627_vm1 = vcmask 261120   ;;  %v2004_v8 = vld [vmem:[#allocation10 + $0x8] sm:$0xff]   ;;  %vm739_vm2 = vcmask 257024   ;;  %vm817_vm3 = vcmask 64512  }
 0x110   : > { %1780 = vmatprep.subr.bf16.mxu1 %v2363_v0  ;;  %1784 = vmatprep.mubr.msk.bf16.mxu1 %vm2364_vm0, %v2363_v0  ;;  %v603_v5 = vld [vmem:[%s512_s20] sm:$0xf]  ;;  %v2003_v6 = vld [vmem:[#allocation10] sm:$0xff]   ;;  %v671_v7 = vld [vmem:[%s521_s29] sm:$0xf]  ;;  %s2365_s19 = smov 120  }
 0x111   : > { %1773 = vmatpush3.bf16.msra.mxu0 %v1999_v1  ;;  %1781 = vmatpush3.bf16.msra.mxu1 %v2001_v3  ;;  %v743_v9 = vld [vmem:[%s503_s5] sm:$0xf]  ;;  %v1708_v10 = vld [vmem:[#allocation13] ss:$0 sm:$0xff]  ;;  %v1712_v14 = vld [vmem:[#allocation16] ss:$0 sm:$0xff] }
 0x112   : > { %1774 = vmatprep.subr.bf16.mxu0 %v2363_v0  ;;  %1782 = vmatprep.subr.bf16.mxu1 %v2363_v0  ;;  %v1716_v23 = vld [vmem:[#allocation12] ss:$0 sm:$0xff]  ;;  %s3060_s16 = sld [smem:[#allocation26_spill]]  ;;  %s2366_s24 = smov 112   ;;  %vm888_vm4 = vcmask 1043456   ;;  %v866_v43 = vshrl.u32 %v865_v41, 7 }
 0x113   : > { %s3061_s7 = sld [smem:[#allocation34_spill]]  ;;  %v2367_v45 = vmov 0   ;;  %s2368_s11 = smov 104  }
 0x114   : > { %v867_v44 = vsub.s32 0, %v866_v43  ;;  %s3062_s30 = sld [smem:[#allocation38_spill]]  ;;  %s1707_s29 = sshll.u32 %s2744_s25, 3 }
 0x115   : > { %1775 = vmatpush3.bf16.msra.mxu0 %v2000_v2  ;;  %1783 = vmatpush3.bf16.msra.mxu1 %v2002_v4  ;;  %s3063_s13 = sld [smem:[#allocation39_spill]]  ;;  %s2369_s15 = smov [#allocation18]  }
 0x116   : > { %1788 = vmatprep.subr.bf16.mxu0 %v2363_v0  ;;  %1796 = vmatprep.subr.bf16.mxu1 %v2363_v0  ;;  %s3064_s27 = sld [smem:[#allocation30_spill]]  ;;  %s2257_s1 = sshll.u32 %s2369_s15, 4  ;;  %s2258_s1 = int_to_ptr.vmem [resolvable:$false] %s2257_s1 }
 0x117   : > { %s2259_s10 = scalar_lea.vmem %s2258_s1, 256 }
 0x118   : > { %1777 = vmatmul.mubr.msk.bf16.vlgmr.msra.gmra.mrb[0].mxu0 %vm627_vm1, %v603_v5  ;;  %1785 = vmatmul.mubr.msk.bf16.vlgmr.msra.gmra.mrb[0].mxu1 %vm627_vm1, %v671_v7  ;;  %p595_p6 = scmp.lt.s32.totalorder %s3060_s16, 1 }
 0x119   : > { %1789 = vmatpush3.bf16.msra.mxu0 %v2003_v6  ;;  %1792 = vmatprep.mubr.msk.bf16.mxu0 %vm2364_vm0, %v2363_v0 }
 0x11a   : > { %1790 = vmatprep.subr.bf16.mxu0 %v2363_v0  ;;  %1798 = vmatprep.mubr.msk.bf16.mxu1 %vm2364_vm0, %v2363_v0  ;;  %s596_s26 = scalar_select %p595_p6, %s3060_s16, 1 }
 0x11c   : > { %s597_s12 = scalar_lea.vmem %s3061_s7, %s596_s26  ;;  %s3065_s7 = sld [smem:[#allocation40_spill]] }
 0x11d   : > { %1791 = vmatpush3.bf16.msra.mxu0 %v2004_v8  ;;  %v813_v42 = vld [vmem:[%s597_s12] sm:$0x1]  ;;  %p3066_p8 = scmp.ne.s32.totalorder %s3064_s27, 0 }
 0x11e   : > { %1802 = vmatprep.subr.bf16.mxu0 %v2363_v0  ;;  %vm814_vm5 = vcmp.ne.s32.totalorder %v813_v42, 0  ;;  %v934_v8 = vld [vmem:[%s3062_s30] sm:$0xf] }
 0x11f   : > { %v864_v46 = vsel %vm814_vm5, 1, %v2367_v45 }
 0x120   : > { %1793 = vmatmul.mubr.msk.bf16.vlgmr.msra.gmra.mrb[4].mxu0 %vm627_vm1, %v743_v9  ;;  %v2832_v47 = vrot.slane %v864_v46, %v867_v44 }
 0x121   : > { %1804 = vmatprep.mubr.msk.bf16.mxu0 %vm2364_vm0, %v2363_v0 }
 0x122   : > { %vm869_vm6 = vcmp.eq.s32.totalorder %v2832_v47, 1 }
 0x1eb   : > { %v665_v11 = vpop.f32.mrb[0].mxu0  ;;  %v732_v18 = vpop.f32.mrb[0].mxu1 }
 0x1ec   : > { %v666_v12 = vadd.f32 %v1708_v10, %v665_v11  ;;  %v1778_v13 = vpop.f32.mrb[1].mxu0  ;;  %v733_v19 = vadd.f32 %v1712_v14, %v732_v18  ;;  %v1786_v20 = vpop.f32.mrb[1].mxu1 }
 0x1ed   : > { %v668_v15 = vpop.f32.mrb[2].mxu0  ;;  %v735_v21 = vpop.f32.mrb[2].mxu1  ;;  %v1057_v13 = vld [vmem:[%s3062_s30 + $0x4] sm:$0xf] }
 0x1ee   : > { %v738_v16 = vpack.c.bf16 %v666_v12, %v666_v12  ;;  %v1779_v17 = vpop.f32.mrb[3].mxu0  ;;  %v741_v22 = vpack.c.bf16 %v733_v19, %v733_v19  ;;  %v1787_v24 = vpop.f32.mrb[3].mxu1  ;;  %v1108_v12 = vsel %vm888_vm4, %v934_v8, 0  ;;  %v1062_v14 = vsel %vm888_vm4, %v1057_v13, 0 }
 0x1f0   : > { %740 = vst.msk [vmem:[#allocation2] sm:$0xf] %vm739_vm2, %v738_v16  ;;  %742 = vst.msk [vmem:[#allocation3] sm:$0xf] %vm739_vm2, %v741_v22 }
 0x1f3   : > { %v805_v25 = vpop.f32.mrb[4].mxu0 }
 0x1f4   : > { %v806_v26 = vadd.f32 %v1716_v23, %v805_v25  ;;  %v1794_v27 = vpop.f32.mrb[5].mxu0 }
 0x1f5   : > { %v808_v28 = vpop.f32.mrb[6].mxu0 }
 0x1f6   : > { %v811_v29 = vmul.f32 0.35355338, %v806_v26  ;;  %v1795_v30 = vpop.f32.mrb[7].mxu0 }
 0x1f7   : > { %v815_v31 = vld [vmem:[#allocation2] sm:$0xf]  ;;  %v816_v35 = vld [vmem:[#allocation3] sm:$0xf] }
 0x1f8   : > { %v822_v32 = vsel %vm817_vm3, %v815_v31, 0  ;;  %v2804_v33 = vcombine.low %v815_v31, %v815_v31  ;;  %v2806_v34 = vpack.c.bf16 %v811_v29, %v811_v29  ;;  %v2811_v36 = vcombine.low %v816_v35, %v816_v35 }
 0x1f9   : > { %1797 = vmatpush3.bf16.xpose.msra.mxu1 %v822_v32  ;;  %v890_v37 = vsel %vm888_vm4, %v816_v35, 0 }
 0x1fa   : > { %941 = vrot.lane.b32.xlu0 %v2804_v33, %s2365_s19  ;;  %1808 = vmatprep.subr.bf16.mxu1 %v2363_v0 }
 0x1fb   : > { %1803 = vmatpush3.bf16.msra.mxu0 %v890_v37 }
 0x1fc   : > { %1814 = vmatprep.subr.bf16.mxu0 %v2363_v0 }
 0x1fe   : > { %936 = vrot.lane.b32.xlu0 %v2806_v34, %s2365_s19 }
 0x200   : > { %1799 = vmatmul.mubr.msk.bf16.vlgmr.msra.gmra.mrb[4].mxu1 %vm817_vm3, %v2806_v34 }
 0x201   : > { %1810 = vmatprep.mubr.msk.bf16.mxu1 %vm2364_vm0, %v2363_v0 }
 0x202   : > { %1007 = vrot.lane.b32.xlu0 %v2811_v36, %s2365_s19  ;;  %s1736_s19 = sshll.u32 %s3060_s16, 7  ;;  %s1486_s16 = scalar_lea.sflag [#allocation6], %s2744_s25 }
 0x203   : > { %s2926_s12 = scalar_lea.hbm %s3065_s7, %s1736_s19 }
 0x206   : > { %1152 = vrot.lane.b32.xlu0 %v2804_v33, %s2366_s24 }
 0x26c   : > { %v942_v38 = vpop.permute.xlu0 %941 }
 0x26d   : > { %v947_v39 = vsel %vm817_vm3, %v942_v38, 0 }
 0x26e   : > { %1809 = vmatpush3.bf16.xpose.msra.mxu1 %v947_v39 }
 0x26f   : > { %1820 = vmatprep.subr.bf16.mxu1 %v2363_v0 }
 0x270   : > { %v937_v40 = vpop.permute.xlu0 %936 }
 0x274   : > { %v1008_v1 = vpop.permute.xlu0 %1007 }
 0x275   : > { %1811 = vmatmul.mubr.msk.bf16.vlgmr.msra.gmra.mrb[8].mxu1 %vm817_vm3, %v937_v40  ;;  %v1013_v2 = vsel %vm888_vm4, %v1008_v1, 0 }
 0x276   : > { %1822 = vmatprep.mubr.msk.bf16.mxu1 %vm2364_vm0, %v2363_v0  ;;  %1821 = vmatpush3.bf16.msra.mxu1 %v1062_v14 }
 0x277   : > { %1832 = vmatprep.subr.bf16.mxu1 %v2363_v0 }
 0x278   : > { %v1153_v15 = vpop.permute.xlu0 %1152 }
 0x279   : > { %v1158_v42 = vsel %vm817_vm3, %v1153_v15, 0 }
 0x2d3   : > { %v858_v48 = vpop.f32.mrb[4].mxu1 }
 0x2d4   : > { %v870_v49 = vsel %vm869_vm6, %v858_v48, -1e+09  ;;  %v1800_v50 = vpop.f32.mrb[5].mxu1 }
 0x2d5   : > { %v861_v51 = vpop.f32.mrb[6].mxu1  ;;  %v871_v52 = vsel %vm817_vm3, %v870_v49, -inf }
 0x2d6   : > { %872 = vmax.xlane.f32.xlu1 %v871_v52  ;;  %v1801_v53 = vpop.f32.mrb[7].mxu1 }
 0x348   : > { %v983_v54 = vpop.f32.mrb[8].mxu1 }
 0x349   : > { %v989_v55 = vsel %vm869_vm6, %v983_v54, -1e+09  ;;  %v1812_v56 = vpop.f32.mrb[9].mxu1 }
 0x34a   : > { %v986_v57 = vpop.f32.mrb[10].mxu1  ;;  %v990_v58 = vsel %vm817_vm3, %v989_v55, -inf }
 0x34b   : > { %991 = vmax.xlane.f32.xlu1 %v990_v58  ;;  %v1813_v59 = vpop.f32.mrb[11].mxu1 }
 0x363   : > { %v873_v60 = vpop.xlane.xlu1 %872 }
 0x364   : > { %v874_v61 = vsub.f32 %v870_v49, %v873_v60 }
 0x366   : > { %v875_v62 = vmul.f32 1.442695, %v874_v61 }
 0x368   : > { %2007 = vpow2.f32 %v875_v62 }
 0x372   : > { %v2008_v63 = vpop.eup %2007 }
 0x373   : > { %v877_v3 = vsel %vm817_vm3, %v2008_v63, 0.0  ;;  %v884_v4 = vpack.c.bf16 %v2008_v63, %v2008_v63 }
 0x374   : > { %878 = vadd.xlane.f32.xlu0 %v877_v3 }
 0x375   : > { %1805 = vmatmul.mubr.msk.bf16.vlgmr.msra.gmra.mrb[8].mxu0 %vm817_vm3, %v884_v4 }
 0x376   : > { %1815 = vmatpush3.bf16.msra.mxu0 %v1013_v2  ;;  %1816 = vmatprep.mubr.msk.bf16.mxu0 %vm2364_vm0, %v2363_v0 }
 0x377   : > { %1826 = vmatprep.subr.bf16.mxu0 %v2363_v0 }
 0x38a   : > { %1215 = vrot.lane.b32.xlu0 %v2811_v36, %s2366_s24 }
 0x38e   : > { %1313 = vrot.lane.b32.xlu0 %v2806_v34, %s2368_s11 }
 0x3d8   : > { %v992_v5 = vpop.xlane.xlu1 %991 }
 0x3d9   : > { %v993_v6 = vsub.f32 %v989_v55, %v992_v5  ;;  %v1265_v5 = vld [vmem:[%s3062_s30 + $0x8] sm:$0xf] }
 0x3db   : > { %v994_v7 = vmul.f32 1.442695, %v993_v6  ;;  %v1270_v6 = vsel %vm888_vm4, %v1265_v5, 0 }
 0x3dd   : > { %2009 = vpow2.f32 %v994_v7 }
 0x3e7   : > { %v2010_v9 = vpop.eup %2009 }
 0x3e8   : > { %v996_v10 = vsel %vm817_vm3, %v2010_v9, 0.0  ;;  %v1003_v11 = vpack.c.bf16 %v2010_v9, %v2010_v9 }
 0x3e9   : > { %997 = vadd.xlane.f32.xlu1 %v996_v10 }
 0x3ea   : > { %1817 = vmatmul.mubr.msk.bf16.vlgmr.msra.gmra.mrb[12].mxu0 %vm817_vm3, %v1003_v11 }
 0x3eb   : > { %1827 = vmatpush3.bf16.msra.mxu0 %v1108_v12  ;;  %1828 = vmatprep.mubr.msk.bf16.mxu0 %vm2364_vm0, %v2363_v0 }
 0x3ec   : > { %1838 = vmatprep.subr.bf16.mxu0 %v2363_v0 }
 0x3fa   : > { %1150 = vrot.lane.b32.xlu1 %v2806_v34, %s2366_s24  ;;  %s594_s24 = scalar_lea.vmem [#allocation18], %s1707_s29 }
 0x3fb   : > { %s1500_s26 = sshll.u32 %s594_s24, 4  ;;  %s2928_s26 = int_to_ptr.vmem [resolvable:$true] %s1500_s26 }
 0x3fc   : > { %p2260_p11 = scmp.lt.s32.totalorder %s2928_s26, %s2258_s1 }
 0x401   : > { %v879_v16 = vpop.xlane.xlu0 %878 }
 0x402   : > { %2011 = vrcp.f32 %v879_v16 }
 0x405   : > { %v1216_v24 = vpop.permute.xlu0 %1215 }
 0x406   : > { %v1221_v28 = vsel %vm888_vm4, %v1216_v24, 0 }
 0x40c   : > { %v2012_v17 = vpop.eup %2011 }
 0x40d   : > { %v881_v18 = vmul.f32 %v2012_v17, %v879_v16 }
 0x40f   : > { %v882_v19 = vsub.f32 2.0, %v881_v18 }
 0x411   : > { %v883_v20 = vmul.f32 %v2012_v17, %v882_v19 }
 0x448   : > { %v926_v21 = vpop.f32.mrb[8].mxu0 }
 0x449   : > { %v932_v22 = vmul.f32 %v926_v21, %v883_v20  ;;  %v1806_v23 = vpop.f32.mrb[9].mxu0 }
 0x44a   : > { %v929_v25 = vpop.f32.mrb[10].mxu0 }
 0x44b   : > { %v933_v26 = vpack.c.bf16 %v932_v22, %v932_v22  ;;  %v1807_v27 = vpop.f32.mrb[11].mxu0 }
 0x44d   : > { %1829 = vmatmul.mubr.msk.bf16.vlgmr.msra.gmra.mrb[16].mxu0 %vm817_vm3, %v933_v26 }
 0x44e   : > { %1839 = vmatpush3.bf16.msra.mxu0 %v1221_v28  ;;  %1840 = vmatprep.mubr.msk.bf16.mxu0 %vm2364_vm0, %v2363_v0 }
 0x44f   : > { %1850 = vmatprep.subr.bf16.mxu0 %v2363_v0 }
 0x476   : > { %v998_v29 = vpop.xlane.xlu1 %997 }
 0x477   : > { %2013 = vrcp.f32 %v998_v29 }
 0x47a   : > { %v1151_v43 = vpop.permute.xlu1 %1150 }
 0x481   : > { %v2014_v30 = vpop.eup %2013 }
 0x482   : > { %v1000_v31 = vmul.f32 %v2014_v30, %v998_v29 }
 0x484   : > { %v1001_v32 = vsub.f32 2.0, %v1000_v31 }
 0x486   : > { %v1002_v34 = vmul.f32 %v2014_v30, %v1001_v32 }
 0x4bd   : > { %v1049_v35 = vpop.f32.mrb[12].mxu0 }
 0x4be   : > { %v1055_v37 = vmul.f32 %v1049_v35, %v1002_v34  ;;  %v1818_v38 = vpop.f32.mrb[13].mxu0 }
 0x4bf   : > { %v1052_v39 = vpop.f32.mrb[14].mxu0 }
 0x4c0   : > { %v1056_v40 = vpack.c.bf16 %v1055_v37, %v1055_v37  ;;  %v1819_v41 = vpop.f32.mrb[15].mxu0 }
 0x4c2   : > { %1823 = vmatmul.mubr.msk.bf16.vlgmr.msra.gmra.mrb[12].mxu1 %vm817_vm3, %v1056_v40 }
 0x4c3   : > { %1833 = vmatpush3.bf16.xpose.msra.mxu1 %v1158_v42  ;;  %1834 = vmatprep.mubr.msk.bf16.mxu1 %vm2364_vm0, %v2363_v0 }
 0x4c4   : > { %1844 = vmatprep.subr.bf16.mxu1 %v2363_v0 }
 0x4ca   : > { %1835 = vmatmul.mubr.msk.bf16.vlgmr.msra.gmra.mrb[16].mxu1 %vm817_vm3, %v1151_v43 }
 0x4cb   : > { %1846 = vmatprep.mubr.msk.bf16.mxu1 %vm2364_vm0, %v2363_v0  ;;  %1845 = vmatpush3.bf16.msra.mxu1 %v1270_v6 }
 0x4cc   : > { %1856 = vmatprep.subr.bf16.mxu1 %v2363_v0 }
 0x520   : > { %v1144_v44 = vpop.f32.mrb[16].mxu0 }
 0x521   : > { %v1830_v45 = vpop.f32.mrb[17].mxu0 }
 0x522   : > { %v1147_v46 = vpop.f32.mrb[18].mxu0 }
 0x523   : > { %v1831_v48 = vpop.f32.mrb[19].mxu0 }
 0x595   : > { %v1098_v49 = vpop.f32.mrb[12].mxu1 }
 0x596   : > { %v2880_v50 = vadd.f32 %v1144_v44, %v1098_v49  ;;  %v1824_v51 = vpop.f32.mrb[13].mxu1 }
 0x597   : > { %v1101_v52 = vpop.f32.mrb[14].mxu1  ;;  %v1734_v51 = vld [vmem:[%s3063_s13] ss:$0 sm:$0xff] }
 0x598   : > { %v1825_v53 = vpop.f32.mrb[15].mxu1 }
 0x59d   : > { %v1194_v54 = vpop.f32.mrb[16].mxu1 }
 0x59e   : > { %v1200_v55 = vsel %vm869_vm6, %v1194_v54, -1e+09  ;;  %v1836_v56 = vpop.f32.mrb[17].mxu1 }
 0x59f   : > { %v1197_v57 = vpop.f32.mrb[18].mxu1  ;;  %v1201_v58 = vsel %vm817_vm3, %v1200_v55, -inf }
 0x5a0   : > { %1202 = vmax.xlane.f32.xlu1 %v1201_v58  ;;  %v1837_v59 = vpop.f32.mrb[19].mxu1 }
 0x5b1   : > { %1315 = vrot.lane.b32.xlu1 %v2804_v33, %s2368_s11  ;;  %v1314_v33 = vpop.permute.xlu0 %1313 }
 0x62d   : > { %v1203_v60 = vpop.xlane.xlu1 %1202 }
 0x62e   : > { %v1204_v61 = vsub.f32 %v1200_v55, %v1203_v60 }
 0x630   : > { %v1205_v62 = vmul.f32 1.442695, %v1204_v61 }
 0x631   : > { %v1316_v1 = vpop.permute.xlu1 %1315 }
 0x632   : > { %2015 = vpow2.f32 %v1205_v62  ;;  %v1321_v4 = vsel %vm817_vm3, %v1316_v1, 0 }
 0x63c   : > { %v2016_v63 = vpop.eup %2015 }
 0x63d   : > { %v1207_v2 = vsel %vm817_vm3, %v2016_v63, 0.0  ;;  %v1214_v3 = vpack.c.bf16 %v2016_v63, %v2016_v63 }
 0x63e   : > { %1208 = vadd.xlane.f32.xlu0 %v1207_v2 }
 0x63f   : > { %1841 = vmatmul.mubr.msk.bf16.vlgmr.msra.gmra.mrb[20].mxu0 %vm817_vm3, %v1214_v3 }
 0x640   : > { %1851 = vmatpush3.bf16.xpose.msra.mxu0 %v1321_v4  ;;  %1852 = vmatprep.mubr.msk.bf16.mxu0 %vm2364_vm0, %v2363_v0 }
 0x641   : > { %1862 = vmatprep.subr.bf16.mxu0 %v2363_v0 }
 0x647   : > { %1853 = vmatmul.mubr.msk.bf16.vlgmr.msra.gmra.mrb[24].mxu0 %vm817_vm3, %v1314_v33 }
 0x648   : > { %1864 = vmatprep.mubr.msk.bf16.mxu0 %vm2364_vm0, %v2363_v0 }
 0x654   : > { %1378 = vrot.lane.b32.xlu0 %v2811_v36, %s2368_s11  ;;  %s2253_s11 = scalar_lea.vmem %s2928_s26, 128 }
 0x655   : > { %p2254_p1 = scmp.ne.s32.totalorder %s2928_s26, %s2253_s11  ;;  %p2261_p5 = scmp.lt.s32.totalorder %s2259_s10, %s2253_s11 }
 0x657   : > { %p2255_p12 = pnand %p2254_p1, %p3066_p8  ;;  %p2262_p2 = por %p2261_p5, %p2260_p11 }
 0x659   : > { %p2256_p7 = pneg %p2255_p12 }
 0x65b   : > { %p2263_p9 = pnand %p2262_p2, %p2256_p7 }
 0x6cb   : > { %v1209_v7 = vpop.xlane.xlu0 %1208 }
 0x6cc   : > { %2017 = vrcp.f32 %v1209_v7 }
 0x6cf   : > { %v1379_v15 = vpop.permute.xlu0 %1378 }
 0x6d0   : > { %v1384_v18 = vsel %vm888_vm4, %v1379_v15, 0 }
 0x6d6   : > { %v2018_v8 = vpop.eup %2017 }
 0x6d7   : > { %v1211_v9 = vmul.f32 %v2018_v8, %v1209_v7 }
 0x6d9   : > { %v1212_v10 = vsub.f32 2.0, %v1211_v9 }
 0x6db   : > { %v1213_v11 = vmul.f32 %v2018_v8, %v1212_v10 }
 0x712   : > { %v1257_v12 = vpop.f32.mrb[20].mxu0 }
 0x713   : > { %v1263_v13 = vmul.f32 %v1257_v12, %v1213_v11  ;;  %v1842_v14 = vpop.f32.mrb[21].mxu0 }
 0x714   : > { %v1260_v36 = vpop.f32.mrb[22].mxu0 }
 0x715   : > { %v1264_v16 = vpack.c.bf16 %v1263_v13, %v1263_v13  ;;  %v1843_v17 = vpop.f32.mrb[23].mxu0 }
 0x717   : > { %1847 = vmatmul.mubr.msk.bf16.vlgmr.msra.gmra.mrb[20].mxu1 %vm817_vm3, %v1264_v16 }
 0x718   : > { %1857 = vmatpush3.bf16.msra.mxu1 %v1384_v18  ;;  %1858 = vmatprep.mubr.msk.bf16.mxu1 %vm2364_vm0, %v2363_v0  ;;  %v1428_v0 = vld [vmem:[%s3062_s30 + $0xc] sm:$0xf] }
 0x719   : > { %v1433_v47 = vsel %vm888_vm4, %v1428_v0, 0 }
 0x71a   : > { %v1357_v19 = vpop.f32.mrb[24].mxu0  ;;  %1863 = vmatpush3.bf16.msra.mxu0 %v1433_v47 }
 0x71b   : > { %v1363_v20 = vsel %vm869_vm6, %v1357_v19, -1e+09  ;;  %v1854_v21 = vpop.f32.mrb[25].mxu0 }
 0x71c   : > { %v1360_v22 = vpop.f32.mrb[26].mxu0  ;;  %v1364_v23 = vsel %vm817_vm3, %v1363_v20, -inf }
 0x71d   : > { %1365 = vmax.xlane.f32.xlu1 %v1364_v23  ;;  %v1855_v24 = vpop.f32.mrb[27].mxu0 }
 0x7aa   : > { %v1366_v25 = vpop.xlane.xlu1 %1365 }
 0x7ab   : > { %v1367_v26 = vsub.f32 %v1363_v20, %v1366_v25 }
 0x7ad   : > { %v1368_v27 = vmul.f32 1.442695, %v1367_v26 }
 0x7af   : > { %2019 = vpow2.f32 %v1368_v27 }
 0x7b9   : > { %v2020_v28 = vpop.eup %2019 }
 0x7ba   : > { %v1370_v29 = vsel %vm817_vm3, %v2020_v28, 0.0  ;;  %v1377_v30 = vpack.c.bf16 %v2020_v28, %v2020_v28 }
 0x7bb   : > { %1371 = vadd.xlane.f32.xlu1 %v1370_v29 }
 0x7bc   : > { %1859 = vmatmul.mubr.msk.bf16.vlgmr.msra.gmra.mrb[24].mxu1 %vm817_vm3, %v1377_v30 }
 0x7ea   : > { %v1306_v31 = vpop.f32.mrb[20].mxu1 }
 0x7eb   : > { %v1312_v32 = vadd.f32 %v1306_v31, %v2880_v50  ;;  %v1848_v34 = vpop.f32.mrb[21].mxu1 }
 0x7ec   : > { %v1309_v35 = vpop.f32.mrb[22].mxu1 }
 0x7ed   : > { %v1849_v37 = vpop.f32.mrb[23].mxu1 }
 0x848   : > { %v1372_v38 = vpop.xlane.xlu1 %1371 }
 0x849   : > { %2021 = vrcp.f32 %v1372_v38 }
 0x853   : > { %v2022_v39 = vpop.eup %2021 }
 0x854   : > { %v1374_v40 = vmul.f32 %v2022_v39, %v1372_v38 }
 0x856   : > { %v1375_v41 = vsub.f32 2.0, %v1374_v40 }
 0x858   : > { %v1376_v42 = vmul.f32 %v2022_v39, %v1375_v41 }
 0x88f   : > { %v1420_v43 = vpop.f32.mrb[24].mxu1 }
 0x890   : > { %v1426_v44 = vmul.f32 %v1420_v43, %v1376_v42  ;;  %v1860_v45 = vpop.f32.mrb[25].mxu1 }
 0x891   : > { %v1423_v46 = vpop.f32.mrb[26].mxu1 }
 0x892   : > { %v1427_v48 = vpack.c.bf16 %v1426_v44, %v1426_v44  ;;  %v1861_v49 = vpop.f32.mrb[27].mxu1 }
 0x894   : > { %1865 = vmatmul.mubr.msk.bf16.vlgmr.msra.gmra.mrb[28].mxu0 %vm817_vm3, %v1427_v48 }
 0x967   : > { %v1469_v50 = vpop.f32.mrb[28].mxu0 }
 0x968   : > { %v1475_v52 = vadd.f32 %v1469_v50, %v1312_v32  ;;  %v1866_v53 = vpop.f32.mrb[29].mxu0 }
 0x969   : > { %v1472_v54 = vpop.f32.mrb[30].mxu0 }
 0x96a   : > { %v1483_v55 = vadd.f32 %v1734_v51, %v1475_v52  ;;  %v1867_v56 = vpop.f32.mrb[31].mxu0 }
 0x96c   : > { %1484 = vst.msk [vmem:[%s594_s24] sm:$0xff] %vm627_vm1, %v1483_v55 }
 0x96d   : > { %2266 = shalt.err (!%p2263_p9)
}
 0x96e   : > { %s2267_s25 = scalar_lea.hbm %s2926_s12, 128  ;;  %s2271_s28 = scalar_lea.hbm %s3065_s7, 256 }
 0x96f   : > { %p2268_p0 = scmp.ne.s32.totalorder %s2926_s12, %s2267_s25  ;;  %p2272_p13 = scmp.lt.u32.totalorder %s2926_s12, %s3065_s7 }
 0x970   : > { %p2273_p3 = scmp.lt.u32.totalorder %s2271_s28, %s2267_s25  ;;  %p2275_p1 = scmp.lt.u32.totalorder %s2267_s25, %s2926_s12 }
 0x971   : > { %p2269_p4 = pnand %p2268_p0, %p3066_p8 }
 0x972   : > { %p2274_p6 = por %p2273_p3, %p2272_p13 }
 0x973   : > { %p2270_p10 = pneg %p2269_p4 }
 0x974   : > { %p2276_p12 = por %p2275_p1, %p2274_p6 }
 0x976   : > { %p2277_p7 = pnand %p2276_p12, %p2270_p10 }
 0x978   : > { %2280 = shalt.err (!%p2277_p7)
}
 0x979   : > { %1894 = dma.vmem_to_hbm [thread:$0]  (%p3066_p8), %s2928_s26, 128, %s2926_s12, %s1486_s16  }
 0x97a PF: > { %s3067_s29 = sld [smem:[#allocation25_spill]]  ;;  %s3068_s14 = sld [smem:[#allocation32_spill]] }
 0x97b   : > { %s3069_s21 = sld [smem:[#allocation28_spill]] }
 0x980   : > { %s1512_s13 = sand.u32 1, %s3067_s29   ;;  %p3070_p11 = scmp.ne.s32.totalorder %s3068_s14, 0 }
 0x981   : > { %p3071_p5 = scmp.ge.s32.totalorder %s3069_s21, 2  ;;  %s1513_s19 = scalar_lea.sflag [#allocation6], %s1512_s13 }
 0x983   : > { %p1923_p2 = pnand %p3071_p5, %p3070_p11 }
 0x985   : > { %2326 = dma.done.wait (!%p1923_p2), %s1513_s19, 128  }
 0x986   : > { %2328 = vsyncadd (!%p1923_p2), %s1513_s19, 4294967168  ;;  %s34_s26 = sadd.s32 1, %s3069_s21   ;;  %s3072_s27 = sld [smem:[#allocation31_spill]] }
 0x987   : > { %p31_p9 = scmp.ge.s32.totalorder %s34_s26, 4   ;;  %s3073_s24 = sld [smem:[#allocation27_spill]] }
 0x988   : > { %s3074_s25 = sld [smem:[#allocation29_spill]]  ;;  %s3075_s21 = smov %s2335_s22 }
 0x989   : > { %s3076_s22 = smov %s2339_s23  ;;  %33 = sbr.rel (!%p31_p9) target bundleno = 20 (0x14), region = 164 }
 0x98c   : > { %s3077_s23 = smov %s3072_s27 }
 0x990   :  { %1518 = vsyncpa [#allocation5], 1 }
 0x991   :  { %1520 = vsyncpa [#allocation5 + $0x1], 1 }
 0x992   :  { %1521 = vsyncpa [#allocation8], 1 }
 0x993   :  { %1523 = vsyncpa [#allocation8 + $0x1], 1 }
 0x994   :  { %1524 = vsyncpa [#allocation11], 1 }
 0x995   :  { %1525 = vsyncpa [#allocation14], 1 }
 0x996   :  { %1526 = vsyncpa [#allocation17], 1 }
 0x997   :  { %1527 = vsyncpa [#allocation6], 1 }
 0x998   :  { %1529 = vsyncpa [#allocation6 + $0x1], 1 }

// kernel: tpu_custom_call.1
= control target key start
LH: loop header
LB: loop body
LE: loop exit
PB: predicated region body
PF: predicated region fallthrough
CT: control target
= control target key end

     0   :  { %s2973_s0 = inlined_call_operand.hbm [shape: bf16[2,8,32], index: 0, kind: input, shape index: {}]   ;;  %s2974_s1 = inlined_call_operand.hbm [shape: bf16[2,8,32], index: 1, kind: input, shape index: {}]   ;;  %s2975_s2 = inlined_call_operand.hbm [shape: bf16[2,8,32], index: 2, kind: input, shape index: {}]   ;;  %s2976_s3 = inlined_call_operand.vmem [shape: s32[2,1,8], index: 3, kind: input, shape index: {}]   ;;  %s2977_s4 = inlined_call_operand.hbm [shape: bf16[32,32], index: 4, kind: input, shape index: {}]   ;;  %s2978_s5 = inlined_call_operand.hbm [shape: f32[1,32], index: 5, kind: input, shape index: {}]   ;;  %s2979_s6 = inlined_call_operand.vmem [shape: bf16[32,32], index: 6, kind: input, shape index: {}]   ;;  %s2980_s7 = inlined_call_operand.hbm [shape: f32[1,32], index: 7, kind: input, shape index: {}]   ;;  %s2981_s8 = inlined_call_operand.hbm [shape: bf16[32,32], index: 8, kind: input, shape index: {}]   ;;  %s2982_s9 = inlined_call_operand.hbm [shape: f32[1,32], index: 9, kind: input, shape index: {}]   ;;  %s2983_s10 = inlined_call_operand.vmem [shape: bf16[32,32], index: 10, kind: input, shape index: {}]   ;;  %s2984_s11 = inlined_call_operand.vmem [shape: f32[1,32], index: 11, kind: input, shape index: {}]   ;;  %s2985_s12 = inlined_call_operand.hbm [shape: f32[2,8,32], index: 12, kind: output, shape index: {}]  }
   0x1   :  { %3012 = sst [smem:[#allocation33_spill]] %s2974_s1 }
   0x2   :  { %3013 = sst [smem:[#allocation34_spill]] %s2976_s3 }
   0x3   :  { %3014 = sst [smem:[#allocation35_spill]] %s2977_s4 }
   0x4   :  { %3015 = sst [smem:[#allocation36_spill]] %s2978_s5 }
   0x5   :  { %3016 = sst [smem:[#allocation37_spill]] %s2980_s7 }
   0x6   :  { %3017 = sst [smem:[#allocation38_spill]] %s2983_s10 }
   0x7   :  { %3018 = sst [smem:[#allocation39_spill]] %s2984_s11 }
   0x8   :  { %3019 = sst [smem:[#allocation40_spill]] %s2985_s12 }
   0x9   :  { %17 = vsyncpa [#allocation5], 0 }
   0xa   :  { %19 = vsyncpa [#allocation5 + $0x1], 0 }
   0xb   :  { %20 = vsyncpa [#allocation8], 0 }
   0xc   :  { %22 = vsyncpa [#allocation8 + $0x1], 0 }
   0xd   :  { %23 = vsyncpa [#allocation11], 0 }
   0xe   :  { %24 = vsyncpa [#allocation14], 0 }
   0xf   :  { %25 = vsyncpa [#allocation17], 0 }
  0x10   :  { %26 = vsyncpa [#allocation6], 0 }
  0x11   :  { %28 = vsyncpa [#allocation6 + $0x1], 0  ;;  %s2432_s21 = smov 0   ;;  %s2434_s22 = smov 0  }
  0x12   :  { %s2436_s23 = smov 0   ;;  %s2438_s24 = smov 0  }
  0x13   :  { %s2440_s25 = smov 0   ;;  %s2442_s26 = smov 0  }
  0x14 LB: > { %3020 = sst [smem:[#allocation25_spill]] %s2328_s21  ;;  %s2463_s27 = sadd.s32 4294967295, %s2348_s26   ;;  %s2348_s26 = sphi %s2442_s26, %s34_s26   ;;  %s2344_s25 = sphi %s2440_s25, %s3071_s25   ;;  %s2340_s24 = sphi %s2438_s24, %s3070_s24   ;;  %s2336_s23 = sphi %s2436_s23, %s3074_s23   ;;  %s2332_s22 = sphi %s2434_s22, %s3073_s22   ;;  %s2328_s21 = sphi %s2432_s21, %s3072_s21  }
  0x15   : > { %3021 = sst [smem:[#allocation26_spill]] %s2340_s24  ;;  %p1682_p0 = scmp.ge.s32.totalorder %s2348_s26, 1 }
  0x16   : > { %3022 = sst [smem:[#allocation27_spill]] %s2344_s25  ;;  %p2996_p1 = scmp.eq.s32.totalorder %s2463_s27, 0 }
  0x17   : > { %3023 = sst [smem:[#allocation28_spill]] %s2348_s26  ;;  %p353_p2 = scmp.lt.s32.totalorder %s2348_s26, 3 }
  0x18   : > { %s2350_s29 = smov [#allocation10]   ;;  %s2351_s14 = smov [#allocation13]  }
  0x19   : > { %p2468_p3 = pnand %p1682_p0, %p353_p2  ;;  %s365_s30 = sshll.u32 %s2350_s29, 4  ;;  %s2472_s30 = int_to_ptr.vmem [resolvable:$true] %s365_s30 }
  0x1a   : > { %s393_s15 = sshll.u32 %s2351_s14, 4  ;;  %s3026_s4 = sld [smem:[#allocation35_spill]]  ;;  %s2483_s15 = int_to_ptr.vmem [resolvable:$true] %s393_s15 }
  0x1b   : > { %s3024_s28 = scalar_select %p2468_p3, 1, 0 }
  0x1c   : > { %p1893_p4 = pneg %p2468_p3 }
  0x1e   : > { %p2479_p6 = pnand %p1893_p4, %p2996_p1 }
  0x20   : > { %s3025_s13 = scalar_select %p2479_p6, 1, 0 }
  0x21   : > { %s2020_s18 = scalar_lea.hbm %s3026_s4, 256  ;;  %p2493_p8 = pneg %p2479_p6 }
  0x22   : > { %p2021_p7 = scmp.ne.s32.totalorder %s3026_s4, %s2020_s18  ;;  %p2027_p11 = scmp.lt.u32.totalorder %s2020_s18, %s3026_s4 }
  0x23   : > { %s3027_s29 = scalar_select %p2493_p8, 1, 0 }
  0x24   : > { %p2023_p9 = pnand %p2493_p8, %p2021_p7 }
  0x26   : > { %p2024_p10 = pneg %p2023_p9 }
  0x28   : > { %p2029_p12 = pnand %p2027_p11, %p2024_p10 }
  0x2a   : > { %2032 = shalt.err (!%p2029_p12)
}
  0x2b   : > { %s2033_s16 = scalar_lea.vmem %s2472_s30, 256  ;;  %p2041_p4 = scmp.lt.s32.totalorder %s2472_s30, %s2472_s30 }
  0x2c   : > { %p2034_p13 = scmp.ne.s32.totalorder %s2472_s30, %s2033_s16  ;;  %p2042_p5 = scmp.lt.s32.totalorder %s2033_s16, %s2033_s16 }
  0x2e   : > { %p2036_p0 = pnand %p2034_p13, %p2493_p8  ;;  %p2043_p7 = por %p2042_p5, %p2041_p4 }
  0x30   : > { %p2037_p2 = pneg %p2036_p0 }
  0x32   : > { %p2044_p9 = pnand %p2043_p7, %p2037_p2 }
  0x34   : > { %2047 = shalt.err (!%p2044_p9)
}
  0x35   : > { %s2989_s17 = smov 64   ;;  %s2990_s12 = smov 4  }
  0x36   : > { %1896 = dma.hbm_to_vmem [thread:$0]  (!%p2479_p6), %s3026_s4, 256, %s2472_s30, [#allocation11], %s2989_s17, %s2989_s17, %s2990_s12  }
  0x37   : > { %s3028_s7 = sld [smem:[#allocation37_spill]] }
  0x3d   : > { %s2048_s16 = scalar_lea.hbm %s3028_s7, 16 }
  0x3e   : > { %p2049_p5 = scmp.ne.s32.totalorder %s3028_s7, %s2048_s16  ;;  %p2055_p12 = scmp.lt.u32.totalorder %s2048_s16, %s3028_s7 }
  0x40   : > { %p2051_p10 = pnand %p2049_p5, %p2493_p8 }
  0x42   : > { %p2052_p11 = pneg %p2051_p10 }
  0x44   : > { %p2057_p13 = pnand %p2055_p12, %p2052_p11 }
  0x46   : > { %2060 = shalt.err (!%p2057_p13)
}
  0x47   : > { %s2061_s30 = scalar_lea.vmem %s2483_s15, 16  ;;  %s2068_s10 = scalar_lea.vmem %s2483_s15, 32 }
  0x48   : > { %p2062_p0 = scmp.ne.s32.totalorder %s2483_s15, %s2061_s30  ;;  %p2069_p7 = scmp.lt.s32.totalorder %s2483_s15, %s2483_s15 }
  0x49   : > { %p2070_p9 = scmp.lt.s32.totalorder %s2068_s10, %s2061_s30 }
  0x4a   : > { %p2064_p2 = pnand %p2062_p0, %p2493_p8 }
  0x4b   : > { %p2071_p5 = por %p2070_p9, %p2069_p7 }
  0x4c   : > { %p2065_p4 = pneg %p2064_p2 }
  0x4e   : > { %p2072_p10 = pnand %p2071_p5, %p2065_p4 }
  0x50   : > { %2075 = shalt.err (!%p2072_p10)
}
  0x51   : > { %1902 = dma.hbm_to_vmem [thread:$0]  (!%p2479_p6), %s3028_s7, 16, %s2483_s15, [#allocation14]  }
  0x52   : > { %s1681_s24 = sadd.s32 4294967294, %s2348_s26   ;;  %s46_s18 = sadd.s32 1, %s2344_s25 }
  0x53   : > { %p48_p11 = scmp.ge.s32.totalorder %s46_s18, 2  ;;  %s55_s19 = sadd.s32 1, %s2336_s23 }
  0x54   : > { %p62_p12 = scmp.ne.s32.totalorder %s2336_s23, %s2332_s22  ;;  %p63_p13 = scmp.eq.s32.totalorder %s2348_s26, 0 }
  0x55   : > { %s3076_s18 = smov (%p48_p11, %s46_s18), 0  ;;  %p68_p2 = scmp.ne.s32.totalorder %s2332_s22, %s2328_s21 }
  0x56   : > { %3029 = sst [smem:[#allocation29_spill]] %s3076_s18  ;;  %p2549_p0 = por %p63_p13, %p62_p12 }
  0x57   : > { %s50_s15 = ssub.s32 %s2344_s25, %s3076_s18  ;;  %p340_p4 = scmp.eq.s32.totalorder %s2463_s27, 1 }
  0x58   : > { %p53_p7 = scmp.eq.s32.totalorder %s50_s15, 0  ;;  %p2560_p9 = por %p2996_p1, %p68_p2 }
  0x59   : > { %p2564_p5 = por %p340_p4, %p62_p12  ;;  %p346_p10 = scmp.eq.s32.totalorder %s1681_s24, 1 }
  0x5a   : > { %s3031_s14 = scalar_select %p2560_p9, 1, 0 }
  0x5b   : > { %s3032_s16 = scalar_select %p2564_p5, 1, 0 }
  0x5c   : > { %s2569_s30 = scalar_select %p53_p7, %s2336_s23, %s55_s19  }
  0x5d   : > { %3033 = sst [smem:[#allocation30_spill]] %s3032_s16  ;;  %p2571_p11 = por %p346_p10, %p68_p2 }
  0x5e   : > { %3034 = sst [smem:[#allocation31_spill]] %s2569_s30  ;;  %p1928_p13 = scmp.lt.s32.totalorder %s2348_s26, 2 }
  0x5f   : > { %s3035_s10 = scalar_select %p2571_p11, 1, 0 }
  0x60   : > { %s2991_s3 = sand.u32 1, %s2336_s23   ;;  %s2578_s11 = sshll.u32 %s2344_s25, 6 }
  0x61   : > { %3036 = sst [smem:[#allocation32_spill]] %s3035_s10  ;;  %s2582_s15 = sshll.u32 %s2991_s3, 2 }
  0x62   : > { %p2586_p12 = pnand %p1928_p13, %p2549_p0  ;;  %s453_s24 = sand.u32 1, %s2348_s26  }
  0x63   : > { %s3038_s1 = sld [smem:[#allocation33_spill]]  ;;  %s457_s7 = scalar_lea.vmem [#allocation7], %s2582_s15 }
  0x64   : > { %s3037_s17 = scalar_select %p2586_p12, 1, 0 }
  0x65   : > { %s464_s3 = sshll.u32 %s457_s7, 4  ;;  %s2600_s20 = scalar_lea.sflag [#allocation8], %s453_s24  ;;  %s2598_s3 = int_to_ptr.vmem [resolvable:$true] %s464_s3 }
  0x66   : > { %p2606_p2 = pneg %p2586_p12 }
  0x68   : > { %s3039_s25 = scalar_select %p2606_p2, 1, 0 }
  0x69   : > { %s2595_s4 = scalar_lea.hbm %s3038_s1, %s2578_s11  ;;  %s2081_s30 = scalar_lea.hbm %s3038_s1, 128 }
  0x6a   : > { %s2076_s18 = scalar_lea.hbm %s2595_s4, 64  ;;  %p2082_p10 = scmp.lt.u32.totalorder %s2595_s4, %s3038_s1 }
  0x6b   : > { %p2077_p0 = scmp.ne.s32.totalorder %s2595_s4, %s2076_s18  ;;  %p2083_p13 = scmp.lt.u32.totalorder %s2081_s30, %s2076_s18 }
  0x6c   : > { %p2085_p11 = scmp.lt.u32.totalorder %s2076_s18, %s2595_s4 }
  0x6d   : > { %p2079_p4 = pnand %p2606_p2, %p2077_p0  ;;  %p2084_p1 = por %p2083_p13, %p2082_p10 }
  0x6f   : > { %p2080_p7 = pneg %p2079_p4  ;;  %p2086_p5 = por %p2085_p11, %p2084_p1 }
  0x71   : > { %p2087_p9 = pnand %p2086_p5, %p2080_p7 }
  0x73   : > { %2090 = shalt.err (!%p2087_p9)
}
  0x74   : > { %s2091_s24 = scalar_lea.vmem %s2598_s3, 64  ;;  %s2354_s12 = smov [#allocation7]  }
  0x75   : > { %p2092_p0 = scmp.ne.s32.totalorder %s2598_s3, %s2091_s24  ;;  %s2096_s19 = sshll.u32 %s2354_s12, 4  ;;  %s2097_s19 = int_to_ptr.vmem [resolvable:$false] %s2096_s19 }
  0x76   : > { %s2098_s26 = scalar_lea.vmem %s2097_s19, 128  ;;  %p2099_p6 = scmp.lt.s32.totalorder %s2598_s3, %s2097_s19 }
  0x77   : > { %p2094_p4 = pnand %p2092_p0, %p2606_p2  ;;  %p2100_p8 = scmp.lt.s32.totalorder %s2098_s26, %s2091_s24 }
  0x79   : > { %p2095_p3 = pneg %p2094_p4  ;;  %p2101_p10 = por %p2100_p8, %p2099_p6 }
  0x7b   : > { %p2102_p13 = pnand %p2101_p10, %p2095_p3 }
  0x7d   : > { %2105 = shalt.err (!%p2102_p13)
}
  0x7e   : > { %1915 = dma.hbm_to_vmem [thread:$0]  (!%p2586_p12), %s2595_s4, 64, %s2598_s3, %s2600_s20  }
  0x7f   : > { %s2355_s18 = smov [#allocation12]   ;;  %s2356_s7 = smov [#allocation15]  }
  0x80   : > { %s379_s30 = sshll.u32 %s2355_s18, 4  ;;  %s403_s1 = sshll.u32 %s2356_s7, 4  ;;  %s380_s30 = int_to_ptr.vmem [resolvable:$true] %s379_s30  ;;  %s404_s1 = int_to_ptr.vmem [resolvable:$true] %s403_s1 }
  0x81   : > { %s3040_s5 = sld [smem:[#allocation36_spill]]  ;;  %p3041_p3 = scmp.ne.s32.totalorder %s3027_s29, 0 }
  0x87   : > { %s2106_s19 = scalar_lea.hbm %s3040_s5, 16 }
  0x88   : > { %p2107_p1 = scmp.ne.s32.totalorder %s3040_s5, %s2106_s19  ;;  %p2113_p9 = scmp.lt.u32.totalorder %s2106_s19, %s3040_s5 }
  0x8a   : > { %p2109_p6 = pnand %p2107_p1, %p3041_p3 }
  0x8c   : > { %p2110_p8 = pneg %p2109_p6 }
  0x8e   : > { %p2115_p5 = pnand %p2113_p9, %p2110_p8 }
  0x90   : > { %2118 = shalt.err (!%p2115_p5)
}
  0x91   : > { %s2119_s4 = scalar_lea.vmem %s380_s30, 16  ;;  %s2126_s10 = scalar_lea.vmem %s380_s30, 32 }
  0x92   : > { %p2120_p11 = scmp.ne.s32.totalorder %s380_s30, %s2119_s4  ;;  %p2127_p4 = scmp.lt.s32.totalorder %s380_s30, %s380_s30 }
  0x93   : > { %p2128_p10 = scmp.lt.s32.totalorder %s2126_s10, %s2119_s4 }
  0x94   : > { %p2122_p7 = pnand %p2120_p11, %p3041_p3 }
  0x95   : > { %p2129_p13 = por %p2128_p10, %p2127_p4 }
  0x96   : > { %p2123_p0 = pneg %p2122_p7 }
  0x98   : > { %p2130_p12 = pnand %p2129_p13, %p2123_p0 }
  0x9a   : > { %2133 = shalt.err (!%p2130_p12)
}
  0x9b   : > { %p3042_p1 = scmp.ne.s32.totalorder %s3025_s13, 0  ;;  %s2134_s7 = scalar_lea.hbm %s2981_s8, 256 }
  0x9c   : > { %p2135_p6 = scmp.ne.s32.totalorder %s2981_s8, %s2134_s7  ;;  %p2141_p12 = scmp.lt.u32.totalorder %s2134_s7, %s2981_s8 }
  0x9d   : > { %1899 = dma.hbm_to_vmem [thread:$0]  (!%p3042_p1), %s3040_s5, 16, %s380_s30, [#allocation11]  }
  0x9e   : > { %p2137_p8 = pnand %p2135_p6, %p3041_p3 }
  0xa0   : > { %p2138_p9 = pneg %p2137_p8 }
  0xa2   : > { %p2143_p5 = pnand %p2141_p12, %p2138_p9 }
  0xa4   : > { %2146 = shalt.err (!%p2143_p5)
}
  0xa5   : > { %s2147_s4 = scalar_lea.vmem %s404_s1, 256  ;;  %p2155_p4 = scmp.lt.s32.totalorder %s404_s1, %s404_s1 }
  0xa6   : > { %p2148_p11 = scmp.ne.s32.totalorder %s404_s1, %s2147_s4  ;;  %p2156_p10 = scmp.lt.s32.totalorder %s2147_s4, %s2147_s4 }
  0xa8   : > { %p2150_p7 = pnand %p2148_p11, %p3041_p3  ;;  %p2157_p13 = por %p2156_p10, %p2155_p4 }
  0xaa   : > { %p2151_p0 = pneg %p2150_p7 }
  0xac   : > { %p2158_p2 = pnand %p2157_p13, %p2151_p0 }
  0xae   : > { %2161 = shalt.err (!%p2158_p2)
}
  0xaf   : > { %s3043_s30 = smov 4   ;;  %s3044_s10 = smov 64  }
  0xb0   : > { %1905 = dma.hbm_to_vmem [thread:$0]  (!%p3042_p1), %s2981_s8, 256, %s404_s1, [#allocation14], %s3044_s10, %s3044_s10, %s3043_s30  }
  0xb1   : > { %s2357_s21 = smov [#allocation16]   ;;  %s2162_s19 = scalar_lea.hbm %s2982_s9, 16 }
  0xb2   : > { %s417_s16 = sshll.u32 %s2357_s21, 4  ;;  %p2163_p2 = scmp.ne.s32.totalorder %s2982_s9, %s2162_s19  ;;  %s418_s16 = int_to_ptr.vmem [resolvable:$true] %s417_s16 }
  0xb3   : > { %p2169_p9 = scmp.lt.u32.totalorder %s2162_s19, %s2982_s9 }
  0xb4   : > { %p2165_p6 = pnand %p2163_p2, %p3041_p3 }
  0xb6   : > { %p2166_p8 = pneg %p2165_p6 }
  0xb8   : > { %p2171_p12 = pnand %p2169_p9, %p2166_p8 }
  0xba   : > { %2174 = shalt.err (!%p2171_p12)
}
  0xbb   : > { %s2175_s1 = scalar_lea.vmem %s418_s16, 16  ;;  %s2182_s30 = scalar_lea.vmem %s418_s16, 32 }
  0xbc   : > { %p2176_p5 = scmp.ne.s32.totalorder %s418_s16, %s2175_s1  ;;  %p2183_p0 = scmp.lt.s32.totalorder %s418_s16, %s418_s16 }
  0xbd   : > { %p2184_p4 = scmp.lt.s32.totalorder %s2182_s30, %s2175_s1 }
  0xbe   : > { %p2178_p11 = pnand %p2176_p5, %p3041_p3 }
  0xbf   : > { %p2185_p10 = por %p2184_p4, %p2183_p0 }
  0xc0   : > { %p2179_p7 = pneg %p2178_p11 }
  0xc2   : > { %p2186_p13 = pnand %p2185_p10, %p2179_p7 }
  0xc4   : > { %2189 = shalt.err (!%p2186_p13)
}
  0xc5   : > { %1908 = dma.hbm_to_vmem [thread:$0]  (!%p3042_p1), %s2982_s9, 16, %s418_s16, [#allocation17]  }
  0xc6   : > { %s2691_s18 = scalar_lea.hbm %s2973_s0, %s2578_s11  ;;  %s438_s21 = scalar_lea.vmem [#allocation4], %s2582_s15 }
  0xc7   : > { %s446_s7 = sshll.u32 %s438_s21, 4  ;;  %s3045_s13 = sand.u32 1, %s2336_s23   ;;  %s447_s7 = int_to_ptr.vmem [resolvable:$true] %s446_s7 }
  0xc8   : > { %s435_s12 = scalar_lea.sflag [#allocation5], %s3045_s13  ;;  %s2190_s19 = scalar_lea.hbm %s2691_s18, 64 }
  0xc9   : > { %p2191_p3 = scmp.ne.s32.totalorder %s2691_s18, %s2190_s19  ;;  %p3046_p2 = scmp.ne.s32.totalorder %s3039_s25, 0 }
  0xca   : > { %s2195_s26 = scalar_lea.hbm %s2973_s0, 128  ;;  %p2196_p1 = scmp.lt.u32.totalorder %s2691_s18, %s2973_s0 }
  0xcb   : > { %p2193_p6 = pnand %p2191_p3, %p3046_p2  ;;  %p2197_p9 = scmp.lt.u32.totalorder %s2195_s26, %s2190_s19 }
  0xcc   : > { %p2199_p5 = scmp.lt.u32.totalorder %s2190_s19, %s2691_s18 }
  0xcd   : > { %p2194_p8 = pneg %p2193_p6  ;;  %p2198_p12 = por %p2197_p9, %p2196_p1 }
  0xcf   : > { %p2200_p11 = por %p2199_p5, %p2198_p12 }
  0xd1   : > { %p2201_p7 = pnand %p2200_p11, %p2194_p8 }
  0xd3   : > { %2204 = shalt.err (!%p2201_p7)
}
  0xd4   : > { %s2205_s30 = scalar_lea.vmem %s447_s7, 64  ;;  %s2358_s10 = smov [#allocation4]  }
  0xd5   : > { %p2206_p0 = scmp.ne.s32.totalorder %s447_s7, %s2205_s30  ;;  %s2210_s3 = sshll.u32 %s2358_s10, 4  ;;  %s2211_s3 = int_to_ptr.vmem [resolvable:$false] %s2210_s3 }
  0xd6   : > { %s2212_s5 = scalar_lea.vmem %s2211_s3, 128  ;;  %p2213_p13 = scmp.lt.s32.totalorder %s447_s7, %s2211_s3 }
  0xd7   : > { %p2208_p4 = pnand %p2206_p0, %p3046_p2  ;;  %p2214_p3 = scmp.lt.s32.totalorder %s2212_s5, %s2205_s30 }
  0xd9   : > { %p2209_p10 = pneg %p2208_p4  ;;  %p2215_p6 = por %p2214_p3, %p2213_p13 }
  0xdb   : > { %p2216_p1 = pnand %p2215_p6, %p2209_p10 }
  0xdd   : > { %2219 = shalt.err (!%p2216_p1)
}
  0xde   : > { %p3047_p9 = scmp.ne.s32.totalorder %s3037_s17, 0  ;;  %s2717_s13 = scalar_lea.hbm %s2975_s2, %s2578_s11 }
  0xdf   : > { %s475_s19 = scalar_lea.vmem [#allocation9], %s2582_s15  ;;  %s2220_s24 = scalar_lea.hbm %s2717_s13, 64 }
  0xe0   : > { %1912 = dma.hbm_to_vmem [thread:$0]  (!%p3047_p9), %s2691_s18, 64, %s447_s7, %s435_s12  }
  0xe1   : > { %s482_s16 = sshll.u32 %s475_s19, 4  ;;  %p2221_p8 = scmp.ne.s32.totalorder %s2717_s13, %s2220_s24  ;;  %s483_s16 = int_to_ptr.vmem [resolvable:$true] %s482_s16 }
  0xe2   : > { %s2225_s18 = scalar_lea.hbm %s2975_s2, 128  ;;  %p2226_p11 = scmp.lt.u32.totalorder %s2717_s13, %s2975_s2 }
  0xe3   : > { %p2223_p12 = pnand %p2221_p8, %p3046_p2  ;;  %p2227_p7 = scmp.lt.u32.totalorder %s2225_s18, %s2220_s24 }
  0xe4   : > { %p2229_p4 = scmp.lt.u32.totalorder %s2220_s24, %s2717_s13 }
  0xe5   : > { %p2224_p5 = pneg %p2223_p12  ;;  %p2228_p0 = por %p2227_p7, %p2226_p11 }
  0xe7   : > { %p2230_p10 = por %p2229_p4, %p2228_p0 }
  0xe9   : > { %p2231_p13 = pnand %p2230_p10, %p2224_p5 }
  0xeb   : > { %2234 = shalt.err (!%p2231_p13)
}
  0xec   : > { %s2235_s11 = scalar_lea.vmem %s483_s16, 64  ;;  %s2359_s15 = smov [#allocation9]  }
  0xed   : > { %p2236_p3 = scmp.ne.s32.totalorder %s483_s16, %s2235_s11  ;;  %s2240_s1 = sshll.u32 %s2359_s15, 4  ;;  %s2241_s1 = int_to_ptr.vmem [resolvable:$false] %s2240_s1 }
  0xee   : > { %s2242_s30 = scalar_lea.vmem %s2241_s1, 128  ;;  %p2243_p8 = scmp.lt.s32.totalorder %s483_s16, %s2241_s1 }
  0xef   : > { %p2238_p6 = pnand %p2236_p3, %p3046_p2  ;;  %p2244_p12 = scmp.lt.s32.totalorder %s2242_s30, %s2235_s11 }
  0xf1   : > { %p2239_p1 = pneg %p2238_p6  ;;  %p2245_p9 = por %p2244_p12, %p2243_p8 }
  0xf3   : > { %p2246_p7 = pnand %p2245_p9, %p2239_p1 }
  0xf5   : > { %2249 = shalt.err (!%p2246_p7)
}
  0xf6   : > { %p3048_p11 = scmp.ne.s32.totalorder %s3037_s17, 0  ;;  %p3049_p5 = scmp.ne.s32.totalorder %s3024_s28, 0 }
  0xf7   : > { %s2741_s25 = sand.u32 (!%p3049_p5), 1, %s2332_s22   ;;  %p3050_p2 = scmp.ne.s32.totalorder (!%p3049_p5), %s3031_s14, 0 }
  0xf8   : > { %1918 = dma.hbm_to_vmem [thread:$0]  (!%p3048_p11), %s2717_s13, 64, %s483_s16, %s2600_s20  }
  0xf9   : > { %497 = sbr.rel (%p3049_p5) target bundleno = 2426 (0x97a), region = 68  ;;  %s2744_s10 = sshll.u32 (!%p3049_p5), %s2741_s25, 2 }
  0xfa   : > { %s500_s3 = scalar_lea.sflag (!%p3049_p5), [#allocation5], %s2741_s25  ;;  %s503_s5 = scalar_lea.vmem (!%p3049_p5), [#allocation4], %s2744_s10 }
 0x100   : > { %2303 = dma.done.wait (%p3050_p2), %s500_s3, 64  }
 0x101   : > { %2305 = vsyncadd (%p3050_p2), %s500_s3, 4294967232  ;;  %s508_s28 = sand.u32 1, %s2463_s27   ;;  %s512_s20 = scalar_lea.vmem [#allocation7], %s2744_s10 }
 0x102   : > { %s509_s17 = scalar_lea.sflag [#allocation8], %s508_s28 }
 0x103   : > { %2307 = dma.done.wait (%p3050_p2), %s509_s17, 128  }
 0x104   : > { %2309 = vsyncadd (%p3050_p2), %s509_s17, 4294967168  ;;  %s521_s29 = scalar_lea.vmem [#allocation9], %s2744_s10  ;;  %p3051_p9 = scmp.eq.s32.totalorder %s2463_s27, 0 }
 0x106   : > { %2311 = dma.done.wait (%p3051_p9), [#allocation11], 272   ;;  %p3052_p0 = pmov %p3051_p9 }
 0x108   : > { %2313 = vsyncadd (%p3052_p0), [#allocation11], 4294967024  ;;  %p3053_p4 = pmov %p3052_p0 }
 0x109   : > { %p3054_p10 = pmov %p3052_p0 }
 0x10a   : > { %2315 = dma.done.wait (%p3053_p4), [#allocation14], 272  }
 0x10b   : > { %2317 = vsyncadd (%p3054_p10), [#allocation14], 4294967024  ;;  %p3055_p13 = pmov %p3052_p0 }
 0x10c   : > { %p3056_p3 = pmov %p3052_p0 }
 0x10d   : > { %2319 = dma.done.wait (%p3055_p13), [#allocation17], 16  }
 0x10e   : > { %2321 = vsyncadd (%p3056_p3), [#allocation17], 4294967280  ;;  %v2360_v0 = vmov 0.0   ;;  %vm2361_vm0 = vmmov 0   ;;  %v1996_v1 = vld [vmem:[%s2979_s6] sm:$0xff]   ;;  %v1997_v2 = vld [vmem:[%s2979_s6 + $0x8] sm:$0xff]   ;;  %v865_v41 = vlaneseq }
 0x10f   : > { %1769 = vmatprep.subr.bf16.mxu0 %v2360_v0  ;;  %1773 = vmatprep.mubr.msk.bf16.mxu0 %vm2361_vm0, %v2360_v0  ;;  %v1998_v3 = vld [vmem:[#allocation15] sm:$0xff]   ;;  %v1999_v4 = vld [vmem:[#allocation15 + $0x8] sm:$0xff]   ;;  %vm627_vm1 = vcmask 261120   ;;  %v2001_v8 = vld [vmem:[#allocation10 + $0x8] sm:$0xff]   ;;  %vm739_vm2 = vcmask 257024   ;;  %vm817_vm3 = vcmask 64512  }
 0x110   : > { %1777 = vmatprep.subr.bf16.mxu1 %v2360_v0  ;;  %1781 = vmatprep.mubr.msk.bf16.mxu1 %vm2361_vm0, %v2360_v0  ;;  %v603_v5 = vld [vmem:[%s512_s20] sm:$0xf]  ;;  %v2000_v6 = vld [vmem:[#allocation10] sm:$0xff]   ;;  %v671_v7 = vld [vmem:[%s521_s29] sm:$0xf]  ;;  %s2362_s19 = smov 120  }
 0x111   : > { %1770 = vmatpush3.bf16.msra.mxu0 %v1996_v1  ;;  %1778 = vmatpush3.bf16.msra.mxu1 %v1998_v3  ;;  %v743_v9 = vld [vmem:[%s503_s5] sm:$0xf]  ;;  %v1705_v10 = vld [vmem:[#allocation13] ss:$0 sm:$0xff]  ;;  %v1709_v14 = vld [vmem:[#allocation16] ss:$0 sm:$0xff] }
 0x112   : > { %1771 = vmatprep.subr.bf16.mxu0 %v2360_v0  ;;  %1779 = vmatprep.subr.bf16.mxu1 %v2360_v0  ;;  %v1713_v23 = vld [vmem:[#allocation12] ss:$0 sm:$0xff]  ;;  %s3057_s16 = sld [smem:[#allocation26_spill]]  ;;  %s2363_s24 = smov 112   ;;  %vm888_vm4 = vcmask 1043456   ;;  %v866_v43 = vshrl.u32 %v865_v41, 7 }
 0x113   : > { %s3058_s7 = sld [smem:[#allocation34_spill]]  ;;  %v2364_v45 = vmov 0   ;;  %s2365_s11 = smov 104  }
 0x114   : > { %v867_v44 = vsub.s32 0, %v866_v43  ;;  %s3059_s30 = sld [smem:[#allocation38_spill]]  ;;  %s1704_s29 = sshll.u32 %s2741_s25, 3 }
 0x115   : > { %1772 = vmatpush3.bf16.msra.mxu0 %v1997_v2  ;;  %1780 = vmatpush3.bf16.msra.mxu1 %v1999_v4  ;;  %s3060_s13 = sld [smem:[#allocation39_spill]]  ;;  %s2366_s15 = smov [#allocation18]  }
 0x116   : > { %1785 = vmatprep.subr.bf16.mxu0 %v2360_v0  ;;  %1793 = vmatprep.subr.bf16.mxu1 %v2360_v0  ;;  %s3061_s27 = sld [smem:[#allocation30_spill]]  ;;  %s2254_s1 = sshll.u32 %s2366_s15, 4  ;;  %s2255_s1 = int_to_ptr.vmem [resolvable:$false] %s2254_s1 }
 0x117   : > { %s2256_s10 = scalar_lea.vmem %s2255_s1, 256 }
 0x118   : > { %1774 = vmatmul.mubr.msk.bf16.vlgmr.msra.gmra.mrb[0].mxu0 %vm627_vm1, %v603_v5  ;;  %1782 = vmatmul.mubr.msk.bf16.vlgmr.msra.gmra.mrb[0].mxu1 %vm627_vm1, %v671_v7  ;;  %p595_p6 = scmp.lt.s32.totalorder %s3057_s16, 1 }
 0x119   : > { %1786 = vmatpush3.bf16.msra.mxu0 %v2000_v6  ;;  %1789 = vmatprep.mubr.msk.bf16.mxu0 %vm2361_vm0, %v2360_v0 }
 0x11a   : > { %1787 = vmatprep.subr.bf16.mxu0 %v2360_v0  ;;  %1795 = vmatprep.mubr.msk.bf16.mxu1 %vm2361_vm0, %v2360_v0  ;;  %s596_s26 = scalar_select %p595_p6, %s3057_s16, 1 }
 0x11c   : > { %s597_s12 = scalar_lea.vmem %s3058_s7, %s596_s26  ;;  %s3062_s7 = sld [smem:[#allocation40_spill]] }
 0x11d   : > { %1788 = vmatpush3.bf16.msra.mxu0 %v2001_v8  ;;  %v813_v42 = vld [vmem:[%s597_s12] sm:$0x1]  ;;  %p3063_p8 = scmp.ne.s32.totalorder %s3061_s27, 0 }
 0x11e   : > { %1799 = vmatprep.subr.bf16.mxu0 %v2360_v0  ;;  %vm814_vm5 = vcmp.ne.s32.totalorder %v813_v42, 0  ;;  %v934_v8 = vld [vmem:[%s3059_s30] sm:$0xf] }
 0x11f   : > { %v864_v46 = vsel %vm814_vm5, 1, %v2364_v45 }
 0x120   : > { %1790 = vmatmul.mubr.msk.bf16.vlgmr.msra.gmra.mrb[4].mxu0 %vm627_vm1, %v743_v9  ;;  %v2829_v47 = vrot.slane %v864_v46, %v867_v44 }
 0x121   : > { %1801 = vmatprep.mubr.msk.bf16.mxu0 %vm2361_vm0, %v2360_v0 }
 0x122   : > { %vm869_vm6 = vcmp.eq.s32.totalorder %v2829_v47, 1 }
 0x1eb   : > { %v665_v11 = vpop.f32.mrb[0].mxu0  ;;  %v732_v18 = vpop.f32.mrb[0].mxu1 }
 0x1ec   : > { %v666_v12 = vadd.f32 %v1705_v10, %v665_v11  ;;  %v1775_v13 = vpop.f32.mrb[1].mxu0  ;;  %v733_v19 = vadd.f32 %v1709_v14, %v732_v18  ;;  %v1783_v20 = vpop.f32.mrb[1].mxu1 }
 0x1ed   : > { %v668_v15 = vpop.f32.mrb[2].mxu0  ;;  %v735_v21 = vpop.f32.mrb[2].mxu1  ;;  %v1057_v13 = vld [vmem:[%s3059_s30 + $0x4] sm:$0xf] }
 0x1ee   : > { %v738_v16 = vpack.c.bf16 %v666_v12, %v666_v12  ;;  %v1776_v17 = vpop.f32.mrb[3].mxu0  ;;  %v741_v22 = vpack.c.bf16 %v733_v19, %v733_v19  ;;  %v1784_v24 = vpop.f32.mrb[3].mxu1  ;;  %v1108_v12 = vsel %vm888_vm4, %v934_v8, 0  ;;  %v1062_v14 = vsel %vm888_vm4, %v1057_v13, 0 }
 0x1f0   : > { %740 = vst.msk [vmem:[#allocation2] sm:$0xf] %vm739_vm2, %v738_v16  ;;  %742 = vst.msk [vmem:[#allocation3] sm:$0xf] %vm739_vm2, %v741_v22 }
 0x1f3   : > { %v805_v25 = vpop.f32.mrb[4].mxu0 }
 0x1f4   : > { %v806_v26 = vadd.f32 %v1713_v23, %v805_v25  ;;  %v1791_v27 = vpop.f32.mrb[5].mxu0 }
 0x1f5   : > { %v808_v28 = vpop.f32.mrb[6].mxu0 }
 0x1f6   : > { %v811_v29 = vmul.f32 0.35355338, %v806_v26  ;;  %v1792_v30 = vpop.f32.mrb[7].mxu0 }
 0x1f7   : > { %v815_v31 = vld [vmem:[#allocation2] sm:$0xf]  ;;  %v816_v35 = vld [vmem:[#allocation3] sm:$0xf] }
 0x1f8   : > { %v822_v32 = vsel %vm817_vm3, %v815_v31, 0  ;;  %v2801_v33 = vcombine.low %v815_v31, %v815_v31  ;;  %v2803_v34 = vpack.c.bf16 %v811_v29, %v811_v29  ;;  %v2808_v36 = vcombine.low %v816_v35, %v816_v35 }
 0x1f9   : > { %1794 = vmatpush3.bf16.xpose.msra.mxu1 %v822_v32  ;;  %v890_v37 = vsel %vm888_vm4, %v816_v35, 0 }
 0x1fa   : > { %941 = vrot.lane.b32.xlu0 %v2801_v33, %s2362_s19  ;;  %1805 = vmatprep.subr.bf16.mxu1 %v2360_v0 }
 0x1fb   : > { %1800 = vmatpush3.bf16.msra.mxu0 %v890_v37 }
 0x1fc   : > { %1811 = vmatprep.subr.bf16.mxu0 %v2360_v0 }
 0x1fe   : > { %936 = vrot.lane.b32.xlu0 %v2803_v34, %s2362_s19 }
 0x200   : > { %1796 = vmatmul.mubr.msk.bf16.vlgmr.msra.gmra.mrb[4].mxu1 %vm817_vm3, %v2803_v34 }
 0x201   : > { %1807 = vmatprep.mubr.msk.bf16.mxu1 %vm2361_vm0, %v2360_v0 }
 0x202   : > { %1007 = vrot.lane.b32.xlu0 %v2808_v36, %s2362_s19  ;;  %s1733_s19 = sshll.u32 %s3057_s16, 7  ;;  %s1486_s16 = scalar_lea.sflag [#allocation6], %s2741_s25 }
 0x203   : > { %s2923_s12 = scalar_lea.hbm %s3062_s7, %s1733_s19 }
 0x206   : > { %1152 = vrot.lane.b32.xlu0 %v2801_v33, %s2363_s24 }
 0x26c   : > { %v942_v38 = vpop.permute.xlu0 %941 }
 0x26d   : > { %v947_v39 = vsel %vm817_vm3, %v942_v38, 0 }
 0x26e   : > { %1806 = vmatpush3.bf16.xpose.msra.mxu1 %v947_v39 }
 0x26f   : > { %1817 = vmatprep.subr.bf16.mxu1 %v2360_v0 }
 0x270   : > { %v937_v40 = vpop.permute.xlu0 %936 }
 0x274   : > { %v1008_v1 = vpop.permute.xlu0 %1007 }
 0x275   : > { %1808 = vmatmul.mubr.msk.bf16.vlgmr.msra.gmra.mrb[8].mxu1 %vm817_vm3, %v937_v40  ;;  %v1013_v2 = vsel %vm888_vm4, %v1008_v1, 0 }
 0x276   : > { %1819 = vmatprep.mubr.msk.bf16.mxu1 %vm2361_vm0, %v2360_v0  ;;  %1818 = vmatpush3.bf16.msra.mxu1 %v1062_v14 }
 0x277   : > { %1829 = vmatprep.subr.bf16.mxu1 %v2360_v0 }
 0x278   : > { %v1153_v15 = vpop.permute.xlu0 %1152 }
 0x279   : > { %v1158_v42 = vsel %vm817_vm3, %v1153_v15, 0 }
 0x2d3   : > { %v858_v48 = vpop.f32.mrb[4].mxu1 }
 0x2d4   : > { %v870_v49 = vsel %vm869_vm6, %v858_v48, -1e+09  ;;  %v1797_v50 = vpop.f32.mrb[5].mxu1 }
 0x2d5   : > { %v861_v51 = vpop.f32.mrb[6].mxu1  ;;  %v871_v52 = vsel %vm817_vm3, %v870_v49, -inf }
 0x2d6   : > { %872 = vmax.xlane.f32.xlu1 %v871_v52  ;;  %v1798_v53 = vpop.f32.mrb[7].mxu1 }
 0x348   : > { %v983_v54 = vpop.f32.mrb[8].mxu1 }
 0x349   : > { %v989_v55 = vsel %vm869_vm6, %v983_v54, -1e+09  ;;  %v1809_v56 = vpop.f32.mrb[9].mxu1 }
 0x34a   : > { %v986_v57 = vpop.f32.mrb[10].mxu1  ;;  %v990_v58 = vsel %vm817_vm3, %v989_v55, -inf }
 0x34b   : > { %991 = vmax.xlane.f32.xlu1 %v990_v58  ;;  %v1810_v59 = vpop.f32.mrb[11].mxu1 }
 0x363   : > { %v873_v60 = vpop.xlane.xlu1 %872 }
 0x364   : > { %v874_v61 = vsub.f32 %v870_v49, %v873_v60 }
 0x366   : > { %v875_v62 = vmul.f32 1.442695, %v874_v61 }
 0x368   : > { %2004 = vpow2.f32 %v875_v62 }
 0x372   : > { %v2005_v63 = vpop.eup %2004 }
 0x373   : > { %v877_v3 = vsel %vm817_vm3, %v2005_v63, 0.0  ;;  %v884_v4 = vpack.c.bf16 %v2005_v63, %v2005_v63 }
 0x374   : > { %878 = vadd.xlane.f32.xlu0 %v877_v3 }
 0x375   : > { %1802 = vmatmul.mubr.msk.bf16.vlgmr.msra.gmra.mrb[8].mxu0 %vm817_vm3, %v884_v4 }
 0x376   : > { %1812 = vmatpush3.bf16.msra.mxu0 %v1013_v2  ;;  %1813 = vmatprep.mubr.msk.bf16.mxu0 %vm2361_vm0, %v2360_v0 }
 0x377   : > { %1823 = vmatprep.subr.bf16.mxu0 %v2360_v0 }
 0x38a   : > { %1215 = vrot.lane.b32.xlu0 %v2808_v36, %s2363_s24 }
 0x38e   : > { %1313 = vrot.lane.b32.xlu0 %v2803_v34, %s2365_s11 }
 0x3d8   : > { %v992_v5 = vpop.xlane.xlu1 %991 }
 0x3d9   : > { %v993_v6 = vsub.f32 %v989_v55, %v992_v5  ;;  %v1265_v5 = vld [vmem:[%s3059_s30 + $0x8] sm:$0xf] }
 0x3db   : > { %v994_v7 = vmul.f32 1.442695, %v993_v6  ;;  %v1270_v6 = vsel %vm888_vm4, %v1265_v5, 0 }
 0x3dd   : > { %2006 = vpow2.f32 %v994_v7 }
 0x3e7   : > { %v2007_v9 = vpop.eup %2006 }
 0x3e8   : > { %v996_v10 = vsel %vm817_vm3, %v2007_v9, 0.0  ;;  %v1003_v11 = vpack.c.bf16 %v2007_v9, %v2007_v9 }
 0x3e9   : > { %997 = vadd.xlane.f32.xlu1 %v996_v10 }
 0x3ea   : > { %1814 = vmatmul.mubr.msk.bf16.vlgmr.msra.gmra.mrb[12].mxu0 %vm817_vm3, %v1003_v11 }
 0x3eb   : > { %1824 = vmatpush3.bf16.msra.mxu0 %v1108_v12  ;;  %1825 = vmatprep.mubr.msk.bf16.mxu0 %vm2361_vm0, %v2360_v0 }
 0x3ec   : > { %1835 = vmatprep.subr.bf16.mxu0 %v2360_v0 }
 0x3fa   : > { %1150 = vrot.lane.b32.xlu1 %v2803_v34, %s2363_s24  ;;  %s594_s24 = scalar_lea.vmem [#allocation18], %s1704_s29 }
 0x3fb   : > { %s1500_s26 = sshll.u32 %s594_s24, 4  ;;  %s2925_s26 = int_to_ptr.vmem [resolvable:$true] %s1500_s26 }
 0x3fc   : > { %p2257_p11 = scmp.lt.s32.totalorder %s2925_s26, %s2255_s1 }
 0x401   : > { %v879_v16 = vpop.xlane.xlu0 %878 }
 0x402   : > { %2008 = vrcp.f32 %v879_v16 }
 0x405   : > { %v1216_v24 = vpop.permute.xlu0 %1215 }
 0x406   : > { %v1221_v28 = vsel %vm888_vm4, %v1216_v24, 0 }
 0x40c   : > { %v2009_v17 = vpop.eup %2008 }
 0x40d   : > { %v881_v18 = vmul.f32 %v2009_v17, %v879_v16 }
 0x40f   : > { %v882_v19 = vsub.f32 2.0, %v881_v18 }
 0x411   : > { %v883_v20 = vmul.f32 %v2009_v17, %v882_v19 }
 0x448   : > { %v926_v21 = vpop.f32.mrb[8].mxu0 }
 0x449   : > { %v932_v22 = vmul.f32 %v926_v21, %v883_v20  ;;  %v1803_v23 = vpop.f32.mrb[9].mxu0 }
 0x44a   : > { %v929_v25 = vpop.f32.mrb[10].mxu0 }
 0x44b   : > { %v933_v26 = vpack.c.bf16 %v932_v22, %v932_v22  ;;  %v1804_v27 = vpop.f32.mrb[11].mxu0 }
 0x44d   : > { %1826 = vmatmul.mubr.msk.bf16.vlgmr.msra.gmra.mrb[16].mxu0 %vm817_vm3, %v933_v26 }
 0x44e   : > { %1836 = vmatpush3.bf16.msra.mxu0 %v1221_v28  ;;  %1837 = vmatprep.mubr.msk.bf16.mxu0 %vm2361_vm0, %v2360_v0 }
 0x44f   : > { %1847 = vmatprep.subr.bf16.mxu0 %v2360_v0 }
 0x476   : > { %v998_v29 = vpop.xlane.xlu1 %997 }
 0x477   : > { %2010 = vrcp.f32 %v998_v29 }
 0x47a   : > { %v1151_v43 = vpop.permute.xlu1 %1150 }
 0x481   : > { %v2011_v30 = vpop.eup %2010 }
 0x482   : > { %v1000_v31 = vmul.f32 %v2011_v30, %v998_v29 }
 0x484   : > { %v1001_v32 = vsub.f32 2.0, %v1000_v31 }
 0x486   : > { %v1002_v34 = vmul.f32 %v2011_v30, %v1001_v32 }
 0x4bd   : > { %v1049_v35 = vpop.f32.mrb[12].mxu0 }
 0x4be   : > { %v1055_v37 = vmul.f32 %v1049_v35, %v1002_v34  ;;  %v1815_v38 = vpop.f32.mrb[13].mxu0 }
 0x4bf   : > { %v1052_v39 = vpop.f32.mrb[14].mxu0 }
 0x4c0   : > { %v1056_v40 = vpack.c.bf16 %v1055_v37, %v1055_v37  ;;  %v1816_v41 = vpop.f32.mrb[15].mxu0 }
 0x4c2   : > { %1820 = vmatmul.mubr.msk.bf16.vlgmr.msra.gmra.mrb[12].mxu1 %vm817_vm3, %v1056_v40 }
 0x4c3   : > { %1830 = vmatpush3.bf16.xpose.msra.mxu1 %v1158_v42  ;;  %1831 = vmatprep.mubr.msk.bf16.mxu1 %vm2361_vm0, %v2360_v0 }
 0x4c4   : > { %1841 = vmatprep.subr.bf16.mxu1 %v2360_v0 }
 0x4ca   : > { %1832 = vmatmul.mubr.msk.bf16.vlgmr.msra.gmra.mrb[16].mxu1 %vm817_vm3, %v1151_v43 }
 0x4cb   : > { %1843 = vmatprep.mubr.msk.bf16.mxu1 %vm2361_vm0, %v2360_v0  ;;  %1842 = vmatpush3.bf16.msra.mxu1 %v1270_v6 }
 0x4cc   : > { %1853 = vmatprep.subr.bf16.mxu1 %v2360_v0 }
 0x520   : > { %v1144_v44 = vpop.f32.mrb[16].mxu0 }
 0x521   : > { %v1827_v45 = vpop.f32.mrb[17].mxu0 }
 0x522   : > { %v1147_v46 = vpop.f32.mrb[18].mxu0 }
 0x523   : > { %v1828_v48 = vpop.f32.mrb[19].mxu0 }
 0x595   : > { %v1098_v49 = vpop.f32.mrb[12].mxu1 }
 0x596   : > { %v2877_v50 = vadd.f32 %v1144_v44, %v1098_v49  ;;  %v1821_v51 = vpop.f32.mrb[13].mxu1 }
 0x597   : > { %v1101_v52 = vpop.f32.mrb[14].mxu1  ;;  %v1731_v51 = vld [vmem:[%s3060_s13] ss:$0 sm:$0xff] }
 0x598   : > { %v1822_v53 = vpop.f32.mrb[15].mxu1 }
 0x59d   : > { %v1194_v54 = vpop.f32.mrb[16].mxu1 }
 0x59e   : > { %v1200_v55 = vsel %vm869_vm6, %v1194_v54, -1e+09  ;;  %v1833_v56 = vpop.f32.mrb[17].mxu1 }
 0x59f   : > { %v1197_v57 = vpop.f32.mrb[18].mxu1  ;;  %v1201_v58 = vsel %vm817_vm3, %v1200_v55, -inf }
 0x5a0   : > { %1202 = vmax.xlane.f32.xlu1 %v1201_v58  ;;  %v1834_v59 = vpop.f32.mrb[19].mxu1 }
 0x5b1   : > { %1315 = vrot.lane.b32.xlu1 %v2801_v33, %s2365_s11  ;;  %v1314_v33 = vpop.permute.xlu0 %1313 }
 0x62d   : > { %v1203_v60 = vpop.xlane.xlu1 %1202 }
 0x62e   : > { %v1204_v61 = vsub.f32 %v1200_v55, %v1203_v60 }
 0x630   : > { %v1205_v62 = vmul.f32 1.442695, %v1204_v61 }
 0x631   : > { %v1316_v1 = vpop.permute.xlu1 %1315 }
 0x632   : > { %2012 = vpow2.f32 %v1205_v62  ;;  %v1321_v4 = vsel %vm817_vm3, %v1316_v1, 0 }
 0x63c   : > { %v2013_v63 = vpop.eup %2012 }
 0x63d   : > { %v1207_v2 = vsel %vm817_vm3, %v2013_v63, 0.0  ;;  %v1214_v3 = vpack.c.bf16 %v2013_v63, %v2013_v63 }
 0x63e   : > { %1208 = vadd.xlane.f32.xlu0 %v1207_v2 }
 0x63f   : > { %1838 = vmatmul.mubr.msk.bf16.vlgmr.msra.gmra.mrb[20].mxu0 %vm817_vm3, %v1214_v3 }
 0x640   : > { %1848 = vmatpush3.bf16.xpose.msra.mxu0 %v1321_v4  ;;  %1849 = vmatprep.mubr.msk.bf16.mxu0 %vm2361_vm0, %v2360_v0 }
 0x641   : > { %1859 = vmatprep.subr.bf16.mxu0 %v2360_v0 }
 0x647   : > { %1850 = vmatmul.mubr.msk.bf16.vlgmr.msra.gmra.mrb[24].mxu0 %vm817_vm3, %v1314_v33 }
 0x648   : > { %1861 = vmatprep.mubr.msk.bf16.mxu0 %vm2361_vm0, %v2360_v0 }
 0x654   : > { %1378 = vrot.lane.b32.xlu0 %v2808_v36, %s2365_s11  ;;  %s2250_s11 = scalar_lea.vmem %s2925_s26, 128 }
 0x655   : > { %p2251_p1 = scmp.ne.s32.totalorder %s2925_s26, %s2250_s11  ;;  %p2258_p5 = scmp.lt.s32.totalorder %s2256_s10, %s2250_s11 }
 0x657   : > { %p2252_p12 = pnand %p2251_p1, %p3063_p8  ;;  %p2259_p2 = por %p2258_p5, %p2257_p11 }
 0x659   : > { %p2253_p7 = pneg %p2252_p12 }
 0x65b   : > { %p2260_p9 = pnand %p2259_p2, %p2253_p7 }
 0x6cb   : > { %v1209_v7 = vpop.xlane.xlu0 %1208 }
 0x6cc   : > { %2014 = vrcp.f32 %v1209_v7 }
 0x6cf   : > { %v1379_v15 = vpop.permute.xlu0 %1378 }
 0x6d0   : > { %v1384_v18 = vsel %vm888_vm4, %v1379_v15, 0 }
 0x6d6   : > { %v2015_v8 = vpop.eup %2014 }
 0x6d7   : > { %v1211_v9 = vmul.f32 %v2015_v8, %v1209_v7 }
 0x6d9   : > { %v1212_v10 = vsub.f32 2.0, %v1211_v9 }
 0x6db   : > { %v1213_v11 = vmul.f32 %v2015_v8, %v1212_v10 }
 0x712   : > { %v1257_v12 = vpop.f32.mrb[20].mxu0 }
 0x713   : > { %v1263_v13 = vmul.f32 %v1257_v12, %v1213_v11  ;;  %v1839_v14 = vpop.f32.mrb[21].mxu0 }
 0x714   : > { %v1260_v36 = vpop.f32.mrb[22].mxu0 }
 0x715   : > { %v1264_v16 = vpack.c.bf16 %v1263_v13, %v1263_v13  ;;  %v1840_v17 = vpop.f32.mrb[23].mxu0 }
 0x717   : > { %1844 = vmatmul.mubr.msk.bf16.vlgmr.msra.gmra.mrb[20].mxu1 %vm817_vm3, %v1264_v16 }
 0x718   : > { %1854 = vmatpush3.bf16.msra.mxu1 %v1384_v18  ;;  %1855 = vmatprep.mubr.msk.bf16.mxu1 %vm2361_vm0, %v2360_v0  ;;  %v1428_v0 = vld [vmem:[%s3059_s30 + $0xc] sm:$0xf] }
 0x719   : > { %v1433_v47 = vsel %vm888_vm4, %v1428_v0, 0 }
 0x71a   : > { %v1357_v19 = vpop.f32.mrb[24].mxu0  ;;  %1860 = vmatpush3.bf16.msra.mxu0 %v1433_v47 }
 0x71b   : > { %v1363_v20 = vsel %vm869_vm6, %v1357_v19, -1e+09  ;;  %v1851_v21 = vpop.f32.mrb[25].mxu0 }
 0x71c   : > { %v1360_v22 = vpop.f32.mrb[26].mxu0  ;;  %v1364_v23 = vsel %vm817_vm3, %v1363_v20, -inf }
 0x71d   : > { %1365 = vmax.xlane.f32.xlu1 %v1364_v23  ;;  %v1852_v24 = vpop.f32.mrb[27].mxu0 }
 0x7aa   : > { %v1366_v25 = vpop.xlane.xlu1 %1365 }
 0x7ab   : > { %v1367_v26 = vsub.f32 %v1363_v20, %v1366_v25 }
 0x7ad   : > { %v1368_v27 = vmul.f32 1.442695, %v1367_v26 }
 0x7af   : > { %2016 = vpow2.f32 %v1368_v27 }
 0x7b9   : > { %v2017_v28 = vpop.eup %2016 }
 0x7ba   : > { %v1370_v29 = vsel %vm817_vm3, %v2017_v28, 0.0  ;;  %v1377_v30 = vpack.c.bf16 %v2017_v28, %v2017_v28 }
 0x7bb   : > { %1371 = vadd.xlane.f32.xlu1 %v1370_v29 }
 0x7bc   : > { %1856 = vmatmul.mubr.msk.bf16.vlgmr.msra.gmra.mrb[24].mxu1 %vm817_vm3, %v1377_v30 }
 0x7ea   : > { %v1306_v31 = vpop.f32.mrb[20].mxu1 }
 0x7eb   : > { %v1312_v32 = vadd.f32 %v1306_v31, %v2877_v50  ;;  %v1845_v34 = vpop.f32.mrb[21].mxu1 }
 0x7ec   : > { %v1309_v35 = vpop.f32.mrb[22].mxu1 }
 0x7ed   : > { %v1846_v37 = vpop.f32.mrb[23].mxu1 }
 0x848   : > { %v1372_v38 = vpop.xlane.xlu1 %1371 }
 0x849   : > { %2018 = vrcp.f32 %v1372_v38 }
 0x853   : > { %v2019_v39 = vpop.eup %2018 }
 0x854   : > { %v1374_v40 = vmul.f32 %v2019_v39, %v1372_v38 }
 0x856   : > { %v1375_v41 = vsub.f32 2.0, %v1374_v40 }
 0x858   : > { %v1376_v42 = vmul.f32 %v2019_v39, %v1375_v41 }
 0x88f   : > { %v1420_v43 = vpop.f32.mrb[24].mxu1 }
 0x890   : > { %v1426_v44 = vmul.f32 %v1420_v43, %v1376_v42  ;;  %v1857_v45 = vpop.f32.mrb[25].mxu1 }
 0x891   : > { %v1423_v46 = vpop.f32.mrb[26].mxu1 }
 0x892   : > { %v1427_v48 = vpack.c.bf16 %v1426_v44, %v1426_v44  ;;  %v1858_v49 = vpop.f32.mrb[27].mxu1 }
 0x894   : > { %1862 = vmatmul.mubr.msk.bf16.vlgmr.msra.gmra.mrb[28].mxu0 %vm817_vm3, %v1427_v48 }
 0x967   : > { %v1469_v50 = vpop.f32.mrb[28].mxu0 }
 0x968   : > { %v1475_v52 = vadd.f32 %v1469_v50, %v1312_v32  ;;  %v1863_v53 = vpop.f32.mrb[29].mxu0 }
 0x969   : > { %v1472_v54 = vpop.f32.mrb[30].mxu0 }
 0x96a   : > { %v1483_v55 = vadd.f32 %v1731_v51, %v1475_v52  ;;  %v1864_v56 = vpop.f32.mrb[31].mxu0 }
 0x96c   : > { %1484 = vst.msk [vmem:[%s594_s24] sm:$0xff] %vm627_vm1, %v1483_v55 }
 0x96d   : > { %2263 = shalt.err (!%p2260_p9)
}
 0x96e   : > { %s2264_s25 = scalar_lea.hbm %s2923_s12, 128  ;;  %s2268_s28 = scalar_lea.hbm %s3062_s7, 256 }
 0x96f   : > { %p2265_p0 = scmp.ne.s32.totalorder %s2923_s12, %s2264_s25  ;;  %p2269_p13 = scmp.lt.u32.totalorder %s2923_s12, %s3062_s7 }
 0x970   : > { %p2270_p3 = scmp.lt.u32.totalorder %s2268_s28, %s2264_s25  ;;  %p2272_p1 = scmp.lt.u32.totalorder %s2264_s25, %s2923_s12 }
 0x971   : > { %p2266_p4 = pnand %p2265_p0, %p3063_p8 }
 0x972   : > { %p2271_p6 = por %p2270_p3, %p2269_p13 }
 0x973   : > { %p2267_p10 = pneg %p2266_p4 }
 0x974   : > { %p2273_p12 = por %p2272_p1, %p2271_p6 }
 0x976   : > { %p2274_p7 = pnand %p2273_p12, %p2267_p10 }
 0x978   : > { %2277 = shalt.err (!%p2274_p7)
}
 0x979   : > { %1891 = dma.vmem_to_hbm [thread:$0]  (%p3063_p8), %s2925_s26, 128, %s2923_s12, %s1486_s16  }
 0x97a PF: > { %s3064_s29 = sld [smem:[#allocation25_spill]]  ;;  %s3065_s14 = sld [smem:[#allocation32_spill]] }
 0x97b   : > { %s3066_s21 = sld [smem:[#allocation28_spill]] }
 0x980   : > { %s1512_s13 = sand.u32 1, %s3064_s29   ;;  %p3067_p11 = scmp.ne.s32.totalorder %s3065_s14, 0 }
 0x981   : > { %p3068_p5 = scmp.ge.s32.totalorder %s3066_s21, 2  ;;  %s1513_s19 = scalar_lea.sflag [#allocation6], %s1512_s13 }
 0x983   : > { %p1920_p2 = pnand %p3068_p5, %p3067_p11 }
 0x985   : > { %2323 = dma.done.wait (!%p1920_p2), %s1513_s19, 128  }
 0x986   : > { %2325 = vsyncadd (!%p1920_p2), %s1513_s19, 4294967168  ;;  %s34_s26 = sadd.s32 1, %s3066_s21   ;;  %s3069_s27 = sld [smem:[#allocation31_spill]] }
 0x987   : > { %p31_p9 = scmp.ge.s32.totalorder %s34_s26, 4   ;;  %s3070_s24 = sld [smem:[#allocation27_spill]] }
 0x988   : > { %s3071_s25 = sld [smem:[#allocation29_spill]]  ;;  %s3072_s21 = smov %s2332_s22 }
 0x989   : > { %s3073_s22 = smov %s2336_s23  ;;  %33 = sbr.rel (!%p31_p9) target bundleno = 20 (0x14), region = 164 }
 0x98c   : > { %s3074_s23 = smov %s3069_s27 }
 0x990   :  { %1518 = vsyncpa [#allocation5], 1 }
 0x991   :  { %1520 = vsyncpa [#allocation5 + $0x1], 1 }
 0x992   :  { %1521 = vsyncpa [#allocation8], 1 }
 0x993   :  { %1523 = vsyncpa [#allocation8 + $0x1], 1 }
 0x994   :  { %1524 = vsyncpa [#allocation11], 1 }
 0x995   :  { %1525 = vsyncpa [#allocation14], 1 }
 0x996   :  { %1526 = vsyncpa [#allocation17], 1 }
 0x997   :  { %1527 = vsyncpa [#allocation6], 1 }
 0x998   :  { %1529 = vsyncpa [#allocation6 + $0x1], 1 }

</bundles_post_ra>
